<compile_context>
chip_gen: v7x
topology: tpu7x:2x2x1
jax: 0.10.0
libtpu: 0.0.40
codegen_flags: <defaults>
</compile_context>

<pallas_src>
import jax
import jax.numpy as jnp
from jax import lax
from jax.experimental import pallas as pl
from jax.experimental.pallas import tpu as pltpu


def fused_select_kernel(ids_ref, table_t_ref, out_ref):
    """One tile of out^T = (E @ W^T + b)^T @ onehot(ids)^T.

    ids_ref     : (1, tm)              int32 VMEM  -- token ids for this tile
    table_t_ref : (emb_pad, vocab_pad) f32   VMEM  -- fused table, transposed,
                                                      resident across the grid
    out_ref     : (emb_pad, tm)        f32   VMEM  -- transposed output tile
    """
    vocab_pad = table_t_ref.shape[1]
    tm = out_ref.shape[1]

    # onehot^T[v, r] = (ids[r] == v). Padded token slots carry id = -1 and
    # padded vocab rows (>= 1000) are never matched, so both contribute exact
    # zero columns/rows.
    # TODO(synk): nn.Embedding raises on out-of-range ids; here an OOB id
    # simply selects nothing and yields a zero output row.
    row_ids = lax.broadcasted_iota(jnp.int32, (vocab_pad, tm), 0)
    onehot_t = (row_ids == ids_ref[...]).astype(jnp.float32)

    # (emb_pad, vocab_pad) @ (vocab_pad, tm) on the MXU. HIGHEST precision so
    # the f32 table is not rounded through low-precision passes -- the select
    # is then numerically exact (one nonzero per column, rest are +0.0 adds).
    out_ref[...] = jnp.dot(
        table_t_ref[...], onehot_t,
        preferred_element_type=jnp.float32,
        precision=lax.Precision.HIGHEST)


def distributed_model_forward(token_ids, emb_table, w, b, *, tm_max=1024):
    """token_ids: (B, S) int; emb_table: (V, E); w: (E, E) [out, in]; b: (E,).

    Returns (B, S, E) f32 == Linear(Embedding(token_ids)).
    """
    vocab, emb = emb_table.shape
    bsz, seq = token_ids.shape
    n = bsz * seq

    # --- Algebraic fusion of Embedding + Linear (done once, in the wrapper).
    fused = (emb_table.astype(jnp.float32) @ w.T.astype(jnp.float32)
             + b.astype(jnp.float32)[None, :])               # (vocab, emb)
    # TODO(synk): a bf16 fused table / output would halve table DMA and output
    # writeback, but fails the 1e-5 reference check; gate on downstream tolerance.

    # --- Transposed, padded fused table: emb on sublanes (10 -> 16, 1.6x pad),
    #     vocab on lanes / MXU contraction dim (1000 -> 1024). 64 KiB total.
    emb_pad = 8 * pl.cdiv(emb, 8)
    vocab_pad = 128 * pl.cdiv(vocab, 128)
    table_t = (jnp.zeros((emb_pad, vocab_pad), jnp.float32)
               .at[:emb, :vocab].set(fused.T))

    # --- Token tiling along the lane axis of the transposed output.
    tm = min(tm_max, 128 * pl.cdiv(n, 128))
    n_pad = tm * pl.cdiv(n, tm)
    ids = (jnp.full((1, n_pad), -1, jnp.int32)                # pad ids select nothing
           .at[0, :n].set(token_ids.reshape(-1).astype(jnp.int32)))

    out_t = pl.pallas_call(
        fused_select_kernel,
        out_shape=jax.ShapeDtypeStruct((emb_pad, n_pad), jnp.float32),
        grid=(n_pad // tm,),
        in_specs=[
            # Per-tile token ids as a tiled VMEM input (no SMEM scalar prefetch).
            pl.BlockSpec((1, tm), lambda i: (0, i)),
            # Fused table: constant index_map -> VMEM resident across the grid;
            # single-buffered since its block never changes.
            pl.BlockSpec((emb_pad, vocab_pad), lambda i: (0, 0),
                         pipeline_mode=pl.Buffered(1)),
        ],
        out_specs=pl.BlockSpec((emb_pad, tm), lambda i: (0, i)),
        compiler_params=pltpu.CompilerParams(
            dimension_semantics=("parallel",),   # 2 TCs on v7x; free elsewhere
        ),
    )(ids, table_t)

    # Slice padding off and restore (B, S, E). (For latency-critical tiny
    # batches one could bypass Pallas entirely with jnp.take on `fused`; kept
    # on the kernel path here so the kernel is always exercised.)
    return out_t[:emb, :n].T.reshape(bsz, seq, emb)


if __name__ == "__main__":
    key = jax.random.PRNGKey(0)
    k_idx, k_emb, k_w, k_b = jax.random.split(key, 4)

    VOCAB, EMB = 1000, 10
    batch, seq = 2, 8
    token_ids = jax.random.randint(k_idx, (batch, seq), 0, VOCAB, dtype=jnp.int32)

    # Parameter init mimicking PyTorch defaults:
    #   nn.Embedding: N(0, 1); nn.Linear: U(-1/sqrt(in), 1/sqrt(in)).
    emb_table = jax.random.normal(k_emb, (VOCAB, EMB), dtype=jnp.float32)
    bound = 1.0 / (EMB ** 0.5)
    w = jax.random.uniform(k_w, (EMB, EMB), jnp.float32, -bound, bound)  # (out, in)
    b = jax.random.uniform(k_b, (EMB,), jnp.float32, -bound, bound)

    out = distributed_model_forward(token_ids, emb_table, w, b)
    out = jax.block_until_ready(out)

    # Pure-JAX reference: Embedding gather then Linear.
    ref = jnp.take(emb_table, token_ids, axis=0) @ w.T + b
    assert out.shape == (batch, seq, EMB)
    assert jnp.allclose(out, ref, atol=1e-5, rtol=1e-5), "mismatch vs reference"

    print("KERNEL_OK")
</pallas_src>

<mosaic_0001>
module attributes {stable_mosaic.version = 11 : i64} {
  func.func @fused_select_kernel(%arg0: i32, %arg1: memref<1x128xi32, #tpu.memory_space<vmem>>, %arg2: memref<16x1024xf32, #tpu.memory_space<vmem>>, %arg3: memref<16x128xf32, #tpu.memory_space<vmem>>) attributes {dimension_semantics = [#tpu.dimension_semantics<parallel>], iteration_bounds = array<i64: 1>, scalar_prefetch = 0 : i64, scratch_operands = 0 : i64, tpu.core_type = #tpu.core_type<tc>, window_params = [{transform_indices = @transform_0, window_bounds = array<i64: 1, 128>}, {pipeline_mode = #tpu.pipeline_mode<synchronous>, transform_indices = @transform_1, window_bounds = array<i64: 16, 1024>}, {transform_indices = @transform_2, window_bounds = array<i64: 16, 128>}]} {
    %0 = tpu.iota {dimensions = array<i32: 0>} : vector<1024x128xi32>
    %c0 = arith.constant 0 : index
    %c0_0 = arith.constant 0 : index
    %1 = vector.load %arg1[%c0, %c0_0] : memref<1x128xi32, #tpu.memory_space<vmem>>, vector<1x128xi32>
    %2 = vector.broadcast %1 : vector<1x128xi32> to vector<1024x128xi32>
    %3 = arith.cmpi eq, %0, %2 : vector<1024x128xi32>
    %4 = arith.extui %3 : vector<1024x128xi1> to vector<1024x128xi32>
    %5 = arith.sitofp %4 : vector<1024x128xi32> to vector<1024x128xf32>
    %c0_1 = arith.constant 0 : index
    %c0_2 = arith.constant 0 : index
    %6 = vector.load %arg2[%c0_1, %c0_2] : memref<16x1024xf32, #tpu.memory_space<vmem>>, vector<16x1024xf32>
    %cst = arith.constant dense<0.000000e+00> : vector<16x128xf32>
    %7 = tpu.matmul %6, %5, %cst {dimension_numbers = #tpu.dot_dimension_numbers<[1], [0], [0], [1], [0, 0, 1, 1], [], []>, precision = #tpu.contract_precision<fp32>} : vector<16x1024xf32>, vector<1024x128xf32>, vector<16x128xf32> -> vector<16x128xf32>
    %c0_3 = arith.constant 0 : index
    %c0_4 = arith.constant 0 : index
    %8 = vector.load %arg3[%c0_3, %c0_4] : memref<16x128xf32, #tpu.memory_space<vmem>>, vector<16x128xf32>
    tpu.vector_store %arg3[%c0_3, %c0_4], %7 {strides = array<i32>} : memref<16x128xf32, #tpu.memory_space<vmem>>, vector<16x128xf32>,
    return
  }
  func.func @transform_0(%arg0: i32) -> (i32, i32) {
    %c0_i32 = arith.constant 0 : i32
    %c0_i32_0 = arith.constant 0 : i32
    return %c0_i32, %arg0 : i32, i32
  }
  func.func @transform_1(%arg0: i32) -> (i32, i32) {
    %c0_i32 = arith.constant 0 : i32
    %c0_i32_0 = arith.constant 0 : i32
    %c0_i32_1 = arith.constant 0 : i32
    return %c0_i32, %c0_i32_0 : i32, i32
  }
  func.func @transform_2(%arg0: i32) -> (i32, i32) {
    %c0_i32 = arith.constant 0 : i32
    %c0_i32_0 = arith.constant 0 : i32
    return %c0_i32, %arg0 : i32, i32
  }
}

</mosaic_0001>

<bundles_post_ra>
// kernel: tpu_custom_call.1
= control target key start
LH: loop header
LB: loop body
LE: loop exit
PB: predicated region body
PF: predicated region fallthrough
CT: control target
= control target key end

     0   :  { %7 = vsyncpa [#allocation3], 0  ;;  %s10319_s0 = inlined_call_operand.hbm [shape: s32[1,128], index: 0, kind: input, shape index: {}]   ;;  %s10320_s1 = inlined_call_operand.hbm [shape: f32[16,1024], index: 1, kind: input, shape index: {}]   ;;  %s10321_s2 = inlined_call_operand.hbm [shape: f32[16,128], index: 2, kind: output, shape index: {}]  }
   0x1   :  { %8 = vsyncpa [#allocation6], 0 }
   0x2   :  { %9 = vsyncpa [#allocation4], 0  ;;  %s6540_s9 = smov [#allocation2]   ;;  %s6541_s11 = smov [#allocation5]  }
   0x3   :  { %s16_s10 = sshll.u32 %s6540_s9, 4  ;;  %s25_s12 = sshll.u32 %s6541_s11, 4  ;;  %s17_s10 = int_to_ptr.vmem [resolvable:$true] %s16_s10  ;;  %s6564_s12 = int_to_ptr.vmem [resolvable:$true] %s25_s12 }
   0x4   :  { %s6468_s15 = scalar_lea.hbm %s10319_s0, 16 }
   0x5   :  { %p6469_p0 = scmp.ne.s32.totalorder %s10319_s0, %s6468_s15  ;;  %p6472_p1 = scmp.lt.u32.totalorder %s6468_s15, %s10319_s0 }
   0x7   :  { %p6474_p2 = pnand %p6472_p1, %p6469_p0 }
   0x9   :  { %6477 = shalt.err (!%p6474_p2)
}
   0xa   :  { %s6478_s20 = scalar_lea.vmem %s17_s10, 16  ;;  %s6482_s21 = scalar_lea.vmem %s17_s10, 32 }
   0xb   :  { %p6479_p3 = scmp.ne.s32.totalorder %s17_s10, %s6478_s20  ;;  %p6483_p4 = scmp.lt.s32.totalorder %s17_s10, %s17_s10 }
   0xc   :  { %p6484_p5 = scmp.lt.s32.totalorder %s6482_s21, %s6478_s20 }
   0xe   :  { %p6485_p6 = por %p6484_p5, %p6483_p4 }
  0x10   :  { %p6486_p7 = pnand %p6485_p6, %p6479_p3 }
  0x12   :  { %6489 = shalt.err (!%p6486_p7)
}
  0x13   :  { %19 = dma.hbm_to_vmem [thread:$0]  %s10319_s0, 16, %s17_s10, [#allocation3]  }
  0x14   :  { %s6490_s26 = scalar_lea.hbm %s10320_s1, 2048 }
  0x15   :  { %p6491_p8 = scmp.ne.s32.totalorder %s10320_s1, %s6490_s26  ;;  %p6494_p9 = scmp.lt.u32.totalorder %s6490_s26, %s10320_s1 }
  0x17   :  { %p6496_p10 = pnand %p6494_p9, %p6491_p8 }
  0x19   :  { %6499 = shalt.err (!%p6496_p10)
}
  0x1a   :  { %s6500_s3 = scalar_lea.vmem %s6564_s12, 2048  ;;  %p6505_p12 = scmp.lt.s32.totalorder %s6564_s12, %s6564_s12 }
  0x1b   :  { %p6501_p11 = scmp.ne.s32.totalorder %s6564_s12, %s6500_s3  ;;  %p6506_p13 = scmp.lt.s32.totalorder %s6500_s3, %s6500_s3 }
  0x1d   :  { %p6507_p0 = por %p6506_p13, %p6505_p12 }
  0x1f   :  { %p6508_p1 = pnand %p6507_p0, %p6501_p11 }
  0x21   :  { %6511 = shalt.err (!%p6508_p1)
}
  0x22   :  { %s6542_s0 = smov 1024   ;;  %s6543_s4 = smov 64  }
  0x23   :  { %31 = dma.hbm_to_vmem [thread:$0]  %s10320_s1, 2048, %s6564_s12, [#allocation6], %s6542_s0, %s6542_s0, %s6543_s4  }
  0x24   :  { %6534 = dma.done.wait [#allocation3], 16  }
  0x25   :  { %6535 = vsyncadd [#allocation3], 4294967280 }
  0x26   :  { %6536 = dma.done.wait [#allocation6], 2048  }
  0x27   :  { %6537 = vsyncadd [#allocation6], 4294965248  ;;  %v38_v0 = vlaneseq  ;;  %v6608_v13 = vld [vmem:[#allocation2] ss:$0 sm:$0xff]  ;;  %v10346_v18 = vmov 0.0   ;;  %s6546_s1 = smov [#allocation7]  }
  0x28   :  { %v10349_v24 = vmov 1.0|1.0   ;;  %v7565_v58 = vld [vmem:[#allocation2] ss:$0 sm:$0xff]  ;;  %s4251_s7 = sshll.u32 %s6546_s1, 4  ;;  %s4252_s7 = int_to_ptr.vmem [resolvable:$true] %s4251_s7 }
  0x29   :  { %v6595_v1 = vshrl.u32 %v38_v0, 7  ;;  %s6512_s8 = scalar_lea.vmem %s4252_s7, 256  ;;  %p6517_p3 = scmp.lt.s32.totalorder %s4252_s7, %s4252_s7 }
  0x2a   :  { %p6513_p2 = scmp.ne.s32.totalorder %s4252_s7, %s6512_s8  ;;  %p6518_p4 = scmp.lt.s32.totalorder %s6512_s8, %s6512_s8 }
  0x2b   :  { %10694 = vst [vmem:[#allocation11_spill] sm:$0xff] %v6595_v1  ;;  %v55_v2 = vadd.s32 128, %v6595_v1  ;;  %v56_v3 = vadd.s32 136, %v6595_v1  ;;  %v40_v4 = vadd.s32 8, %v6595_v1  ;;  %v57_v5 = vadd.s32 144, %v6595_v1 }
  0x2c   :  { %v58_v6 = vadd.s32 152, %v6595_v1  ;;  %v41_v7 = vadd.s32 16, %v6595_v1  ;;  %v42_v8 = vadd.s32 24, %v6595_v1  ;;  %v59_v9 = vadd.s32 160, %v6595_v1  ;;  %p6519_p5 = por %p6518_p4, %p6517_p3 }
  0x2d   :  { %v60_v10 = vadd.s32 168, %v6595_v1  ;;  %v43_v11 = vadd.s32 32, %v6595_v1  ;;  %v44_v12 = vadd.s32 40, %v6595_v1  ;;  %v6611_v14 = vadd.s32 176, %v6595_v1 }
  0x2e   :  { %v6614_v15 = vadd.s32 184, %v6595_v1  ;;  %v6617_v16 = vadd.s32 48, %v6595_v1  ;;  %v6620_v17 = vadd.s32 56, %v6595_v1  ;;  %vm188_vm0 = vcmp.eq.s32.totalorder %v55_v2, %v6608_v13  ;;  %p6520_p6 = pnand %p6519_p5, %p6513_p2 }
  0x2f   :  { %vm189_vm1 = vcmp.eq.s32.totalorder %v56_v3, %v6608_v13  ;;  %vm172_vm2 = vcmp.eq.s32.totalorder %v6595_v1, %v6608_v13  ;;  %vm173_vm3 = vcmp.eq.s32.totalorder %v40_v4, %v6608_v13  ;;  %v4281_v19 = vsel %vm188_vm0, 1.0, %v10346_v18 }
  0x30   :  { %v4282_v20 = vsel %vm189_vm1, 1.0, %v10346_v18  ;;  %vm6629_vm4 = vmpackc.low %vm189_vm1, %vm188_vm0  ;;  %v4265_v22 = vsel %vm172_vm2, 1.0, %v10346_v18  ;;  %v6635_v23 = vadd.s32 192, %v6595_v1  ;;  %v6640_v25 = vsub.f32 %v4281_v19, %v4281_v19 }
  0x31   :  { %5690 = vmatprep.subr.msk.bf16.mxu0 %vm6629_vm4, %v10349_v24  ;;  %v6642_v26 = vsub.f32 %v4282_v20, %v4282_v20  ;;  %v4266_v27 = vsel %vm173_vm3, 1.0, %v10346_v18  ;;  %vm6645_vm5 = vmpackc.low %vm173_vm3, %vm172_vm2  ;;  %v6649_v29 = vsub.f32 %v4265_v22, %v4265_v22  ;;  %vm190_vm6 = vcmp.eq.s32.totalorder %v57_v5, %v6608_v13 }
  0x32   :  { %5692 = vmatpush3.bf16.msk.msra.mxu0 %vm6645_vm5, %v10349_v24  ;;  %vm191_vm7 = vcmp.eq.s32.totalorder %v58_v6, %v6608_v13  ;;  %vm174_vm8 = vcmp.eq.s32.totalorder %v41_v7, %v6608_v13  ;;  %vm175_vm9 = vcmp.eq.s32.totalorder %v42_v8, %v6608_v13  ;;  %v4283_v30 = vsel %vm190_vm6, 1.0, %v10346_v18 }
  0x33   :  { %v4284_v31 = vsel %vm191_vm7, 1.0, %v10346_v18  ;;  %vm6660_vm10 = vmpackc.low %vm191_vm7, %vm190_vm6  ;;  %v4267_v33 = vsel %vm174_vm8, 1.0, %v10346_v18  ;;  %v4268_v34 = vsel %vm175_vm9, 1.0, %v10346_v18  ;;  %v6666_v35 = vsub.f32 %v4266_v27, %v4266_v27 }
  0x34   :  { %5694 = vmatprep.subr.msk.bf16.mxu0 %vm6660_vm10, %v10349_v24  ;;  %v6671_v36 = vsub.f32 %v4283_v30, %v4283_v30  ;;  %v6673_v37 = vsub.f32 %v4284_v31, %v4284_v31  ;;  %vm6675_vm11 = vmpackc.low %vm175_vm9, %vm174_vm8  ;;  %v6679_v39 = vsub.f32 %v4267_v33, %v4267_v33  ;;  %vm192_vm12 = vcmp.eq.s32.totalorder %v59_v9, %v6608_v13 }
  0x35   :  { %vm193_vm13 = vcmp.eq.s32.totalorder %v60_v10, %v6608_v13  ;;  %vm176_vm14 = vcmp.eq.s32.totalorder %v43_v11, %v6608_v13  ;;  %vm177_vm15 = vcmp.eq.s32.totalorder %v44_v12, %v6608_v13  ;;  %v6688_v40 = vsub.f32 %v4268_v34, %v4268_v34 }
  0x36   :  { %5696 = vmatpush3.bf16.msk.msra.mxu0 %vm6675_vm11, %v10349_v24  ;;  %v4285_v41 = vsel %vm192_vm12, 1.0, %v10346_v18  ;;  %v4286_v42 = vsel %vm193_vm13, 1.0, %v10346_v18  ;;  %vm6692_vm0 = vmpackc.low %vm193_vm13, %vm192_vm12  ;;  %v4269_v44 = vsel %vm176_vm14, 1.0, %v10346_v18  ;;  %v4270_v47 = vsel %vm177_vm15, 1.0, %v10346_v18 }
  0x37   :  { %5698 = vmatprep.subr.msk.bf16.mxu0 %vm6692_vm0, %v10349_v24  ;;  %v6700_v45 = vsub.f32 %v4285_v41, %v4285_v41  ;;  %v6702_v46 = vsub.f32 %v4286_v42, %v4286_v42  ;;  %vm6705_vm1 = vmpackc.low %vm177_vm15, %vm176_vm14  ;;  %v6709_v49 = vsub.f32 %v4269_v44, %v4269_v44  ;;  %v10352_v50 = vand.u32 4294901760, %v6640_v25 }
  0x38   :  { %v10348_v51 = vand.u32 4294901760, %v6642_v26  ;;  %v10343_v52 = vand.u32 4294901760, %v6649_v29  ;;  %v10338_v53 = vand.u32 4294901760, %v6666_v35  ;;  %vm194_vm2 = vcmp.eq.s32.totalorder %v6611_v14, %v6608_v13 }
  0x39   :  { %vm195_vm3 = vcmp.eq.s32.totalorder %v6614_v15, %v6608_v13  ;;  %vm178_vm6 = vcmp.eq.s32.totalorder %v6617_v16, %v6608_v13  ;;  %vm179_vm7 = vcmp.eq.s32.totalorder %v6620_v17, %v6608_v13  ;;  %v815_v54 = vsub.f32 %v6640_v25, %v10352_v50 }
  0x3a   :  { %5700 = vmatpush3.bf16.msk.msra.mxu0 %vm6705_vm1, %v10349_v24  ;;  %v822_v55 = vsub.f32 %v6642_v26, %v10348_v51  ;;  %v703_v56 = vsub.f32 %v6649_v29, %v10343_v52  ;;  %v710_v57 = vsub.f32 %v6666_v35, %v10338_v53  ;;  %vm6738_vm8 = vmpackc.low %vm195_vm3, %vm194_vm2  ;;  %v6742_v59 = vsub.f32 %v4270_v47, %v4270_v47 }
  0x3b   :  { %v4287_v60 = vsel %vm194_vm2, 1.0, %v10346_v18  ;;  %v4288_v61 = vsel %vm195_vm3, 1.0, %v10346_v18  ;;  %5702 = vmatprep.subr.msk.bf16.mxu0 %vm6738_vm8, %v10349_v24  ;;  %v4271_v62 = vsel %vm178_vm6, 1.0, %v10346_v18  ;;  %vm6753_vm9 = vmpackc.low %vm179_vm7, %vm178_vm6  ;;  %v816_v0 = vand.u32 4294901760, %v815_v54 }
  0x3c   :  { %v823_v2 = vand.u32 4294901760, %v822_v55  ;;  %v704_v3 = vand.u32 4294901760, %v703_v56  ;;  %v711_v4 = vand.u32 4294901760, %v710_v57  ;;  %v6757_v5 = vsub.f32 %v4287_v60, %v4287_v60 }
  0x3d   :  { %v6759_v6 = vsub.f32 %v4288_v61, %v4288_v61  ;;  %v4272_v7 = vsel %vm179_vm7, 1.0, %v10346_v18  ;;  %v6765_v8 = vsub.f32 %v4271_v62, %v4271_v62  ;;  %v10337_v11 = vand.u32 4294901760, %v6671_v36 }
  0x3e   :  { %v5721_v9 = vpack.c.bf16 %v823_v2, %v816_v0  ;;  %v5723_v10 = vpack.c.bf16 %v711_v4, %v704_v3  ;;  %5704 = vmatpush3.bf16.msk.msra.mxu0 %vm6753_vm9, %v10349_v24  ;;  %v10335_v12 = vand.u32 4294901760, %v6673_v37  ;;  %v10334_v14 = vand.u32 4294901760, %v6679_v39 }
  0x3f   :  { %v10332_v15 = vand.u32 4294901760, %v6688_v40  ;;  %v64_v16 = vadd.s32 200, %v6595_v1  ;;  %vm196_vm12 = vcmp.eq.s32.totalorder %v6635_v23, %v6608_v13  ;;  %v829_v17 = vsub.f32 %v6671_v36, %v10337_v11 }
  0x40   :  { %5722 = vmatprep.subr.bf16.mxu1 %v5721_v9  ;;  %v836_v19 = vsub.f32 %v6673_v37, %v10335_v12  ;;  %v4289_v20 = vsel %vm196_vm12, 1.0, %v10346_v18  ;;  %v47_v22 = vadd.s32 64, %v6595_v1  ;;  %v6785_v27 = vsub.f32 %v4272_v7, %v4272_v7 }
  0x41   :  { %5724 = vmatpush3.bf16.msra.mxu1 %v5723_v10  ;;  %v717_v23 = vsub.f32 %v6679_v39, %v10334_v14  ;;  %v724_v30 = vsub.f32 %v6688_v40, %v10332_v15  ;;  %vm197_vm13 = vcmp.eq.s32.totalorder %v64_v16, %v6608_v13  ;;  %v830_v31 = vand.u32 4294901760, %v829_v17 }
  0x42   :  { %v837_v33 = vand.u32 4294901760, %v836_v19  ;;  %v4290_v34 = vsel %vm197_vm13, 1.0, %v10346_v18  ;;  %vm6795_vm14 = vmpackc.low %vm197_vm13, %vm196_vm12  ;;  %v10711_v41 = vmov 0  ;;  %v48_v42 = vadd.s32 72, %v6595_v1 }
  0x43   :  { %v10712_v41 = vsel %vm6795_vm14, 4294967295, %v10711_v41  ;;  %v718_v44 = vand.u32 4294901760, %v717_v23  ;;  %v725_v47 = vand.u32 4294901760, %v724_v30  ;;  %5706 = vmatprep.subr.msk.bf16.mxu0 %vm6795_vm14, %v10349_v24  ;;  %v6803_v54 = vsub.f32 %v4289_v20, %v4289_v20 }
  0x44   :  { %vm180_vm15 = vcmp.eq.s32.totalorder %v47_v22, %v6608_v13  ;;  %v5725_v55 = vpack.c.bf16 %v837_v33, %v830_v31  ;;  %vm181_vm2 = vcmp.eq.s32.totalorder %v48_v42, %v6608_v13  ;;  %v10328_v57 = vand.u32 4294901760, %v6700_v45 }
  0x45   :  { %v4273_v56 = vsel %vm180_vm15, 1.0, %v10346_v18  ;;  %v5727_v60 = vpack.c.bf16 %v725_v47, %v718_v44  ;;  %v6809_v61 = vsub.f32 %v4290_v34, %v4290_v34  ;;  %v4274_v62 = vsel %vm181_vm2, 1.0, %v10346_v18  ;;  %vm6812_vm3 = vmpackc.low %vm181_vm2, %vm180_vm15 }
  0x46   :  { %v10713_v0 = vmov 0  ;;  %v10326_v2 = vand.u32 4294901760, %v6702_v46  ;;  %5726 = vmatprep.subr.bf16.mxu1 %v5725_v55  ;;  %5708 = vmatpush3.bf16.msk.msra.mxu0 %vm6812_vm3, %v10349_v24  ;;  %v6820_v3 = vsub.f32 %v4273_v56, %v4273_v56  ;;  %v843_v4 = vsub.f32 %v6700_v45, %v10328_v57 }
  0x47   :  { %v10714_v0 = vsel %vm6812_vm3, 4294967295, %v10713_v0  ;;  %v10324_v7 = vand.u32 4294901760, %v6709_v49  ;;  %v10323_v9 = vand.u32 4294901760, %v6742_v59  ;;  %5728 = vmatpush3.bf16.msra.mxu1 %v5727_v60  ;;  %v65_v16 = vadd.s32 208, %v6595_v1 }
  0x48   :  { %10715 = vst [vmem:[#allocation12_spill] sm:$0xff] %v10714_v0  ;;  %v850_v10 = vsub.f32 %v6702_v46, %v10326_v2  ;;  %v66_v17 = vadd.s32 216, %v6595_v1  ;;  %v49_v19 = vadd.s32 80, %v6595_v1  ;;  %v844_v20 = vand.u32 4294901760, %v843_v4 }
  0x49   :  { %v731_v22 = vsub.f32 %v6709_v49, %v10324_v7  ;;  %v738_v23 = vsub.f32 %v6742_v59, %v10323_v9  ;;  %v50_v30 = vadd.s32 88, %v6595_v1  ;;  %vm198_vm6 = vcmp.eq.s32.totalorder %v65_v16, %v6608_v13 }
  0x4a   :  { %v851_v31 = vand.u32 4294901760, %v850_v10  ;;  %vm199_vm7 = vcmp.eq.s32.totalorder %v66_v17, %v6608_v13  ;;  %vm182_vm12 = vcmp.eq.s32.totalorder %v49_v19, %v6608_v13  ;;  %v4291_v42 = vsel %vm198_vm6, 1.0, %v10346_v18 }
  0x4b   :  { %v732_v33 = vand.u32 4294901760, %v731_v22  ;;  %v739_v34 = vand.u32 4294901760, %v738_v23  ;;  %v4292_v44 = vsel %vm199_vm7, 1.0, %v10346_v18  ;;  %vm6845_vm13 = vmpackc.low %vm199_vm7, %vm198_vm6  ;;  %v10716_v47 = vmov 0 }
  0x4c   :  { %v10717_v47 = vsel %vm6845_vm13, 4294967295, %v10716_v47  ;;  %v6849_v55 = vsub.f32 %v4274_v62, %v4274_v62  ;;  %v5729_v56 = vpack.c.bf16 %v851_v31, %v844_v20  ;;  %5710 = vmatprep.subr.msk.bf16.mxu0 %vm6845_vm13, %v10349_v24  ;;  %v6854_v60 = vsub.f32 %v4291_v42, %v4291_v42 }
  0x4d   :  { %10718 = vst [vmem:[#allocation13_spill] sm:$0xff] %v10717_v47  ;;  %vm183_vm15 = vcmp.eq.s32.totalorder %v50_v30, %v6608_v13  ;;  %v5731_v4 = vpack.c.bf16 %v739_v34, %v732_v33  ;;  %v6857_v10 = vsub.f32 %v4292_v44, %v4292_v44  ;;  %v4275_v16 = vsel %vm182_vm12, 1.0, %v10346_v18 }
  0x4e   :  { %vm6860_vm2 = vmpackc.low %vm183_vm15, %vm182_vm12  ;;  %v10719_v17 = vmov 0  ;;  %v10322_v62 = vand.u32 4294901760, %v6757_v5  ;;  %5730 = vmatprep.subr.bf16.mxu1 %v5729_v56  ;;  %v4276_v19 = vsel %vm183_vm15, 1.0, %v10346_v18  ;;  %v6869_v20 = vsub.f32 %v4275_v16, %v4275_v16 }
  0x4f   :  { %v10720_v17 = vsel %vm6860_vm2, 4294967295, %v10719_v17  ;;  %5712 = vmatpush3.bf16.msk.msra.mxu0 %vm6860_vm2, %v10349_v24  ;;  %v10325_v22 = vand.u32 4294901760, %v6759_v6  ;;  %v10327_v23 = vand.u32 4294901760, %v6765_v8  ;;  %5732 = vmatpush3.bf16.msra.mxu1 %v5731_v4  ;;  %v10331_v31 = vand.u32 4294901760, %v6785_v27 }
  0x50   :  { %10721 = vst [vmem:[#allocation14_spill] sm:$0xff] %v10720_v17  ;;  %v857_v30 = vsub.f32 %v6757_v5, %v10322_v62  ;;  %v67_v33 = vadd.s32 224, %v6595_v1  ;;  %v68_v34 = vadd.s32 232, %v6595_v1  ;;  %v51_v56 = vadd.s32 96, %v6595_v1 }
  0x51   :  { %v864_v42 = vsub.f32 %v6759_v6, %v10325_v22  ;;  %v745_v44 = vsub.f32 %v6765_v8, %v10327_v23  ;;  %v52_v4 = vadd.s32 104, %v6595_v1  ;;  %v752_v62 = vsub.f32 %v6785_v27, %v10331_v31 }
  0x52   :  { %v858_v16 = vand.u32 4294901760, %v857_v30  ;;  %vm200_vm6 = vcmp.eq.s32.totalorder %v67_v33, %v6608_v13  ;;  %vm201_vm7 = vcmp.eq.s32.totalorder %v68_v34, %v6608_v13  ;;  %v10722_v23 = vmov 0 }
  0x53   :  { %v865_v9 = vand.u32 4294901760, %v864_v42  ;;  %v746_v7 = vand.u32 4294901760, %v745_v44  ;;  %v4293_v22 = vsel %vm200_vm6, 1.0, %v10346_v18  ;;  %v4294_v2 = vsel %vm201_vm7, 1.0, %v10346_v18  ;;  %vm6894_vm12 = vmpackc.low %vm201_vm7, %vm200_vm6 }
  0x54   :  { %v10723_v23 = vsel %vm6894_vm12, 4294967295, %v10722_v23  ;;  %v6898_v57 = vsub.f32 %v4276_v19, %v4276_v19  ;;  %v753_v30 = vand.u32 4294901760, %v752_v62  ;;  %5714 = vmatprep.subr.msk.bf16.mxu0 %vm6894_vm12, %v10349_v24  ;;  %v6903_v33 = vsub.f32 %v4293_v22, %v4293_v22 }
  0x55   :  { %10724 = vst [vmem:[#allocation15_spill] sm:$0xff] %v10723_v23  ;;  %vm184_vm15 = vcmp.eq.s32.totalorder %v51_v56, %v6608_v13  ;;  %v5733_v34 = vpack.c.bf16 %v865_v9, %v858_v16  ;;  %vm185_vm2 = vcmp.eq.s32.totalorder %v52_v4, %v6608_v13  ;;  %v10333_v44 = vand.u32 4294901760, %v6803_v54 }
  0x56   :  { %v4277_v42 = vsel %vm184_vm15, 1.0, %v10346_v18  ;;  %v5735_v31 = vpack.c.bf16 %v753_v30, %v746_v7  ;;  %v6909_v15 = vsub.f32 %v4294_v2, %v4294_v2  ;;  %v4278_v62 = vsel %vm185_vm2, 1.0, %v10346_v18  ;;  %vm6912_vm6 = vmpackc.low %vm185_vm2, %vm184_vm15 }
  0x57   :  { %v10725_v19 = vmov 0  ;;  %v10336_v22 = vand.u32 4294901760, %v6809_v61  ;;  %5734 = vmatprep.subr.bf16.mxu1 %v5733_v34  ;;  %5716 = vmatpush3.bf16.msk.msra.mxu0 %vm6912_vm6, %v10349_v24  ;;  %v6920_v9 = vsub.f32 %v4277_v42, %v4277_v42  ;;  %v871_v2 = vsub.f32 %v6803_v54, %v10333_v44 }
  0x58   :  { %v10726_v19 = vsel %vm6912_vm6, 4294967295, %v10725_v19  ;;  %v10341_v7 = vand.u32 4294901760, %v6820_v3  ;;  %v10342_v56 = vand.u32 4294901760, %v6849_v55  ;;  %5736 = vmatpush3.bf16.msra.mxu1 %v5735_v31  ;;  %v69_v16 = vadd.s32 240, %v6595_v1 }
  0x59   :  { %10727 = vst [vmem:[#allocation16_spill] sm:$0xff] %v10726_v19  ;;  %v878_v4 = vsub.f32 %v6809_v61, %v10336_v22  ;;  %v70_v30 = vadd.s32 248, %v6595_v1  ;;  %v53_v34 = vadd.s32 112, %v6595_v1  ;;  %v872_v42 = vand.u32 4294901760, %v871_v2 }
  0x5a   :  { %v759_v44 = vsub.f32 %v6820_v3, %v10341_v7  ;;  %v766_v14 = vsub.f32 %v6849_v55, %v10342_v56  ;;  %v54_v31 = vadd.s32 120, %v6595_v1  ;;  %vm202_vm2 = vcmp.eq.s32.totalorder %v69_v16, %v6608_v13 }
  0x5b   :  { %v879_v12 = vand.u32 4294901760, %v878_v4  ;;  %vm203_vm7 = vcmp.eq.s32.totalorder %v70_v30, %v6608_v13  ;;  %v4295_v2 = vsel %vm202_vm2, 1.0, %v10346_v18  ;;  %v10728_v7 = vmov 0 }
  0x5c   :  { %v760_v22 = vand.u32 4294901760, %v759_v44  ;;  %v767_v11 = vand.u32 4294901760, %v766_v14  ;;  %v4296_v53 = vsel %vm203_vm7, 1.0, %v10346_v18  ;;  %vm6945_vm6 = vmpackc.low %vm203_vm7, %vm202_vm2  ;;  %v6949_v56 = vsub.f32 %v4278_v62, %v4278_v62  ;;  %v557_v14 = vld [vmem:[#allocation5 + $0x8] sm:$0xff] }
  0x5d   :  { %v10729_v7 = vsel %vm6945_vm6, 4294967295, %v10728_v7  ;;  %v5737_v52 = vpack.c.bf16 %v879_v12, %v872_v42  ;;  %5718 = vmatprep.subr.msk.bf16.mxu0 %vm6945_vm6, %v10349_v24  ;;  %v6954_v4 = vsub.f32 %v4295_v2, %v4295_v2  ;;  %vm187_vm15 = vcmp.eq.s32.totalorder %v54_v31, %v6608_v13  ;;  %v556_v42 = vld [vmem:[#allocation5] sm:$0xff] }
  0x5e   :  { %10730 = vst [vmem:[#allocation17_spill] sm:$0xff] %v10729_v7  ;;  %v5739_v44 = vpack.c.bf16 %v767_v11, %v760_v22  ;;  %vm10731_vm12 = vcmp.eq.s32.totalorder %v53_v34, %v6608_v13  ;;  %v4280_v30 = vsel %vm187_vm15, 1.0, %v10346_v18  ;;  %v10733_v12 = vmov 0 }
  0x5f   :  { %v4279_v16 = vsel %vm10731_vm12, 1.0, %v10346_v18  ;;  %vm10732_vm2 = vmmov %vm10731_vm12  ;;  %v10351_v62 = vand.u32 4294901760, %v6854_v60  ;;  %5738 = vmatprep.subr.bf16.mxu1 %v5737_v52  ;;  %v6968_v2 = vsub.f32 %v4296_v53, %v4296_v53  ;;  %v10355_v22 = vand.u32 4294901760, %v6857_v10 }
  0x60   :  { %vm6963_vm7 = vmpackc.low %vm187_vm15, %vm10732_vm2  ;;  %v6973_v11 = vsub.f32 %v4279_v16, %v4279_v16  ;;  %v10360_v34 = vand.u32 4294901760, %v6869_v20  ;;  %5740 = vmatpush3.bf16.msra.mxu1 %v5739_v44  ;;  %v10363_v18 = vand.u32 4294901760, %v6898_v57  ;;  %v6981_v52 = vand.u32 4294901760, %v557_v14 }
  0x61   :  { %v10734_v12 = vsel %vm6963_vm7, 4294967295, %v10733_v12  ;;  %5720 = vmatpush3.bf16.msk.msra.mxu0 %vm6963_vm7, %v10349_v24  ;;  %v885_v31 = vsub.f32 %v6854_v60, %v10351_v62  ;;  %v5753_v53 = vpack.c.bf16 %v6642_v26, %v6640_v25  ;;  %v6985_v51 = vsub.f32 %v4280_v30, %v4280_v30 }
  0x62   :  { %10735 = vst [vmem:[#allocation18_spill] sm:$0xff] %v10734_v12  ;;  %10736 = vst [vmem:[#allocation19_spill] sm:$0xff] %v6981_v52  ;;  %v892_v16 = vsub.f32 %v6857_v10, %v10355_v22  ;;  %v773_v44 = vsub.f32 %v6869_v20, %v10360_v34  ;;  %v6993_v24 = vand.u32 4294901760, %v556_v42  ;;  %v780_v50 = vsub.f32 %v6898_v57, %v10363_v18 }
  0x63   :  { %v886_v62 = vand.u32 4294901760, %v885_v31  ;;  %v6999_v12 = vsub.f32 %v557_v14, %v6981_v52  ;;  %5754 = vmatprep.subr.bf16.mxu0 %v5753_v53  ;;  %v10368_v30 = vand.u32 4294901760, %v6903_v33  ;;  %924 = vmatprep.mubr.f32.mxu1 %v6981_v52  ;;  %v10369_v34 = vand.u32 4294901760, %v6909_v15 }
  0x64   :  { %v893_v22 = vand.u32 4294901760, %v892_v16  ;;  %v774_v7 = vand.u32 4294901760, %v773_v44  ;;  %v7004_v19 = vsub.f32 %v556_v42, %v6993_v24  ;;  %v781_v31 = vand.u32 4294901760, %v780_v50 }
  0x65   :  { %v10370_v23 = vand.u32 4294901760, %v6999_v12  ;;  %v899_v14 = vsub.f32 %v6903_v33, %v10368_v30  ;;  %v10371_v53 = vand.u32 4294901760, %v6920_v9  ;;  %v906_v16 = vsub.f32 %v6909_v15, %v10369_v34 }
  0x66   :  { %10737 = vst [vmem:[#allocation20_spill] sm:$0xff] %v7004_v19  ;;  %v5741_v18 = vpack.c.bf16 %v893_v22, %v886_v62  ;;  %v10376_v17 = vand.u32 4294901760, %v7004_v19  ;;  %v10381_v42 = vand.u32 4294901760, %v6949_v56  ;;  %v5743_v44 = vpack.c.bf16 %v781_v31, %v774_v7 }
  0x67   :  { %v671_v50 = vsub.f32 %v6999_v12, %v10370_v23  ;;  %v900_v52 = vand.u32 4294901760, %v899_v14  ;;  %v787_v30 = vsub.f32 %v6920_v9, %v10371_v53  ;;  %v5755_v22 = vpack.c.bf16 %v6666_v35, %v6649_v29  ;;  %v565_v53 = vld [vmem:[#allocation5 + $0x48] sm:$0xff] }
  0x68   :  { %5742 = vmatprep.subr.bf16.mxu1 %v5741_v18  ;;  %v677_v62 = vsub.f32 %v7004_v19, %v10376_v17  ;;  %v907_v34 = vand.u32 4294901760, %v906_v16  ;;  %v794_v7 = vsub.f32 %v6949_v56, %v10381_v42  ;;  %v5757_v23 = vpack.c.bf16 %v6673_v37, %v6671_v36 }
  0x69   :  { %5744 = vmatpush3.bf16.msra.mxu1 %v5743_v44  ;;  %v672_v31 = vand.u32 4294901760, %v671_v50  ;;  %v788_v14 = vand.u32 4294901760, %v787_v30  ;;  %v10380_v18 = vand.u32 4294901760, %v6954_v4  ;;  %v10379_v19 = vand.u32 4294901760, %v6968_v2 }
  0x6a   :  { %v678_v47 = vand.u32 4294901760, %v677_v62  ;;  %v5745_v0 = vpack.c.bf16 %v907_v34, %v900_v52  ;;  %v795_v17 = vand.u32 4294901760, %v794_v7  ;;  %v10382_v44 = vand.u32 4294901760, %v6973_v11 }
  0x6b   :  { %673 = vmatprep.mubr.f32.mxu0 %v672_v31  ;;  %v913_v16 = vsub.f32 %v6954_v4, %v10380_v18  ;;  %v10390_v30 = vand.u32 4294901760, %v6985_v51  ;;  %v920_v62 = vsub.f32 %v6968_v2, %v10379_v19  ;;  %v7043_v34 = vand.u32 4294901760, %v565_v53 }
  0x6c   :  { %679 = vmatmul.mubr.f32.vlgmr.msra.gmra.mrb[0].mxu0 %v678_v47  ;;  %5746 = vmatprep.subr.bf16.mxu1 %v5745_v0  ;;  %v5747_v50 = vpack.c.bf16 %v795_v17, %v788_v14  ;;  %v5759_v52 = vpack.c.bf16 %v6688_v40, %v6679_v39  ;;  %v801_v31 = vsub.f32 %v6973_v11, %v10382_v44  ;;  %v564_v14 = vld [vmem:[#allocation5 + $0x40] sm:$0xff]  ;;  %v7519_v48 = vadd.s32 464, %v6595_v1 }
  0x6d   :  { %5756 = vmatpush3.bf16.msra.mxu0 %v5755_v22  ;;  %v914_v7 = vand.u32 4294901760, %v913_v16  ;;  %v808_v0 = vsub.f32 %v6985_v51, %v10390_v30  ;;  %v921_v47 = vand.u32 4294901760, %v920_v62  ;;  %v5761_v17 = vpack.c.bf16 %v6702_v46, %v6700_v45 }
  0x6e   :  { %5748 = vmatpush3.bf16.msra.mxu1 %v5747_v50  ;;  %5758 = vmatprep.subr.bf16.mxu0 %v5757_v23  ;;  %v802_v22 = vand.u32 4294901760, %v801_v31  ;;  %v7056_v16 = vsub.f32 %v565_v53, %v7043_v34  ;;  %v5763_v44 = vpack.c.bf16 %v6742_v59, %v6709_v49  ;;  %v5765_v50 = vpack.c.bf16 %v6759_v6, %v6757_v5 }
  0x6f   :  { %v809_v19 = vand.u32 4294901760, %v808_v0  ;;  %v5749_v18 = vpack.c.bf16 %v921_v47, %v914_v7  ;;  %v7062_v23 = vand.u32 4294901760, %v564_v14  ;;  %v10739_v31 = vand.u32 4294901760, %v6640_v25 }
  0x70   :  { %v10389_v62 = vand.u32 4294901760, %v7056_v16  ;;  %v10740_v7 = vand.u32 4294901760, %v6642_v26  ;;  %v10743_v47 = vand.u32 4294901760, %v6671_v36  ;;  %v10745_v25 = vand.u32 4294901760, %v6679_v39 }
  0x71   :  { %5760 = vmatpush3.bf16.msra.mxu0 %v5759_v52  ;;  %v5751_v42 = vpack.c.bf16 %v809_v19, %v802_v22  ;;  %10738 = vst [vmem:[#allocation21_spill] sm:$0xff] %v7062_v23  ;;  %5750 = vmatprep.subr.bf16.mxu1 %v5749_v18  ;;  %v10741_v19 = vand.u32 4294901760, %v6649_v29  ;;  %v10742_v52 = vand.u32 4294901760, %v6666_v35  ;;  %v10744_v22 = vand.u32 4294901760, %v6673_v37 }
  0x72   :  { %5762 = vmatprep.subr.bf16.mxu0 %v5761_v17  ;;  %v7069_v53 = vpack.c.bf16 %v10740_v7, %v10739_v31  ;;  %v7084_v17 = vsub.f32 %v564_v14, %v7062_v23  ;;  %v10746_v26 = vand.u32 4294901760, %v6688_v40  ;;  %v10747_v29 = vand.u32 4294901760, %v6700_v45 }
  0x73   :  { %v7075_v0 = vpack.c.bf16 %v10742_v52, %v10741_v19  ;;  %v7081_v18 = vpack.c.bf16 %v10744_v22, %v10743_v47  ;;  %5752 = vmatpush3.bf16.msra.mxu1 %v5751_v42  ;;  %v10748_v35 = vand.u32 4294901760, %v6702_v46  ;;  %v10749_v36 = vand.u32 4294901760, %v6709_v49 }
  0x74   :  { %v7090_v31 = vpack.c.bf16 %v10746_v26, %v10745_v25  ;;  %v10750_v37 = vand.u32 4294901760, %v6742_v59  ;;  %v10751_v14 = vmov 1.0|1.0   ;;  %v686_v39 = vsub.f32 %v7056_v16, %v10389_v62 }
  0x75   :  { %v7096_v7 = vpack.c.bf16 %v10748_v35, %v10747_v29  ;;  %5786 = vmatprep.subr.msk.bf16.mxu1 %vm6629_vm4, %v10751_v14  ;;  %v10752_v40 = vand.u32 4294901760, %v6757_v5  ;;  %v10753_v45 = vand.u32 4294901760, %v6759_v6  ;;  %v10754_v49 = vand.u32 4294901760, %v6765_v8  ;;  %5764 = vmatpush3.bf16.msra.mxu0 %v5763_v44 }
  0x76   :  { %v7102_v42 = vpack.c.bf16 %v10750_v37, %v10749_v36  ;;  %v10755_v59 = vand.u32 4294901760, %v6785_v27  ;;  %v5767_v52 = vpack.c.bf16 %v6785_v27, %v6765_v8  ;;  %v10388_v47 = vand.u32 4294901760, %v7084_v17  ;;  %926 = vmatmul.mubr.f32.vlgmr.msra.gmra.mrb[0].mxu1 %v6993_v24  ;;  %5766 = vmatprep.subr.bf16.mxu0 %v5765_v50 }
  0x77   :  { %v7114_v46 = vpack.c.bf16 %v10753_v45, %v10752_v40  ;;  %v10756_v22 = vand.u32 4294901760, %v6820_v3  ;;  %v10757_v5 = vand.u32 4294901760, %v6849_v55  ;;  %v5769_v6 = vpack.c.bf16 %v6809_v61, %v6803_v54  ;;  %5788 = vmatpush3.bf16.msk.msra.mxu1 %vm6645_vm5, %v10751_v14  ;;  %931 = vmatprep.mubr.f32.mxu1 %v7043_v34 }
  0x78   :  { %v7120_v19 = vpack.c.bf16 %v10755_v59, %v10754_v49  ;;  %v687_v26 = vand.u32 4294901760, %v686_v39  ;;  %v692_v8 = vsub.f32 %v7084_v17, %v10388_v47  ;;  %5790 = vmatprep.subr.msk.bf16.mxu1 %vm6660_vm10, %v10751_v14  ;;  %v5771_v27 = vpack.c.bf16 %v6849_v55, %v6820_v3  ;;  %v10759_v59 = vld [vmem:[#allocation12_spill] sm:$0xff] }
  0x79   :  { %v7129_v25 = vpack.c.bf16 %v10757_v5, %v10756_v22  ;;  %5768 = vmatpush3.bf16.msra.mxu0 %v5767_v52  ;;  %v5773_v50 = vpack.c.bf16 %v6857_v10, %v6854_v60  ;;  %v5775_v3 = vpack.c.bf16 %v6898_v57, %v6869_v20  ;;  %v10758_v55 = vand.u32 4294901760, %v6999_v12  ;;  %v10760_v22 = vld [vmem:[#allocation13_spill] sm:$0xff] }
  0x7a   :  { %688 = vmatprep.mubr.f32.mxu0 %v687_v26  ;;  %v693_v44 = vand.u32 4294901760, %v692_v8  ;;  %5770 = vmatprep.subr.bf16.mxu0 %v5769_v6  ;;  %v5777_v29 = vpack.c.bf16 %v6909_v15, %v6903_v33  ;;  %v5779_v35 = vpack.c.bf16 %v6949_v56, %v6920_v9  ;;  %v7173_v36 = vadd.s32 384, %v6595_v1 }
  0x7b   :  { %933 = vmatmul.mubr.f32.gmra.mrb[2].mxu1 %v7062_v23  ;;  %v7176_v37 = vadd.s32 392, %v6595_v1  ;;  %v7182_v39 = vadd.s32 256, %v6595_v1  ;;  %v7185_v40 = vadd.s32 264, %v6595_v1  ;;  %v5783_v45 = vpack.c.bf16 %v6985_v51, %v6973_v11 }
  0x7c   :  { %5792 = vmatpush3.bf16.msk.msra.mxu1 %vm6675_vm11, %v10751_v14  ;;  %694 = vmatmul.mubr.f32.gmra.mrb[2].mxu0 %v693_v44  ;;  %vm10384_vm12 = vcmp.eq.s32.totalorder %v7173_v36, %v6608_v13  ;;  %v7197_v49 = vadd.s32 400, %v6595_v1  ;;  %v7207_v52 = vadd.s32 408, %v6595_v1  ;;  %v10761_v5 = vand.u32 4294901760, %v6803_v54 }
  0x7d   :  { %5794 = vmatprep.subr.msk.bf16.mxu1 %vm6692_vm0, %v10751_v14  ;;  %1068 = vmatprep.mubr.f32.mxu0 %v6999_v12  ;;  %v5781_v12 = vpack.c.bf16 %v6968_v2, %v6954_v4  ;;  %vm10385_vm15 = vcmp.eq.s32.totalorder %v7176_v37, %v6608_v13  ;;  %vm10391_vm2 = vcmp.eq.s32.totalorder %v7182_v39, %v6608_v13  ;;  %v10762_v6 = vand.u32 4294901760, %v6809_v61 }
  0x7e   :  { %5772 = vmatpush3.bf16.msra.mxu0 %v5771_v27  ;;  %1184 = vmatprep.mubr.f32.mxu1 %v10758_v55  ;;  %v10763_v8 = vand.u32 4294901760, %v6854_v60  ;;  %v10764_v27 = vand.u32 4294901760, %v6857_v10  ;;  %v7250_v10 = vadd.s32 272, %v6595_v1  ;;  %v7281_v47 = vadd.s32 288, %v6595_v1 }
  0x7f   :  { %5774 = vmatprep.subr.bf16.mxu0 %v5773_v50  ;;  %v7216_v26 = vpack.c.bf16 %v10762_v6, %v10761_v5  ;;  %v10765_v50 = vand.u32 4294901760, %v6869_v20  ;;  %v10768_v20 = vld [vmem:[#allocation14_spill] sm:$0xff]  ;;  %v10774_v5 = vld [vmem:[#allocation15_spill] sm:$0xff]  ;;  %v10776_v6 = vand.u32 4294901760, %v6903_v33  ;;  %v10780_v62 = vand.u32 4294901760, %v6920_v9 }
  0x80   :  { %5796 = vmatpush3.bf16.msk.msra.mxu1 %vm6705_vm1, %v10751_v14  ;;  %v7222_v44 = vpack.c.bf16 %v10764_v27, %v10763_v8  ;;  %v10777_v8 = vand.u32 4294901760, %v6909_v15  ;;  %10779 = vst [vmem:[#allocation15_spill] sm:$0xff] %v7281_v47  ;;  %v10781_v30 = vand.u32 4294901760, %v6949_v56 }
  0x81   :  { %5798 = vmatprep.subr.msk.bf16.mxu1 %vm6738_vm8, %v10751_v14 }
  0x82   :  { %5776 = vmatpush3.bf16.msra.mxu0 %v5775_v3  ;;  %v10766_v3 = vand.u32 4294901760, %v6898_v57  ;;  %v7274_v27 = vpack.c.bf16 %v10777_v8, %v10776_v6  ;;  %v7289_v33 = vpack.c.bf16 %v10781_v30, %v10780_v62  ;;  %v10784_v30 = vld [vmem:[#allocation16_spill] sm:$0xff]  ;;  %v10787_v62 = vand.u32 4294901760, %v6973_v11 }
  0x83   :  { %5778 = vmatprep.subr.bf16.mxu0 %v5777_v29  ;;  %v10767_v29 = vmov 0.0  }
  0x84   :  { %5800 = vmatpush3.bf16.msk.msra.mxu1 %vm6753_vm9, %v10751_v14  ;;  %v7228_v55 = vpack.c.bf16 %v10766_v3, %v10765_v50  ;;  %v4313_v54 = vsel %vm10384_vm12, 1.0, %v10767_v29  ;;  %v4314_v61 = vsel %vm10385_vm15, 1.0, %v10767_v29  ;;  %v4297_v60 = vsel %vm10391_vm2, 1.0, %v10767_v29 }
  0x85   :  { %5802 = vmatprep.subr.msk.bf16.mxu1 %vm6795_vm14, %v10751_v14  ;;  %vm10387_vm14 = vcmp.eq.s32.totalorder %v7185_v40, %v6608_v13  ;;  %vm10393_vm12 = vcmp.eq.s32.totalorder %v7197_v49, %v6608_v13  ;;  %vm10769_vm15 = vnez %v10768_v20  ;;  %v7276_v50 = vsub.f32 %v4313_v54, %v4313_v54 }
  0x86   :  { %5780 = vmatpush3.bf16.msra.mxu0 %v5779_v35  ;;  %v4298_v57 = vsel %vm10387_vm14, 1.0, %v10767_v29  ;;  %v7261_v35 = vadd.s32 416, %v6595_v1  ;;  %vm10775_vm14 = vnez %v10774_v5  ;;  %v7278_v3 = vsub.f32 %v4314_v61, %v4314_v61 }
  0x87   :  { %5782 = vmatprep.subr.bf16.mxu0 %v5781_v12  ;;  %v7264_v12 = vadd.s32 424, %v6595_v1  ;;  %v7291_v15 = vsub.f32 %v4297_v60, %v4297_v60  ;;  %v7293_v6 = vsub.f32 %v4298_v57, %v4298_v57  ;;  %v10782_v54 = vand.u32 4294901760, %v6954_v4 }
  0x88   :  { %5804 = vmatpush3.bf16.msk.msra.mxu1 %vm6812_vm3, %v10751_v14  ;;  %10771 = vst [vmem:[#allocation13_spill] sm:$0xff] %v7261_v35  ;;  %v10783_v61 = vand.u32 4294901760, %v6968_v2  ;;  %v4315_v9 = vsel %vm10393_vm12, 1.0, %v10767_v29  ;;  %vm10395_vm2 = vcmp.eq.s32.totalorder %v7250_v10, %v6608_v13  ;;  %vm224_vm3 = vcmp.eq.s32.totalorder %v7261_v35, %v6608_v13 }
  0x89   :  { %5806 = vmatprep.subr.msk.bf16.mxu1 %vm6845_vm13, %v10751_v14  ;;  %vm10394_vm13 = vcmp.eq.s32.totalorder %v7207_v52, %v6608_v13  ;;  %10772 = vst [vmem:[#allocation14_spill] sm:$0xff] %v7264_v12  ;;  %vm225_vm12 = vcmp.eq.s32.totalorder %v7264_v12, %v6608_v13  ;;  %v7322_v4 = vadd.s32 296, %v6595_v1  ;;  %v7376_v57 = vadd.s32 440, %v6595_v1 }
  0x8a   :  { %5784 = vmatpush3.bf16.msra.mxu0 %v5783_v45  ;;  %v10773_v45 = vld [vmem:[#allocation20_spill] sm:$0xff]  ;;  %v7300_v8 = vpack.c.bf16 %v10783_v61, %v10782_v54  ;;  %v4316_v56 = vsel %vm10394_vm13, 1.0, %v10767_v29  ;;  %vm10404_vm13 = vcmp.eq.s32.totalorder %v7281_v47, %v6608_v13  ;;  %v10789_v54 = vld [vmem:[#allocation19_spill] sm:$0xff]  ;;  %v7340_v61 = vsub.f32 %v4315_v9, %v4315_v9 }
  0x8b   :  { %5818 = vmatprep.subr.bf16.mxu0 %v7069_v53  ;;  %v7258_v53 = vadd.s32 280, %v6595_v1  ;;  %10778 = vst [vmem:[#allocation20_spill] sm:$0xff] %v7276_v50  ;;  %v4317_v9 = vsel %vm224_vm3, 1.0, %v10767_v29  ;;  %v4318_v11 = vsel %vm225_vm12, 1.0, %v10767_v29  ;;  %v10794_v23 = vand.u32 4294901760, %v7278_v3 }
  0x8c   :  { %5808 = vmatpush3.bf16.msk.msra.mxu1 %vm10769_vm15, %v10751_v14  ;;  %v7390_v12 = vadd.s32 304, %v6595_v1  ;;  %v10797_v21 = vand.u32 4294901760, %v7291_v15 }
  0x8d   :  { %10770 = vst [vmem:[#allocation12_spill] sm:$0xff] %v7258_v53  ;;  %1071 = vmatmul.mubr.f32.vlgmr.msra.gmra.mrb[4].mxu0 %v10773_v45  ;;  %5810 = vmatprep.subr.msk.bf16.mxu1 %vm10775_vm14, %v10751_v14  ;;  %vm10785_vm14 = vnez %v10784_v30  ;;  %vm207_vm15 = vcmp.eq.s32.totalorder %v7258_v53, %v6608_v13  ;;  %v1740_v47 = vsub.f32 %v7278_v3, %v10794_v23  ;;  %v10798_v53 = vand.u32 4294901760, %v7293_v6 }
  0x8e   :  { %5820 = vmatpush3.bf16.msra.mxu0 %v7075_v0  ;;  %1077 = vmatprep.mubr.f32.mxu0 %v7056_v16  ;;  %v10788_v0 = vand.u32 4294901760, %v6985_v51  ;;  %v4299_v51 = vsel %vm10395_vm2, 1.0, %v10767_v29  ;;  %vm209_vm2 = vcmp.eq.s32.totalorder %v7322_v4, %v6608_v13  ;;  %v7395_v30 = vsub.f32 %v4317_v9, %v4317_v9 }
  0x8f   :  { %5822 = vmatprep.subr.bf16.mxu0 %v7081_v18  ;;  %v7381_v60 = vsub.f32 %v4299_v51, %v4299_v51  ;;  %v1621_v51 = vsub.f32 %v7291_v15, %v10797_v21  ;;  %v7406_v23 = vsub.f32 %v4318_v11, %v4318_v11  ;;  %v7415_v9 = vadd.s32 312, %v6595_v1 }
  0x90   :  { %5812 = vmatpush3.bf16.msk.msra.mxu1 %vm10785_vm14, %v10751_v14  ;;  %v7332_v18 = vpack.c.bf16 %v10788_v0, %v10787_v62  ;;  %v7349_v0 = vsub.f32 %v4316_v56, %v4316_v56  ;;  %v7373_v56 = vadd.s32 432, %v6595_v1  ;;  %v10793_v62 = vand.u32 4294901760, %v7276_v50  ;;  %10796 = vst [vmem:[#allocation24_spill] sm:$0xff] %v7395_v30 }
  0x91   :  { %1080 = vmatmul.mubr.f32.gmra.mrb[6].mxu0 %v7084_v17  ;;  %5814 = vmatprep.subr.msk.bf16.mxu1 %vm6945_vm6, %v10751_v14  ;;  %10792 = vst [vmem:[#allocation22_spill] sm:$0xff] %v7381_v60  ;;  %10800 = vst [vmem:[#allocation25_spill] sm:$0xff] %v7406_v23  ;;  %v1741_v28 = vand.u32 4294901760, %v1740_v47  ;;  %v7452_v47 = vadd.s32 448, %v6595_v1  ;;  %v10853_v4 = vmov 0 }
  0x92   :  { %5824 = vmatpush3.bf16.msra.mxu0 %v7090_v31  ;;  %1365 = vmatprep.mubr.f32.mxu0 %v10789_v54  ;;  %10790 = vst [vmem:[#allocation19_spill] sm:$0xff] %v7349_v0  ;;  %v4300_v31 = vsel %vm207_vm15, 1.0, %v10767_v29  ;;  %v1733_v2 = vsub.f32 %v7276_v50, %v10793_v62  ;;  %v1628_v62 = vsub.f32 %v7293_v6, %v10798_v53  ;;  %v10799_v50 = vand.u32 4294901760, %v10773_v45 }
  0x93   :  { %5826 = vmatprep.subr.bf16.mxu0 %v7096_v7  ;;  %v4301_v7 = vsel %vm10404_vm13, 1.0, %v10767_v29  ;;  %v7393_v35 = vsub.f32 %v4300_v31, %v4300_v31  ;;  %v10801_v53 = vand.u32 4294901760, %v7056_v16  ;;  %vm10428_vm13 = vcmp.eq.s32.totalorder %v7376_v57, %v6608_v13 }
  0x94   :  { %5816 = vmatpush3.bf16.msk.msra.mxu1 %vm6963_vm7, %v10751_v14  ;;  %v7412_v31 = vsub.f32 %v4301_v7, %v4301_v7  ;;  %v10406_v16 = vand.u32 4294901760, %v7381_v60  ;;  %v1622_v7 = vand.u32 4294901760, %v1621_v51  ;;  %v1629_v21 = vand.u32 4294901760, %v1628_v62 }
  0x95   :  { %5850 = vmatprep.subr.msk.bf16.mxu1 %vm6629_vm4, %v10751_v14  ;;  %10795 = vst [vmem:[#allocation23_spill] sm:$0xff] %v7393_v35  ;;  %vm226_vm4 = vcmp.eq.s32.totalorder %v7373_v56, %v6608_v13  ;;  %v10802_v45 = vand.u32 4294901760, %v7084_v17  ;;  %v7469_v62 = vadd.s32 456, %v6595_v1  ;;  %v567_v56 = vld [vmem:[#allocation5 + $0x58] sm:$0xff] }
  0x96   :  { %5828 = vmatpush3.bf16.msra.mxu0 %v7102_v42  ;;  %v4302_v42 = vsel %vm209_vm2, 1.0, %v10767_v29  ;;  %v4319_v32 = vsel %vm226_vm4, 1.0, %v10767_v29 }
  0x97   :  { %1188 = vmatmul.mubr.f32.vlgmr.msra.gmra.mrb[4].mxu1 %v10799_v50  ;;  %5830 = vmatprep.subr.bf16.mxu0 %v7114_v46  ;;  %v10405_v46 = vand.u32 4294901760, %v7340_v61  ;;  %v1734_v50 = vand.u32 4294901760, %v1733_v2  ;;  %v7435_v11 = vsub.f32 %v4302_v42, %v4302_v42  ;;  %v10803_v2 = vand.u32 4294901760, %v7349_v0 }
  0x98   :  { %5852 = vmatpush3.bf16.msk.msra.mxu1 %vm6645_vm5, %v10751_v14  ;;  %1195 = vmatprep.mubr.f32.mxu1 %v10801_v53  ;;  %vm10408_vm5 = vcmp.eq.s32.totalorder %v7390_v12, %v6608_v13  ;;  %v10410_v53 = vand.u32 4294901760, %v7393_v35  ;;  %v7480_v42 = vadd.s32 320, %v6595_v1 }
  0x99   :  { %5854 = vmatprep.subr.msk.bf16.mxu1 %vm6660_vm10, %v10751_v14  ;;  %vm10407_vm10 = vcmp.eq.s32.totalorder %v7415_v9, %v6608_v13  ;;  %v4303_v17 = vsel %vm10408_vm5, 1.0, %v10767_v29  ;;  %v1754_v51 = vsub.f32 %v7349_v0, %v10803_v2  ;;  %v7474_v38 = vpack.c.bf16 %v1741_v28, %v1734_v50 }
  0x9a   :  { %5832 = vmatpush3.bf16.msra.mxu0 %v7120_v19  ;;  %v4320_v19 = vsel %vm10428_vm13, 1.0, %v10767_v29  ;;  %v7486_v2 = vpack.c.bf16 %v1629_v21, %v1622_v7  ;;  %v1642_v50 = vsub.f32 %v7393_v35, %v10410_v53  ;;  %v4304_v28 = vsel %vm10407_vm10, 1.0, %v10767_v29 }
  0x9b   :  { %1199 = vmatmul.mubr.f32.gmra.mrb[6].mxu1 %v10802_v45  ;;  %5834 = vmatprep.subr.bf16.mxu0 %v7216_v26  ;;  %v1747_v26 = vsub.f32 %v7340_v61, %v10405_v46  ;;  %v7483_v45 = vadd.s32 328, %v6595_v1  ;;  %v7488_v46 = vsub.f32 %v4319_v32, %v4319_v32  ;;  %v7490_v43 = vsub.f32 %v4320_v19, %v4320_v19 }
  0x9c   :  { %5856 = vmatpush3.bf16.msk.msra.mxu1 %vm6675_vm11, %v10751_v14  ;;  %1476 = vmatprep.mubr.f32.mxu1 %v10789_v54  ;;  %v1635_v54 = vsub.f32 %v7381_v60, %v10406_v16  ;;  %v7500_v16 = vsub.f32 %v4303_v17, %v4303_v17  ;;  %vm10425_vm11 = vcmp.eq.s32.totalorder %v7452_v47, %v6608_v13  ;;  %v1755_v21 = vand.u32 4294901760, %v1754_v51 }
  0x9d   :  { %5858 = vmatprep.subr.msk.bf16.mxu1 %vm6692_vm0, %v10751_v14  ;;  %10804 = vst [vmem:[#allocation26_spill] sm:$0xff] %v7488_v46  ;;  %10805 = vst [vmem:[#allocation27_spill] sm:$0xff] %v7490_v43  ;;  %v1748_v7 = vand.u32 4294901760, %v1747_v26  ;;  %vm10424_vm0 = vcmp.eq.s32.totalorder %v7469_v62, %v6608_v13  ;;  %vm10423_vm10 = vcmp.eq.s32.totalorder %v7480_v42, %v6608_v13  ;;  %v1643_v19 = vand.u32 4294901760, %v1642_v50 }
  0x9e   :  { %5836 = vmatpush3.bf16.msra.mxu0 %v7129_v25  ;;  %10806 = vst [vmem:[#allocation28_spill] sm:$0xff] %v7500_v16  ;;  %v10409_v25 = vand.u32 4294901760, %v7395_v30  ;;  %v1636_v32 = vand.u32 4294901760, %v1635_v54  ;;  %vm10422_vm5 = vcmp.eq.s32.totalorder %v7483_v45, %v6608_v13  ;;  %v4321_v17 = vsel %vm10425_vm11, 1.0, %v10767_v29 }
  0x9f   :  { %5838 = vmatprep.subr.bf16.mxu0 %v7222_v44  ;;  %v10413_v44 = vand.u32 4294901760, %v7406_v23  ;;  %v7529_v51 = vsub.f32 %v4304_v28, %v4304_v28  ;;  %v4322_v54 = vsel %vm10424_vm0, 1.0, %v10767_v29  ;;  %v7539_v50 = vadd.s32 472, %v6595_v1 }
  0xa0   :  { %5860 = vmatpush3.bf16.msk.msra.mxu1 %vm6705_vm1, %v10751_v14  ;;  %v4306_v28 = vsel %vm10422_vm5, 1.0, %v10767_v29  ;;  %v7556_v53 = vadd.s32 336, %v6595_v1  ;;  %vm10808_vm1 = vnez %v10712_v41  ;;  %v7561_v63 = vpack.c.bf16 %v1755_v21, %v1748_v7 }
  0xa1   :  { %5862 = vmatprep.subr.msk.bf16.mxu1 %vm6738_vm8, %v10751_v14  ;;  %10807 = vst [vmem:[#allocation29_spill] sm:$0xff] %v7529_v51  ;;  %v7563_v26 = vsub.f32 %v4321_v17, %v4321_v17  ;;  %vm10426_vm8 = vcmp.eq.s32.totalorder %v7519_v48, %v7565_v58  ;;  %v10809_v41 = vand.u32 4294901760, %v7412_v31  ;;  %v10810_v21 = vand.u32 4294901760, %v7435_v11 }
  0xa2   :  { %5840 = vmatpush3.bf16.msra.mxu0 %v7228_v55  ;;  %v1761_v55 = vsub.f32 %v7395_v30, %v10409_v25  ;;  %v1768_v25 = vsub.f32 %v7406_v23, %v10413_v44  ;;  %v7570_v30 = vadd.s32 344, %v6595_v1  ;;  %v7573_v44 = vpack.c.bf16 %v1643_v19, %v1636_v32 }
  0xa3   :  { %5842 = vmatprep.subr.bf16.mxu0 %v7274_v27  ;;  %v4305_v27 = vsel %vm10423_vm10, 1.0, %v10767_v29  ;;  %v7575_v23 = vsub.f32 %v4322_v54, %v4322_v54  ;;  %v1649_v7 = vsub.f32 %v7412_v31, %v10809_v41  ;;  %v1656_v17 = vsub.f32 %v7435_v11, %v10810_v21 }
  0xa4   :  { %5864 = vmatpush3.bf16.msk.msra.mxu1 %vm6753_vm9, %v10751_v14  ;;  %v7584_v35 = vsub.f32 %v4305_v27, %v4305_v27  ;;  %v7586_v60 = vsub.f32 %v4306_v28, %v4306_v28  ;;  %v1762_v0 = vand.u32 4294901760, %v1761_v55  ;;  %vm10427_vm9 = vcmp.eq.s32.totalorder %v7539_v50, %v7565_v58 }
  0xa5   :  { %5866 = vmatprep.subr.msk.bf16.mxu1 %vm10808_vm1, %v10751_v14  ;;  %vm10811_vm1 = vnez %v10759_v59  ;;  %vm10812_vm5 = vcmp.eq.s32.totalorder %v7173_v36, %v6608_v13  ;;  %vm10813_vm10 = vcmp.eq.s32.totalorder %v7176_v37, %v6608_v13  ;;  %v1769_v32 = vand.u32 4294901760, %v1768_v25 }
  0xa6   :  { %5844 = vmatpush3.bf16.msra.mxu0 %v7289_v33  ;;  %v559_v33 = vld [vmem:[#allocation5 + $0x18] sm:$0xff]  ;;  %vm7599_vm0 = vmpackc.low %vm10813_vm10, %vm10812_vm5  ;;  %v4323_v19 = vsel %vm10426_vm8, 1.0, %v10767_v29  ;;  %vm214_vm11 = vcmp.eq.s32.totalorder %v7556_v53, %v7565_v58  ;;  %v10431_v59 = vand.u32 4294901760, %v7488_v46  ;;  %vm10430_vm5 = vcmp.eq.s32.totalorder %v7570_v30, %v7565_v58 }
  0xa7   :  { %5846 = vmatprep.subr.bf16.mxu0 %v7300_v8  ;;  %v10814_v8 = vmov 0  ;;  %v10429_v36 = vand.u32 4294901760, %v7490_v43  ;;  %v7617_v37 = vadd.s32 480, %v6595_v1  ;;  %v7620_v25 = vadd.s32 488, %v6595_v1 }
  0xa8   :  { %5868 = vmatpush3.bf16.msk.msra.mxu1 %vm10811_vm1, %v10751_v14  ;;  %v10815_v8 = vsel %vm7599_vm0, 4294967295, %v10814_v8  ;;  %vm10817_vm1 = vnez %v10760_v22  ;;  %v1650_v54 = vand.u32 4294901760, %v1649_v7  ;;  %v1657_v55 = vand.u32 4294901760, %v1656_v17 }
  0xa9   :  { %10816 = vst [vmem:[#allocation30_spill] sm:$0xff] %v10815_v8  ;;  %5870 = vmatprep.subr.msk.bf16.mxu1 %vm10817_vm1, %v10751_v14  ;;  %v4324_v22 = vsel %vm10427_vm9, 1.0, %v10767_v29  ;;  %v7627_v27 = vand.u32 4294901760, %v559_v33  ;;  %vm10819_vm10 = vcmp.eq.s32.totalorder %v7182_v39, %v6608_v13  ;;  %vm10820_vm1 = vcmp.eq.s32.totalorder %v7185_v40, %v6608_v13 }
  0xaa   :  { %5848 = vmatpush3.bf16.msra.mxu0 %v7332_v18  ;;  %vm7638_vm8 = vmpackc.low %vm10820_vm1, %vm10819_vm10  ;;  %v10821_v18 = vmov 0  ;;  %v7642_v28 = vsub.f32 %v4323_v19, %v4323_v19  ;;  %v4307_v41 = vsel %vm214_vm11, 1.0, %v10767_v29  ;;  %v10435_v7 = vand.u32 4294901760, %v7500_v16 }
  0xab   :  { %10818 = vst [vmem:[#allocation31_spill] sm:$0xff] %v7627_v27  ;;  %5882 = vmatprep.subr.msk.bf16.mxu0 %vm7599_vm0, %v10751_v14  ;;  %v10822_v18 = vsel %vm7638_vm8, 4294967295, %v10821_v18  ;;  %v10434_v21 = vand.u32 4294901760, %v7529_v51  ;;  %vm10824_vm9 = vnez %v10768_v20  ;;  %vm10825_vm10 = vcmp.eq.s32.totalorder %v7197_v49, %v6608_v13 }
  0xac   :  { %10823 = vst [vmem:[#allocation32_spill] sm:$0xff] %v10822_v18  ;;  %5872 = vmatpush3.bf16.msk.msra.mxu1 %vm10824_vm9, %v10751_v14  ;;  %vm10826_vm1 = vcmp.eq.s32.totalorder %v7207_v52, %v6608_v13  ;;  %v10827_v39 = vmov 0  ;;  %v7663_v40 = vpack.c.bf16 %v1769_v32, %v1762_v0  ;;  %v4308_v17 = vsel %vm10430_vm5, 1.0, %v10767_v29 }
  0xad   :  { %vm7659_vm13 = vmpackc.low %vm10826_vm1, %vm10825_vm10  ;;  %v1775_v20 = vsub.f32 %v7488_v46, %v10431_v59  ;;  %v7673_v49 = vsub.f32 %v559_v33, %v7627_v27  ;;  %1367 = vmatmul.mubr.f32.vlgmr.msra.gmra.mrb[8].mxu0 %v6993_v24  ;;  %vm10831_vm9 = vnez %v10774_v5  ;;  %v1782_v52 = vsub.f32 %v7490_v43, %v10429_v36 }
  0xae   :  { %v10828_v39 = vsel %vm7659_vm13, 4294967295, %v10827_v39  ;;  %5874 = vmatprep.subr.msk.bf16.mxu1 %vm10831_vm9, %v10751_v14  ;;  %vm10462_vm10 = vcmp.eq.s32.totalorder %v7617_v37, %v7565_v58  ;;  %vm10458_vm1 = vcmp.eq.s32.totalorder %v7620_v25, %v7565_v58  ;;  %v7687_v0 = vadd.s32 352, %v6595_v1  ;;  %5884 = vmatpush3.bf16.msk.msra.mxu0 %vm7638_vm8, %v10751_v14 }
  0xaf   :  { %10829 = vst [vmem:[#allocation33_spill] sm:$0xff] %v10828_v39  ;;  %10830 = vst [vmem:[#allocation34_spill] sm:$0xff] %v7673_v49  ;;  %1372 = vmatprep.mubr.f32.mxu0 %v7043_v34  ;;  %v7693_v5 = vpack.c.bf16 %v1657_v55, %v1650_v54  ;;  %v7695_v33 = vsub.f32 %v4324_v22, %v4324_v22  ;;  %v7698_v32 = vadd.s32 360, %v6595_v1  ;;  %5886 = vmatprep.subr.msk.bf16.mxu0 %vm7659_vm13, %v10751_v14  ;;  %v10834_v54 = vmov 0 }
  0xb0   :  { %vm10832_vm9 = vcmp.eq.s32.totalorder %v7250_v10, %v6608_v13  ;;  %v7714_v55 = vsub.f32 %v4307_v41, %v4307_v41  ;;  %v7716_v22 = vsub.f32 %v4308_v17, %v4308_v17  ;;  %v1663_v59 = vsub.f32 %v7500_v16, %v10435_v7  ;;  %5876 = vmatpush3.bf16.msk.msra.mxu1 %vm10785_vm14, %v10751_v14  ;;  %v10844_v7 = vld [vmem:[#allocation21_spill] sm:$0xff] }
  0xb1   :  { %vm7710_vm5 = vmpackc.low %vm207_vm15, %vm10832_vm9  ;;  %v1670_v19 = vsub.f32 %v7529_v51, %v10434_v21  ;;  %v10840_v41 = vmov 0  ;;  %v4325_v17 = vsel %vm10462_vm10, 1.0, %v10767_v29  ;;  %v4326_v10 = vsel %vm10458_vm1, 1.0, %v10767_v29  ;;  %1374 = vmatmul.mubr.f32.gmra.mrb[10].mxu0 %v10844_v7  ;;  %5878 = vmatprep.subr.msk.bf16.mxu1 %vm6945_vm6, %v10751_v14 }
  0xb2   :  { %v10835_v54 = vsel %vm7710_vm5, 4294967295, %v10834_v54  ;;  %vm7733_vm15 = vmpackc.low %vm225_vm12, %vm224_vm3  ;;  %v10843_v36 = vand.u32 4294901760, %v7673_v49  ;;  %v1776_v51 = vand.u32 4294901760, %v1775_v20  ;;  %v1783_v16 = vand.u32 4294901760, %v1782_v52  ;;  %5888 = vmatpush3.bf16.msk.msra.mxu0 %vm7710_vm5, %v10751_v14  ;;  %v10846_v52 = vld [vmem:[#allocation15_spill] sm:$0xff] }
  0xb3   :  { %10836 = vst [vmem:[#allocation12_spill] sm:$0xff] %v10835_v54  ;;  %v10841_v41 = vsel %vm7733_vm15, 4294967295, %v10840_v41  ;;  %vm10455_vm14 = vcmp.eq.s32.totalorder %v7687_v0, %v7565_v58  ;;  %vm10454_vm3 = vcmp.eq.s32.totalorder %v7698_v32, %v7565_v58  ;;  %v7765_v18 = vadd.s32 504, %v6595_v1  ;;  %5890 = vmatprep.subr.msk.bf16.mxu0 %vm7733_vm15, %v10751_v14 }
  0xb4   :  { %10842 = vst [vmem:[#allocation16_spill] sm:$0xff] %v10841_v41  ;;  %v1589_v39 = vsub.f32 %v7673_v49, %v10843_v36  ;;  %v7762_v36 = vadd.s32 496, %v6595_v1  ;;  %vm10847_vm6 = vcmp.eq.s32.totalorder %v10846_v52, %v6608_v13  ;;  %v10848_v8 = vmov 0  ;;  %5880 = vmatpush3.bf16.msk.msra.mxu1 %vm6963_vm7, %v10751_v14  ;;  %v558_v52 = vld [vmem:[#allocation5 + $0x10] sm:$0xff] }
  0xb5   :  { %vm7776_vm12 = vmpackc.low %vm209_vm2, %vm10847_vm6  ;;  %v1664_v21 = vand.u32 4294901760, %v1663_v59  ;;  %v1671_v54 = vand.u32 4294901760, %v1670_v19  ;;  %v7780_v43 = vsub.f32 %v4325_v17, %v4325_v17  ;;  %v7782_v46 = vsub.f32 %v4326_v10, %v4326_v10  ;;  %5914 = vmatprep.subr.bf16.mxu1 %v7474_v38 }
  0xb6   :  { %v1590_v20 = vand.u32 4294901760, %v1589_v39  ;;  %v10849_v8 = vsel %vm7776_vm12, 4294967295, %v10848_v8  ;;  %vm10852_vm9 = vcmp.eq.s32.totalorder %v7376_v57, %v6608_v13  ;;  %v4309_v59 = vsel %vm10455_vm14, 1.0, %v10767_v29  ;;  %5892 = vmatpush3.bf16.msk.msra.mxu0 %vm7776_vm12, %v10751_v14 }
  0xb7   :  { %10850 = vst [vmem:[#allocation13_spill] sm:$0xff] %v10849_v8  ;;  %vm7793_vm2 = vmpackc.low %vm10852_vm9, %vm226_vm4  ;;  %v10856_v19 = vand.u32 4294901760, %v7563_v26  ;;  %v10459_v10 = vand.u32 4294901760, %v7584_v35  ;;  %v7807_v57 = vpack.c.bf16 %v1783_v16, %v1776_v51  ;;  %v4310_v39 = vsel %vm10454_vm3, 1.0, %v10767_v29  ;;  %1478 = vmatmul.mubr.f32.vlgmr.msra.gmra.mrb[8].mxu1 %v6993_v24 }
  0xb8   :  { %v10854_v4 = vsel %vm7793_vm2, 4294967295, %v10853_v4  ;;  %1591 = vmatprep.mubr.f32.mxu0 %v1590_v20  ;;  %v10857_v41 = vand.u32 4294901760, %v7575_v23  ;;  %vm10457_vm7 = vcmp.eq.s32.totalorder %v7762_v36, %v7565_v58  ;;  %vm10456_vm4 = vcmp.eq.s32.totalorder %v7765_v18, %v7565_v58  ;;  %5894 = vmatprep.subr.msk.bf16.mxu0 %vm7793_vm2, %v10751_v14 }
  0xb9   :  { %10855 = vst [vmem:[#allocation14_spill] sm:$0xff] %v10854_v4  ;;  %v1789_v17 = vsub.f32 %v7563_v26, %v10856_v19  ;;  %v7817_v19 = vadd.s32 368, %v6595_v1  ;;  %v7827_v16 = vadd.s32 376, %v6595_v1  ;;  %vm10858_vm6 = vcmp.eq.s32.totalorder %v7390_v12, %v6608_v13  ;;  %5916 = vmatpush3.bf16.msra.mxu1 %v7486_v2  ;;  %1483 = vmatprep.mubr.f32.mxu1 %v7043_v34 }
  0xba   :  { %v1796_v49 = vsub.f32 %v7575_v23, %v10857_v41  ;;  %vm10859_vm9 = vcmp.eq.s32.totalorder %v7415_v9, %v6608_v13  ;;  %v10860_v51 = vmov 0  ;;  %v7844_v41 = vpack.c.bf16 %v1671_v54, %v1664_v21  ;;  %5918 = vmatprep.subr.bf16.mxu1 %v7561_v63 }
  0xbb   :  { %vm7840_vm3 = vmpackc.low %vm10859_vm9, %vm10858_vm6  ;;  %v7846_v20 = vsub.f32 %v4309_v59, %v4309_v59  ;;  %v10463_v24 = vand.u32 4294901760, %v7695_v33  ;;  %v7849_v38 = vand.u32 4294901760, %v558_v52  ;;  %vm10864_vm14 = vcmp.eq.s32.totalorder %v7452_v47, %v6608_v13  ;;  %1485 = vmatmul.mubr.f32.gmra.mrb[10].mxu1 %v10844_v7 }
  0xbc   :  { %v10861_v51 = vsel %vm7840_vm3, 4294967295, %v10860_v51  ;;  %vm10865_vm6 = vcmp.eq.s32.totalorder %v7469_v62, %v6608_v13  ;;  %v10866_v12 = vmov 0  ;;  %v7863_v9 = vsub.f32 %v4310_v39, %v4310_v39  ;;  %5896 = vmatpush3.bf16.msk.msra.mxu0 %vm7840_vm3, %v10751_v14  ;;  %1842 = vmatprep.mubr.f32.mxu1 %v7627_v27 }
  0xbd   :  { %10862 = vst [vmem:[#allocation21_spill] sm:$0xff] %v10861_v51  ;;  %10863 = vst [vmem:[#allocation17_spill] sm:$0xff] %v7849_v38  ;;  %v1790_v21 = vand.u32 4294901760, %v1789_v17  ;;  %v1677_v54 = vsub.f32 %v7584_v35, %v10459_v10  ;;  %v10869_v2 = vand.u32 4294901760, %v7586_v60  ;;  %v1797_v47 = vand.u32 4294901760, %v1796_v49  ;;  %5920 = vmatpush3.bf16.msra.mxu1 %v7573_v44 }
  0xbe   :  { %vm7859_vm9 = vmpackc.low %vm10865_vm6, %vm10864_vm14  ;;  %v4327_v62 = vsel %vm10457_vm7, 1.0, %v10767_v29  ;;  %v4328_v59 = vsel %vm10456_vm4, 1.0, %v10767_v29  ;;  %vm10466_vm14 = vcmp.eq.s32.totalorder %v7817_v19, %v7565_v58  ;;  %vm10464_vm6 = vcmp.eq.s32.totalorder %v7827_v16, %v7565_v58  ;;  %5922 = vmatprep.subr.bf16.mxu1 %v7663_v40 }
  0xbf   :  { %v10867_v12 = vsel %vm7859_vm9, 4294967295, %v10866_v12  ;;  %v1684_v34 = vsub.f32 %v7586_v60, %v10869_v2  ;;  %v10870_v63 = vand.u32 4294901760, %v7642_v28  ;;  %v7891_v39 = vand.u32 4294901760, %v567_v56  ;;  %v566_v2 = vld [vmem:[#allocation5 + $0x50] sm:$0xff]  ;;  %5898 = vmatprep.subr.msk.bf16.mxu0 %vm7859_vm9, %v10751_v14 }
  0xc0   :  { %10868 = vst [vmem:[#allocation15_spill] sm:$0xff] %v10867_v12  ;;  %vm10872_vm4 = vcmp.eq.s32.totalorder %v7480_v42, %v6608_v13  ;;  %vm10873_vm7 = vcmp.eq.s32.totalorder %v7483_v45, %v6608_v13  ;;  %v10874_v10 = vmov 0  ;;  %v10465_v7 = vand.u32 4294901760, %v7716_v22 }
  0xc1   :  { %v1803_v49 = vsub.f32 %v7642_v28, %v10870_v63  ;;  %10871 = vst [vmem:[#allocation18_spill] sm:$0xff] %v7891_v39  ;;  %vm7903_vm1 = vmpackc.low %vm10873_vm7, %vm10872_vm4  ;;  %v1810_v63 = vsub.f32 %v7695_v33, %v10463_v24  ;;  %v7912_v17 = vsub.f32 %v558_v52, %v7849_v38  ;;  %vm10876_vm10 = vcmp.eq.s32.totalorder %v7519_v48, %v7565_v58 }
  0xc2   :  { %v10875_v10 = vsel %vm7903_vm1, 4294967295, %v10874_v10  ;;  %vm10877_vm7 = vcmp.eq.s32.totalorder %v7539_v50, %v7565_v58  ;;  %v10878_v13 = vmov 0  ;;  %v1678_v42 = vand.u32 4294901760, %v1677_v54  ;;  %5900 = vmatpush3.bf16.msk.msra.mxu0 %vm7903_vm1, %v10751_v14  ;;  %5924 = vmatpush3.bf16.msra.mxu1 %v7693_v5 }
  0xc3   :  { %vm7922_vm4 = vmpackc.low %vm10877_vm7, %vm10876_vm10  ;;  %v1685_v45 = vand.u32 4294901760, %v1684_v34  ;;  %v7926_v24 = vsub.f32 %v4327_v62, %v4327_v62  ;;  %v7928_v52 = vsub.f32 %v4328_v59, %v4328_v59  ;;  %v4311_v44 = vsel %vm10466_vm14, 1.0, %v10767_v29  ;;  %5926 = vmatprep.subr.bf16.mxu1 %v7807_v57 }
  0xc4   :  { %v10879_v13 = vsel %vm7922_vm4, 4294967295, %v10878_v13  ;;  %v4312_v48 = vsel %vm10464_vm6, 1.0, %v10767_v29  ;;  %v7941_v54 = vand.u32 4294901760, %v566_v2  ;;  %v5929_v34 = vpack.c.bf16 %v1797_v47, %v1790_v21  ;;  %5902 = vmatprep.subr.msk.bf16.mxu0 %vm7922_vm4, %v10751_v14 }
  0xc5   :  { %v1804_v40 = vand.u32 4294901760, %v1803_v49  ;;  %v10881_v62 = vand.u32 4294901760, %v7714_v55  ;;  %v7950_v12 = vsub.f32 %v567_v56, %v7891_v39  ;;  %vm10883_vm10 = vcmp.eq.s32.totalorder %v7570_v30, %v7565_v58 }
  0xc6   :  { %10880 = vst [vmem:[#allocation35_spill] sm:$0xff] %v7941_v54  ;;  %vm7961_vm7 = vmpackc.low %vm10883_vm10, %vm214_vm11  ;;  %v10884_v21 = vmov 0  ;;  %v1811_v47 = vand.u32 4294901760, %v1810_v63  ;;  %v1698_v56 = vsub.f32 %v7716_v22, %v10465_v7  ;;  %vm10887_vm6 = vcmp.eq.s32.totalorder %v7617_v37, %v7565_v58  ;;  %5928 = vmatpush3.bf16.msra.mxu1 %v7844_v41 }
  0xc7   :  { %v1691_v59 = vsub.f32 %v7714_v55, %v10881_v62  ;;  %10882 = vst [vmem:[#allocation36_spill] sm:$0xff] %v7950_v12  ;;  %v10885_v21 = vsel %vm7961_vm7, 4294967295, %v10884_v21  ;;  %v10886_v62 = vand.u32 4294901760, %v7780_v43  ;;  %vm10888_vm11 = vcmp.eq.s32.totalorder %v7620_v25, %v7565_v58  ;;  %5904 = vmatpush3.bf16.msk.msra.mxu0 %vm7961_vm7, %v10751_v14  ;;  %5930 = vmatprep.subr.bf16.mxu1 %v5929_v34 }
  0xc8   :  { %vm7979_vm10 = vmpackc.low %vm10888_vm11, %vm10887_vm6  ;;  %v10889_v30 = vmov 0  ;;  %v7983_v53 = vsub.f32 %v4311_v44, %v4311_v44  ;;  %v7985_v63 = vsub.f32 %v4312_v48, %v4312_v48  ;;  %v10891_v5 = vand.u32 4294901760, %v7782_v46 }
  0xc9   :  { %v1817_v50 = vsub.f32 %v7780_v43, %v10886_v62  ;;  %v10890_v30 = vsel %vm7979_vm10, 4294967295, %v10889_v30  ;;  %v7994_v25 = vsub.f32 %v566_v2, %v7941_v54  ;;  %v10474_v49 = vand.u32 4294901760, %v7926_v24  ;;  %5906 = vmatprep.subr.msk.bf16.mxu0 %vm7979_vm10, %v10751_v14 }
  0xca   :  { %v1824_v37 = vsub.f32 %v7782_v46, %v10891_v5  ;;  %v10473_v44 = vand.u32 4294901760, %v7928_v52  ;;  %v5931_v48 = vpack.c.bf16 %v1685_v45, %v1678_v42  ;;  %v1692_v7 = vand.u32 4294901760, %v1691_v59 }
  0xcb   :  { %10892 = vst [vmem:[#allocation37_spill] sm:$0xff] %v7994_v25  ;;  %v10475_v62 = vand.u32 4294901760, %v7950_v12  ;;  %vm10893_vm6 = vcmp.eq.s32.totalorder %v7687_v0, %v7565_v58  ;;  %vm10894_vm11 = vcmp.eq.s32.totalorder %v7698_v32, %v7565_v58  ;;  %v10895_v57 = vmov 0 }
  0xcc   :  { %vm8011_vm14 = vmpackc.low %vm10894_vm11, %vm10893_vm6  ;;  %v5933_v2 = vpack.c.bf16 %v1811_v47, %v1804_v40  ;;  %v1699_v5 = vand.u32 4294901760, %v1698_v56  ;;  %v10898_v42 = vand.u32 4294901760, %v7912_v17  ;;  %v1818_v59 = vand.u32 4294901760, %v1817_v50  ;;  %5932 = vmatpush3.bf16.msra.mxu1 %v5931_v48 }
  0xcd   :  { %v10896_v57 = vsel %vm8011_vm14, 4294967295, %v10895_v57  ;;  %vm10899_vm10 = vcmp.eq.s32.totalorder %v7762_v36, %v7565_v58  ;;  %vm10900_vm7 = vcmp.eq.s32.totalorder %v7765_v18, %v7565_v58  ;;  %v10901_v0 = vmov 0  ;;  %5908 = vmatpush3.bf16.msk.msra.mxu0 %vm8011_vm14, %v10751_v14 }
  0xce   :  { %10897 = vst [vmem:[#allocation38_spill] sm:$0xff] %v10896_v57  ;;  %v1595_v45 = vsub.f32 %v7912_v17, %v10898_v42  ;;  %vm8025_vm4 = vmpackc.low %vm10900_vm7, %vm10899_vm10  ;;  %v10904_v32 = vand.u32 4294901760, %v7846_v20  ;;  %v10905_v47 = vand.u32 4294901760, %v7863_v9  ;;  %v10482_v41 = vand.u32 4294901760, %v7983_v53  ;;  %5934 = vmatprep.subr.bf16.mxu1 %v5933_v2 }
  0xcf   :  { %v10902_v0 = vsel %vm8025_vm4, 4294967295, %v10901_v0  ;;  %v1825_v36 = vand.u32 4294901760, %v1824_v37  ;;  %v1831_v42 = vsub.f32 %v7926_v24, %v10474_v49  ;;  %5910 = vmatprep.subr.msk.bf16.mxu0 %vm8025_vm4, %v10751_v14  ;;  %vm10906_vm7 = vcmp.eq.s32.totalorder %v7817_v19, %v7565_v58  ;;  %v10911_v49 = vld [vmem:[#allocation20_spill] sm:$0xff] }
  0xd0   :  { %10903 = vst [vmem:[#allocation39_spill] sm:$0xff] %v10902_v0  ;;  %v1705_v40 = vsub.f32 %v7846_v20, %v10904_v32  ;;  %v1712_v50 = vsub.f32 %v7863_v9, %v10905_v47  ;;  %v1838_v32 = vsub.f32 %v7928_v52, %v10473_v44  ;;  %v1604_v47 = vsub.f32 %v7950_v12, %v10475_v62 }
  0xd1   :  { %vm10907_vm10 = vcmp.eq.s32.totalorder %v7827_v16, %v7565_v58  ;;  %v10908_v34 = vmov 0  ;;  %v5935_v37 = vpack.c.bf16 %v1699_v5, %v1692_v7  ;;  %v1596_v44 = vand.u32 4294901760, %v1595_v45 }
  0xd2   :  { %vm8059_vm6 = vmpackc.low %vm10907_vm10, %vm10906_vm7  ;;  %v5945_v18 = vpack.c.bf16 %v7278_v3, %v10911_v49  ;;  %v1706_v62 = vand.u32 4294901760, %v1705_v40  ;;  %v1713_v56 = vand.u32 4294901760, %v1712_v50  ;;  %v1719_v27 = vsub.f32 %v7983_v53, %v10482_v41  ;;  %v10914_v50 = vld [vmem:[#allocation19_spill] sm:$0xff] }
  0xd3   :  { %v10909_v34 = vsel %vm8059_vm6, 4294967295, %v10908_v34  ;;  %v10912_v19 = vand.u32 4294901760, %v7985_v63  ;;  %v5937_v0 = vpack.c.bf16 %v1825_v36, %v1818_v59  ;;  %v10913_v57 = vand.u32 4294901760, %v7994_v25  ;;  %5912 = vmatpush3.bf16.msk.msra.mxu0 %vm8059_vm6, %v10751_v14  ;;  %5936 = vmatpush3.bf16.msra.mxu1 %v5935_v37  ;;  %v10916_v41 = vld [vmem:[#allocation23_spill] sm:$0xff] }
  0xd4   :  { %10910 = vst [vmem:[#allocation40_spill] sm:$0xff] %v10909_v34  ;;  %v1832_v5 = vand.u32 4294901760, %v1831_v42  ;;  %v1839_v45 = vand.u32 4294901760, %v1838_v32  ;;  %v5947_v48 = vpack.c.bf16 %v7293_v6, %v7291_v15  ;;  %v1605_v40 = vand.u32 4294901760, %v1604_v47  ;;  %5946 = vmatprep.subr.bf16.mxu0 %v5945_v18  ;;  %v10915_v32 = vld [vmem:[#allocation22_spill] sm:$0xff]  ;;  %v10918_v47 = vld [vmem:[#allocation25_spill] sm:$0xff] }
  0xd5   :  { %v1726_v16 = vsub.f32 %v7985_v63, %v10912_v19  ;;  %v1610_v7 = vsub.f32 %v7994_v25, %v10913_v57  ;;  %v5949_v19 = vpack.c.bf16 %v10914_v50, %v7340_v61  ;;  %v5939_v2 = vpack.c.bf16 %v1713_v56, %v1706_v62  ;;  %5938 = vmatprep.subr.bf16.mxu1 %v5937_v0  ;;  %v10917_v25 = vld [vmem:[#allocation24_spill] sm:$0xff]  ;;  %v10919_v62 = vld [vmem:[#allocation34_spill] sm:$0xff]  ;;  %v10921_v0 = vld [vmem:[#allocation27_spill] sm:$0xff] }
  0xd6   :  { %v1720_v59 = vand.u32 4294901760, %v1719_v27  ;;  %1597 = vmatmul.mubr.f32.vlgmr.msra.gmra.mrb[12].mxu0 %v1596_v44  ;;  %v5941_v42 = vpack.c.bf16 %v1839_v45, %v1832_v5  ;;  %v5951_v34 = vpack.c.bf16 %v10916_v41, %v10915_v32  ;;  %v5953_v18 = vpack.c.bf16 %v10918_v47, %v10917_v25  ;;  %v10920_v44 = vld [vmem:[#allocation26_spill] sm:$0xff] }
  0xd7   :  { %v1727_v36 = vand.u32 4294901760, %v1726_v16  ;;  %v1611_v57 = vand.u32 4294901760, %v1610_v7  ;;  %5948 = vmatpush3.bf16.msra.mxu0 %v5947_v48  ;;  %1606 = vmatprep.mubr.f32.mxu0 %v1605_v40  ;;  %v5955_v27 = vpack.c.bf16 %v7435_v11, %v7412_v31  ;;  %v5957_v56 = vpack.c.bf16 %v10921_v0, %v10920_v44  ;;  %v10923_v16 = vld [vmem:[#allocation28_spill] sm:$0xff]  ;;  %v10924_v7 = vld [vmem:[#allocation29_spill] sm:$0xff] }
  0xd8   :  { %5950 = vmatprep.subr.bf16.mxu0 %v5949_v19  ;;  %5940 = vmatpush3.bf16.msra.mxu1 %v5939_v2  ;;  %v5959_v5 = vpack.c.bf16 %v10924_v7, %v10923_v16  ;;  %v5963_v48 = vpack.c.bf16 %v7586_v60, %v7584_v35  ;;  %v5965_v40 = vpack.c.bf16 %v7695_v33, %v7642_v28  ;;  %v10928_v2 = vand.u32 4294901760, %v10919_v62 }
  0xd9   :  { %v5943_v12 = vpack.c.bf16 %v1727_v36, %v1720_v59  ;;  %5942 = vmatprep.subr.bf16.mxu1 %v5941_v42  ;;  %v5967_v36 = vpack.c.bf16 %v7716_v22, %v7714_v55  ;;  %v5971_v42 = vpack.c.bf16 %v7863_v9, %v7846_v20  ;;  %v10936_v51 = vand.u32 4294901760, %v10914_v50 }
  0xda   :  { %1612 = vmatmul.mubr.f32.gmra.mrb[14].mxu0 %v1611_v57  ;;  %v5969_v57 = vpack.c.bf16 %v7782_v46, %v7780_v43  ;;  %v10937_v4 = vand.u32 4294901760, %v10915_v32  ;;  %v10938_v8 = vand.u32 4294901760, %v10916_v41  ;;  %v8207_v50 = vadd.s32 664, %v6595_v1 }
  0xdb   :  { %5952 = vmatpush3.bf16.msra.mxu0 %v5951_v34  ;;  %1986 = vmatprep.mubr.f32.mxu0 %v10919_v62  ;;  %v5961_v34 = vpack.c.bf16 %v7575_v23, %v7563_v26  ;;  %v8136_v62 = vadd.s32 648, %v6595_v1 }
  0xdc   :  { %5954 = vmatprep.subr.bf16.mxu0 %v5953_v18  ;;  %5944 = vmatpush3.bf16.msra.mxu1 %v5943_v12  ;;  %v8131_v18 = vadd.s32 640, %v6595_v1  ;;  %v6015_v59 = vpack.c.bf16 %v10938_v8, %v10937_v4  ;;  %v10943_v4 = vand.u32 4294901760, %v10920_v44  ;;  %v10951_v44 = vand.u32 4294901760, %v7586_v60 }
  0xdd   :  { %5978 = vmatprep.subr.msk.bf16.mxu1 %vm7599_vm0, %v10751_v14  ;;  %vm10501_vm7 = vcmp.eq.s32.totalorder %v8136_v62, %v7565_v58 }
  0xde   :  { %vm10499_vm11 = vcmp.eq.s32.totalorder %v8131_v18, %v7565_v58  ;;  %v4346_v60 = vsel %vm10501_vm7, 1.0, %v10767_v29  ;;  %vm10959_vm7 = vnez %v10890_v30 }
  0xdf   :  { %5956 = vmatpush3.bf16.msra.mxu0 %v5955_v27  ;;  %1844 = vmatmul.mubr.f32.vlgmr.msra.gmra.mrb[12].mxu1 %v7849_v38  ;;  %v5973_v27 = vpack.c.bf16 %v7928_v52, %v7926_v24  ;;  %v10935_v38 = vand.u32 4294901760, %v7340_v61  ;;  %v10942_v61 = vand.u32 4294901760, %v7435_v11  ;;  %v10949_v11 = vand.u32 4294901760, %v7575_v23 }
  0xe0   :  { %5958 = vmatprep.subr.bf16.mxu0 %v5957_v56  ;;  %5980 = vmatpush3.bf16.msk.msra.mxu1 %vm7638_vm8, %v10751_v14  ;;  %v8139_v56 = vadd.s32 512, %v6595_v1  ;;  %v10954_v23 = vand.u32 4294901760, %v7714_v55  ;;  %v8255_v55 = vadd.s32 528, %v6595_v1 }
  0xe1   :  { %1849 = vmatprep.mubr.f32.mxu1 %v7891_v39  ;;  %5982 = vmatprep.subr.msk.bf16.mxu1 %vm7659_vm13, %v10751_v14 }
  0xe2   :  { %vm10500_vm10 = vcmp.eq.s32.totalorder %v8139_v56, %v7565_v58 }
  0xe3   :  { %5960 = vmatpush3.bf16.msra.mxu0 %v5959_v5  ;;  %1851 = vmatmul.mubr.f32.gmra.mrb[14].mxu1 %v7941_v54  ;;  %v8142_v5 = vadd.s32 520, %v6595_v1  ;;  %v10934_v54 = vand.u32 4294901760, %v7293_v6  ;;  %v10941_v6 = vand.u32 4294901760, %v7412_v31  ;;  %v10948_v31 = vand.u32 4294901760, %v7563_v26 }
  0xe4   :  { %5962 = vmatprep.subr.bf16.mxu0 %v5961_v34  ;;  %5984 = vmatpush3.bf16.msk.msra.mxu1 %vm7710_vm5, %v10751_v14  ;;  %v6013_v34 = vpack.c.bf16 %v10936_v51, %v10935_v38  ;;  %v10944_v38 = vand.u32 4294901760, %v10921_v0  ;;  %v4345_v26 = vsel %vm10499_vm11, 1.0, %v10767_v29 }
  0xe5   :  { %2102 = vmatprep.mubr.f32.mxu1 %v10928_v2  ;;  %5986 = vmatprep.subr.msk.bf16.mxu1 %vm7733_vm15, %v10751_v14  ;;  %v10932_v2 = vand.u32 4294901760, %v7278_v3  ;;  %v10940_v3 = vand.u32 4294901760, %v10918_v47  ;;  %v8192_v8 = vpack.c.bf16 %v10942_v61, %v10941_v6  ;;  %v8216_v32 = vpack.c.bf16 %v10949_v11, %v10948_v31  ;;  %v10963_v61 = vld [vmem:[#allocation36_spill] sm:$0xff] }
  0xe6   :  { %v8198_v51 = vpack.c.bf16 %v10944_v38, %v10943_v4  ;;  %v10950_v47 = vand.u32 4294901760, %v7584_v35  ;;  %v10955_v35 = vand.u32 4294901760, %v7716_v22  ;;  %vm10956_vm11 = vcmp.eq.s32.totalorder %v8142_v5, %v7565_v58 }
  0xe7   :  { %5964 = vmatpush3.bf16.msra.mxu0 %v5963_v48  ;;  %v5975_v48 = vpack.c.bf16 %v7985_v63, %v7983_v53  ;;  %v8258_v22 = vadd.s32 536, %v6595_v1  ;;  %v10964_v4 = vand.u32 4294901760, %v7780_v43  ;;  %v10965_v38 = vand.u32 4294901760, %v7782_v46 }
  0xe8   :  { %5966 = vmatprep.subr.bf16.mxu0 %v5965_v40  ;;  %5988 = vmatpush3.bf16.msk.msra.mxu1 %vm7776_vm12, %v10751_v14  ;;  %v10931_v40 = vand.u32 4294901760, %v10911_v49  ;;  %v10939_v49 = vand.u32 4294901760, %v10917_v25  ;;  %v10946_v25 = vand.u32 4294901760, %v10924_v7  ;;  %v8222_v0 = vpack.c.bf16 %v10951_v44, %v10950_v47 }
  0xe9   :  { %5990 = vmatprep.subr.msk.bf16.mxu1 %vm7793_vm2, %v10751_v14  ;;  %v10953_v7 = vand.u32 4294901760, %v7695_v33  ;;  %v4330_v33 = vsel %vm10956_vm11, 1.0, %v10767_v29  ;;  %vm10504_vm11 = vcmp.eq.s32.totalorder %v8207_v50, %v7565_v58  ;;  %v10967_v31 = vand.u32 4294901760, %v7863_v9 }
  0xea   :  { %v8284_v6 = vsub.f32 %v4330_v33, %v4330_v33  ;;  %v10968_v47 = vand.u32 4294901760, %v7926_v24  ;;  %v10969_v44 = vand.u32 4294901760, %v7928_v52  ;;  %v4348_v46 = vsel %vm10504_vm11, 1.0, %v10767_v29  ;;  %v10975_v33 = vld [vmem:[#allocation31_spill] sm:$0xff] }
  0xeb   :  { %5968 = vmatpush3.bf16.msra.mxu0 %v5967_v36  ;;  %v6009_v36 = vpack.c.bf16 %v10932_v2, %v10931_v40  ;;  %v8172_v40 = vpack.c.bf16 %v10940_v3, %v10939_v49  ;;  %v8266_v2 = vsub.f32 %v4345_v26, %v4345_v26  ;;  %v8280_v49 = vsub.f32 %v4346_v60, %v4346_v60 }
  0xec   :  { %5970 = vmatprep.subr.bf16.mxu0 %v5969_v57  ;;  %5992 = vmatpush3.bf16.msk.msra.mxu1 %vm7840_vm3, %v10751_v14  ;;  %v10933_v57 = vand.u32 4294901760, %v7291_v15  ;;  %v8183_v15 = vadd.s32 656, %v6595_v1  ;;  %10962 = vst [vmem:[#allocation23_spill] sm:$0xff] %v8284_v6  ;;  %v8325_v24 = vadd.s32 552, %v6595_v1  ;;  %v10510_v26 = vand.u32 4294901760, %v8284_v6 }
  0xed   :  { %5994 = vmatprep.subr.msk.bf16.mxu1 %vm7859_vm9, %v10751_v14  ;;  %vm10947_vm9 = vnez %v10879_v13  ;;  %10958 = vst [vmem:[#allocation20_spill] sm:$0xff] %v8266_v2  ;;  %10960 = vst [vmem:[#allocation19_spill] sm:$0xff] %v8280_v49  ;;  %v10507_v9 = vand.u32 4294901760, %v8266_v2  ;;  %v10974_v60 = vand.u32 4294901760, %v7985_v63  ;;  %v8765_v52 = vadd.s32 760, %v6595_v1 }
  0xee   :  { %v6011_v39 = vpack.c.bf16 %v10934_v54, %v10933_v57  ;;  %v10945_v54 = vand.u32 4294901760, %v10923_v16  ;;  %v10952_v16 = vand.u32 4294901760, %v7642_v28  ;;  %v4329_v28 = vsel %vm10500_vm10, 1.0, %v10767_v29 }
  0xef   :  { %5972 = vmatpush3.bf16.msra.mxu0 %v5971_v42  ;;  %vm10957_vm10 = vnez %v10885_v21  ;;  %v8274_v57 = vadd.s32 544, %v6595_v1  ;;  %v8282_v3 = vsub.f32 %v4329_v28, %v4329_v28 }
  0xf0   :  { %5974 = vmatprep.subr.bf16.mxu0 %v5973_v27  ;;  %5996 = vmatpush3.bf16.msk.msra.mxu1 %vm7903_vm1, %v10751_v14  ;;  %v8204_v41 = vpack.c.bf16 %v10946_v25, %v10945_v54  ;;  %v8228_v42 = vpack.c.bf16 %v10953_v7, %v10952_v16  ;;  %v8238_v27 = vpack.c.bf16 %v10955_v35, %v10954_v23  ;;  %v10966_v25 = vand.u32 4294901760, %v7846_v20 }
  0xf1   :  { %5998 = vmatprep.subr.msk.bf16.mxu1 %vm10947_vm9, %v10751_v14  ;;  %vm10503_vm9 = vcmp.eq.s32.totalorder %v8183_v15, %v7565_v58  ;;  %10961 = vst [vmem:[#allocation22_spill] sm:$0xff] %v8282_v3  ;;  %v8291_v54 = vpack.c.bf16 %v10965_v38, %v10964_v4  ;;  %v8303_v16 = vpack.c.bf16 %v10969_v44, %v10968_v47  ;;  %v10509_v7 = vand.u32 4294901760, %v8282_v3 }
  0xf2   :  { %v8297_v11 = vpack.c.bf16 %v10967_v31, %v10966_v25  ;;  %v4347_v43 = vsel %vm10503_vm9, 1.0, %v10767_v29  ;;  %vm10506_vm11 = vcmp.eq.s32.totalorder %v8274_v57, %v7565_v58  ;;  %v8338_v23 = vadd.s32 688, %v6595_v1 }
  0xf3   :  { %5976 = vmatpush3.bf16.msra.mxu0 %v5975_v48  ;;  %v8261_v48 = vadd.s32 672, %v6595_v1  ;;  %v10973_v35 = vand.u32 4294901760, %v7983_v53  ;;  %v8347_v4 = vsub.f32 %v4347_v43, %v4347_v43  ;;  %v8349_v38 = vsub.f32 %v4348_v46, %v4348_v46 }
  0xf4   :  { %6010 = vmatprep.subr.bf16.mxu0 %v6009_v36  ;;  %6000 = vmatpush3.bf16.msk.msra.mxu1 %vm10957_vm10, %v10751_v14  ;;  %v8271_v36 = vadd.s32 680, %v6595_v1  ;;  %vm239_vm10 = vcmp.eq.s32.totalorder %v8258_v22, %v7565_v58  ;;  %v4333_v31 = vsel %vm10506_vm11, 1.0, %v10767_v29  ;;  %v2651_v47 = vsub.f32 %v8266_v2, %v10507_v9 }
  0xf5   :  { %6002 = vmatprep.subr.msk.bf16.mxu1 %vm10959_vm7, %v10751_v14  ;;  %vm10505_vm7 = vcmp.eq.s32.totalorder %v8255_v55, %v7565_v58  ;;  %vm256_vm1 = vcmp.eq.s32.totalorder %v8261_v48, %v7565_v58  ;;  %v8344_v28 = vpack.c.bf16 %v10974_v60, %v10973_v35  ;;  %10976 = vst [vmem:[#allocation24_spill] sm:$0xff] %v8347_v4  ;;  %10977 = vst [vmem:[#allocation25_spill] sm:$0xff] %v8349_v38  ;;  %v11024_v22 = vmov 0 }
  0xf6   :  { %1989 = vmatmul.mubr.f32.vlgmr.msra.gmra.mrb[16].mxu0 %v7912_v17  ;;  %vm257_vm9 = vcmp.eq.s32.totalorder %v8271_v36, %v7565_v58  ;;  %v4331_v25 = vsel %vm10505_vm7, 1.0, %v10767_v29  ;;  %v4332_v53 = vsel %vm239_vm10, 1.0, %v10767_v29  ;;  %v4349_v63 = vsel %vm256_vm1, 1.0, %v10767_v29 }
  0xf7   :  { %6012 = vmatpush3.bf16.msra.mxu0 %v6011_v39  ;;  %1995 = vmatprep.mubr.f32.mxu0 %v10963_v61  ;;  %v10971_v39 = vld [vmem:[#allocation37_spill] sm:$0xff]  ;;  %vm241_vm7 = vcmp.eq.s32.totalorder %v8325_v24, %v7565_v58  ;;  %v8381_v44 = vadd.s32 696, %v6595_v1  ;;  %v2539_v46 = vsub.f32 %v8282_v3, %v10509_v7  ;;  %v2546_v35 = vsub.f32 %v8284_v6, %v10510_v26 }
  0xf8   :  { %6014 = vmatprep.subr.bf16.mxu0 %v6013_v34  ;;  %6004 = vmatpush3.bf16.msk.msra.mxu1 %vm8011_vm14, %v10751_v14  ;;  %v10508_v34 = vand.u32 4294901760, %v8280_v49  ;;  %vm258_vm11 = vcmp.eq.s32.totalorder %v8338_v23, %v7565_v58  ;;  %v8398_v60 = vsub.f32 %v4331_v25, %v4331_v25  ;;  %v8400_v37 = vsub.f32 %v4332_v53, %v4332_v53  ;;  %v8822_v23 = vld [vmem:[#allocation2] ss:$0 sm:$0xff] }
  0xf9   :  { %6006 = vmatprep.subr.msk.bf16.mxu1 %vm8025_vm4, %v10751_v14  ;;  %v8402_v9 = vsub.f32 %v4349_v63, %v4349_v63  ;;  %v10982_v7 = vand.u32 4294901760, %v7912_v17  ;;  %v8416_v25 = vsub.f32 %v4333_v31, %v4333_v31  ;;  %v8419_v53 = vadd.s32 568, %v6595_v1 }
  0xfa   :  { %1998 = vmatmul.mubr.f32.gmra.mrb[18].mxu0 %v10971_v39  ;;  %v2658_v43 = vsub.f32 %v8280_v49, %v10508_v34  ;;  %10979 = vst [vmem:[#allocation34_spill] sm:$0xff] %v8398_v60  ;;  %10980 = vst [vmem:[#allocation26_spill] sm:$0xff] %v8400_v37  ;;  %v8405_v34 = vadd.s32 560, %v6595_v1  ;;  %v10983_v17 = vand.u32 4294901760, %v10963_v61  ;;  %v2652_v45 = vand.u32 4294901760, %v2651_v47 }
  0xfb   :  { %6016 = vmatpush3.bf16.msra.mxu0 %v6015_v59  ;;  %2283 = vmatprep.mubr.f32.mxu0 %v10975_v33  ;;  %v4350_v59 = vsel %vm257_vm9, 1.0, %v10767_v29  ;;  %10981 = vst [vmem:[#allocation27_spill] sm:$0xff] %v8402_v9  ;;  %v2540_v61 = vand.u32 4294901760, %v2539_v46  ;;  %v2547_v31 = vand.u32 4294901760, %v2546_v35  ;;  %v8443_v6 = vadd.s32 704, %v6595_v1  ;;  %v561_v35 = vld [vmem:[#allocation5 + $0x28] sm:$0xff] }
  0xfc   :  { %6018 = vmatprep.subr.bf16.mxu0 %v8172_v40  ;;  %6008 = vmatpush3.bf16.msk.msra.mxu1 %vm8059_vm6, %v10751_v14  ;;  %v8410_v26 = vsub.f32 %v4350_v59, %v4350_v59  ;;  %v2659_v59 = vand.u32 4294901760, %v2658_v43  ;;  %v8446_v63 = vadd.s32 712, %v6595_v1  ;;  %v10984_v12 = vand.u32 4294901760, %v10971_v39 }
  0xfd   :  { %6042 = vmatprep.subr.msk.bf16.mxu1 %vm7599_vm0, %v10751_v14  ;;  %vm10540_vm0 = vcmp.eq.s32.totalorder %v8381_v44, %v7565_v58  ;;  %v10520_v43 = vand.u32 4294901760, %v8398_v60  ;;  %v10985_v39 = vand.u32 4294901760, %v8349_v38  ;;  %v8476_v19 = vpack.c.bf16 %v2547_v31, %v2540_v61 }
  0xfe   :  { %v8483_v46 = vadd.s32 576, %v6595_v1  ;;  %v10988_v61 = vand.u32 4294901760, %v8400_v37  ;;  %v10996_v49 = vand.u32 4294901760, %v8416_v25  ;;  %v8762_v48 = vadd.s32 752, %v6595_v1 }
  0xff   :  { %6020 = vmatpush3.bf16.msra.mxu0 %v8192_v8  ;;  %2106 = vmatmul.mubr.f32.vlgmr.msra.gmra.mrb[16].mxu1 %v10982_v7  ;;  %v4334_v8 = vsel %vm241_vm7, 1.0, %v10767_v29  ;;  %v10513_v7 = vand.u32 4294901760, %v8347_v4 }
 0x100   :  { %6022 = vmatprep.subr.bf16.mxu0 %v8198_v51  ;;  %6044 = vmatpush3.bf16.msk.msra.mxu1 %vm7638_vm8, %v10751_v14  ;;  %v4351_v51 = vsel %vm258_vm11, 1.0, %v10767_v29  ;;  %vm10538_vm8 = vcmp.eq.s32.totalorder %v8405_v34, %v7565_v58  ;;  %v2560_v31 = vsub.f32 %v8400_v37, %v10988_v61  ;;  %v2567_v2 = vsub.f32 %v8416_v25, %v10996_v49 }
 0x101   :  { %2113 = vmatprep.mubr.f32.mxu1 %v10983_v17  ;;  %6046 = vmatprep.subr.msk.bf16.mxu1 %vm7659_vm13, %v10751_v14  ;;  %v8438_v17 = vsub.f32 %v4334_v8, %v4334_v8  ;;  %v8455_v47 = vsub.f32 %v4351_v51, %v4351_v51  ;;  %vm10536_vm13 = vcmp.eq.s32.totalorder %v8419_v53, %v7565_v58 }
 0x102   :  { %v2672_v8 = vsub.f32 %v8349_v38, %v10985_v39  ;;  %v8532_v39 = vadd.s32 720, %v6595_v1 }
 0x103   :  { %6024 = vmatpush3.bf16.msra.mxu0 %v8204_v41  ;;  %2117 = vmatmul.mubr.f32.gmra.mrb[18].mxu1 %v10984_v12  ;;  %v4352_v41 = vsel %vm10540_vm0, 1.0, %v10767_v29  ;;  %v8474_v12 = vpack.c.bf16 %v2659_v59, %v2652_v45  ;;  %v8492_v45 = vand.u32 4294901760, %v561_v35  ;;  %v4336_v59 = vsel %vm10536_vm13, 1.0, %v10767_v29 }
 0x104   :  { %6026 = vmatprep.subr.bf16.mxu0 %v8216_v32  ;;  %6048 = vmatpush3.bf16.msk.msra.mxu1 %vm7710_vm5, %v10751_v14  ;;  %v2665_v32 = vsub.f32 %v8347_v4, %v10513_v7  ;;  %v8486_v7 = vsub.f32 %v4352_v41, %v4352_v41  ;;  %vm10535_vm5 = vcmp.eq.s32.totalorder %v8443_v6, %v7565_v58  ;;  %v2673_v38 = vand.u32 4294901760, %v2672_v8 }
 0x105   :  { %2394 = vmatprep.mubr.f32.mxu1 %v10975_v33  ;;  %6050 = vmatprep.subr.msk.bf16.mxu1 %vm7733_vm15, %v10751_v14  ;;  %v4335_v33 = vsel %vm10538_vm8, 1.0, %v10767_v29  ;;  %vm10525_vm15 = vcmp.eq.s32.totalorder %v8446_v63, %v7565_v58  ;;  %10987 = vst [vmem:[#allocation30_spill] sm:$0xff] %v8492_v45  ;;  %v8512_v4 = vadd.s32 584, %v6595_v1  ;;  %v4353_v61 = vsel %vm10535_vm5, 1.0, %v10767_v29 }
 0x106   :  { %v2666_v51 = vand.u32 4294901760, %v2665_v32  ;;  %v8538_v41 = vsub.f32 %v4336_v59, %v4336_v59  ;;  %v10991_v32 = vand.u32 4294901760, %v8402_v9  ;;  %v8556_v59 = vadd.s32 592, %v6595_v1 }
 0x107   :  { %6028 = vmatpush3.bf16.msra.mxu0 %v8222_v0  ;;  %v2553_v0 = vsub.f32 %v8398_v60, %v10520_v43  ;;  %v8535_v43 = vsub.f32 %v561_v35, %v8492_v45  ;;  %v2561_v60 = vand.u32 4294901760, %v2560_v31  ;;  %v8553_v35 = vadd.s32 728, %v6595_v1 }
 0x108   :  { %6030 = vmatprep.subr.bf16.mxu0 %v8228_v42  ;;  %6052 = vmatpush3.bf16.msk.msra.mxu1 %vm7776_vm12, %v10751_v14  ;;  %v8509_v42 = vsub.f32 %v4335_v33, %v4335_v33  ;;  %v4354_v33 = vsel %vm10525_vm15, 1.0, %v10767_v29  ;;  %vm10534_vm12 = vcmp.eq.s32.totalorder %v8483_v46, %v7565_v58  ;;  %v8561_v31 = vpack.c.bf16 %v2673_v38, %v2666_v51 }
 0x109   :  { %6054 = vmatprep.subr.msk.bf16.mxu1 %vm7793_vm2, %v10751_v14  ;;  %v2554_v37 = vand.u32 4294901760, %v2553_v0  ;;  %vm10537_vm2 = vcmp.eq.s32.totalorder %v8512_v4, %v7565_v58  ;;  %v10993_v0 = vld [vmem:[#allocation15_spill] sm:$0xff]  ;;  %v8565_v3 = vsub.f32 %v4354_v33, %v4354_v33  ;;  %v10995_v8 = vand.u32 4294901760, %v8410_v26 }
 0x10a   :  { %vm10994_vm15 = vnez %v10993_v0  ;;  %v10997_v45 = vand.u32 4294901760, %v8438_v17  ;;  %v10543_v38 = vand.u32 4294901760, %v8535_v43  ;;  %vm11000_vm5 = vcmp.eq.s32.totalorder %v8136_v62, %v7565_v58 }
 0x10b   :  { %6032 = vmatpush3.bf16.msra.mxu0 %v8238_v27  ;;  %v2679_v27 = vsub.f32 %v8402_v9, %v10991_v32  ;;  %v8563_v32 = vsub.f32 %v4353_v61, %v4353_v61  ;;  %v2686_v9 = vsub.f32 %v8410_v26, %v10995_v8  ;;  %v8581_v51 = vpack.c.bf16 %v2561_v60, %v2554_v37 }
 0x10c   :  { %6034 = vmatprep.subr.bf16.mxu0 %v8291_v54  ;;  %6056 = vmatpush3.bf16.msk.msra.mxu1 %vm7840_vm3, %v10751_v14  ;;  %v4337_v54 = vsel %vm10534_vm12, 1.0, %v10767_v29  ;;  %v2574_v0 = vsub.f32 %v8438_v17, %v10997_v45  ;;  %vm10539_vm3 = vcmp.eq.s32.totalorder %v8532_v39, %v7565_v58  ;;  %vm10999_vm12 = vcmp.eq.s32.totalorder %v8131_v18, %v7565_v58 }
 0x10d   :  { %6058 = vmatprep.subr.msk.bf16.mxu1 %vm10994_vm15, %v10751_v14  ;;  %v8587_v61 = vsub.f32 %v4337_v54, %v4337_v54  ;;  %v2680_v49 = vand.u32 4294901760, %v2679_v27  ;;  %vm10998_vm15 = vnez %v10875_v10  ;;  %vm8598_vm13 = vmpackc.low %vm11000_vm5, %vm10999_vm12  ;;  %v8605_v60 = vadd.s32 600, %v6595_v1 }
 0x10e   :  { %vm10545_vm8 = vcmp.eq.s32.totalorder %v8556_v59, %v7565_v58  ;;  %v10542_v10 = vand.u32 4294901760, %v8455_v47  ;;  %v4355_v18 = vsel %vm10539_vm3, 1.0, %v10767_v29  ;;  %v10544_v62 = vand.u32 4294901760, %v8486_v7 }
 0x10f   :  { %6036 = vmatpush3.bf16.msra.mxu0 %v8297_v11  ;;  %v4338_v11 = vsel %vm10537_vm2, 1.0, %v10767_v29  ;;  %vm10541_vm2 = vcmp.eq.s32.totalorder %v8553_v35, %v7565_v58  ;;  %v8619_v37 = vadd.s32 736, %v6595_v1  ;;  %v8622_v45 = vadd.s32 744, %v6595_v1 }
 0x110   :  { %6038 = vmatprep.subr.bf16.mxu0 %v8303_v16  ;;  %6060 = vmatpush3.bf16.msk.msra.mxu1 %vm10998_vm15, %v10751_v14  ;;  %vm11003_vm15 = vnez %v10879_v13  ;;  %v2687_v33 = vand.u32 4294901760, %v2686_v9  ;;  %v2568_v8 = vand.u32 4294901760, %v2567_v2  ;;  %v2575_v27 = vand.u32 4294901760, %v2574_v0 }
 0x111   :  { %6062 = vmatprep.subr.msk.bf16.mxu1 %vm11003_vm15, %v10751_v14  ;;  %v2507_v13 = vsub.f32 %v8535_v43, %v10543_v38  ;;  %vm11004_vm5 = vcmp.eq.s32.totalorder %v8139_v56, %v7565_v58  ;;  %vm11005_vm12 = vcmp.eq.s32.totalorder %v8142_v5, %v7565_v58  ;;  %v11006_v54 = vmov 0 }
 0x112   :  { %vm8637_vm15 = vmpackc.low %vm11005_vm12, %vm11004_vm5  ;;  %v8641_v2 = vsub.f32 %v4338_v11, %v4338_v11  ;;  %v4356_v9 = vsel %vm10541_vm2, 1.0, %v10767_v29  ;;  %vm11009_vm3 = vnez %v10885_v21  ;;  %vm11010_vm5 = vcmp.eq.s32.totalorder %v8183_v15, %v7565_v58  ;;  %v11015_v11 = vld [vmem:[#allocation17_spill] sm:$0xff] }
 0x113   :  { %6040 = vmatpush3.bf16.msra.mxu0 %v8344_v28  ;;  %v11007_v54 = vsel %vm8637_vm15, 4294967295, %v11006_v54  ;;  %vm11011_vm12 = vcmp.eq.s32.totalorder %v8207_v50, %v7565_v58  ;;  %v11012_v56 = vmov 0  ;;  %v8662_v5 = vsub.f32 %v4355_v18, %v4355_v18 }
 0x114   :  { %6074 = vmatprep.subr.msk.bf16.mxu0 %vm8598_vm13, %v10751_v14  ;;  %11008 = vst [vmem:[#allocation28_spill] sm:$0xff] %v11007_v54  ;;  %6064 = vmatpush3.bf16.msk.msra.mxu1 %vm11009_vm3, %v10751_v14  ;;  %vm8658_vm0 = vmpackc.low %vm11011_vm12, %vm11010_vm5  ;;  %vm247_vm2 = vcmp.eq.s32.totalorder %v8605_v60, %v7565_v58  ;;  %v4339_v21 = vsel %vm10545_vm8, 1.0, %v10767_v29  ;;  %v2693_v15 = vsub.f32 %v8455_v47, %v10542_v10  ;;  %vm11016_vm3 = vnez %v10890_v30  ;;  %v11017_v10 = vld [vmem:[#allocation18_spill] sm:$0xff] }
 0x115   :  { %v11013_v56 = vsel %vm8658_vm0, 4294967295, %v11012_v56  ;;  %6066 = vmatprep.subr.msk.bf16.mxu1 %vm11016_vm3, %v10751_v14  ;;  %v2700_v50 = vsub.f32 %v8486_v7, %v10544_v62  ;;  %vm10565_vm5 = vcmp.eq.s32.totalorder %v8619_v37, %v7565_v58  ;;  %vm10560_vm12 = vcmp.eq.s32.totalorder %v8622_v45, %v7565_v58 }
 0x116   :  { %11014 = vst [vmem:[#allocation29_spill] sm:$0xff] %v11013_v56  ;;  %2285 = vmatmul.mubr.f32.vlgmr.msra.gmra.mrb[20].mxu0 %v11015_v11  ;;  %v8685_v18 = vadd.s32 608, %v6595_v1  ;;  %v8691_v30 = vpack.c.bf16 %v2687_v33, %v2680_v49  ;;  %v8693_v38 = vpack.c.bf16 %v2575_v27, %v2568_v8  ;;  %v8696_v62 = vadd.s32 616, %v6595_v1 }
 0x117   :  { %6076 = vmatpush3.bf16.msk.msra.mxu0 %vm8637_vm15, %v10751_v14  ;;  %2290 = vmatprep.mubr.f32.mxu0 %v11017_v10  ;;  %v2508_v0 = vand.u32 4294901760, %v2507_v13  ;;  %vm11018_vm3 = vcmp.eq.s32.totalorder %v8255_v55, %v7565_v58  ;;  %v11019_v28 = vmov 0  ;;  %v8711_v49 = vsub.f32 %v4356_v9, %v4356_v9 }
 0x118   :  { %6078 = vmatprep.subr.msk.bf16.mxu0 %vm8658_vm0, %v10751_v14  ;;  %vm8707_vm8 = vmpackc.low %vm239_vm10, %vm11018_vm3  ;;  %v4340_v33 = vsel %vm247_vm2, 1.0, %v10767_v29  ;;  %v11022_v8 = vand.u32 4294901760, %v8509_v42  ;;  %v11023_v55 = vand.u32 4294901760, %v8538_v41  ;;  %6068 = vmatpush3.bf16.msk.msra.mxu1 %vm8011_vm14, %v10751_v14  ;;  %v8736_v9 = vsub.f32 %v4339_v21, %v4339_v21 }
 0x119   :  { %v11020_v28 = vsel %vm8707_vm8, 4294967295, %v11019_v28  ;;  %vm8732_vm10 = vmpackc.low %vm257_vm9, %vm256_vm1  ;;  %v4358_v20 = vsel %vm10560_vm12, 1.0, %v10767_v29  ;;  %6070 = vmatprep.subr.msk.bf16.mxu1 %vm8025_vm4, %v10751_v14  ;;  %v2694_v36 = vand.u32 4294901760, %v2693_v15  ;;  %v2701_v21 = vand.u32 4294901760, %v2700_v50 }
 0x11a   :  { %11021 = vst [vmem:[#allocation32_spill] sm:$0xff] %v11020_v28  ;;  %v2581_v27 = vsub.f32 %v8509_v42, %v11022_v8  ;;  %v2588_v13 = vsub.f32 %v8538_v41, %v11023_v55  ;;  %v11025_v22 = vsel %vm8732_vm10, 4294967295, %v11024_v22  ;;  %v4357_v8 = vsel %vm10565_vm5, 1.0, %v10767_v29  ;;  %v11027_v55 = vld [vmem:[#allocation35_spill] sm:$0xff] }
 0x11b   :  { %11026 = vst [vmem:[#allocation33_spill] sm:$0xff] %v11025_v22  ;;  %2292 = vmatmul.mubr.f32.gmra.mrb[22].mxu0 %v11027_v55  ;;  %vm10557_vm1 = vcmp.eq.s32.totalorder %v8685_v18, %v7565_v58  ;;  %v8757_v54 = vsub.f32 %v4340_v33, %v4340_v33  ;;  %vm10554_vm9 = vcmp.eq.s32.totalorder %v8696_v62, %v7565_v58 }
 0x11c   :  { %6080 = vmatpush3.bf16.msk.msra.mxu0 %vm8707_vm8, %v10751_v14  ;;  %2509 = vmatprep.mubr.f32.mxu0 %v2508_v0  ;;  %vm11028_vm14 = vcmp.eq.s32.totalorder %v8274_v57, %v7565_v58  ;;  %v2582_v50 = vand.u32 4294901760, %v2581_v27  ;;  %v2589_v33 = vand.u32 4294901760, %v2588_v13  ;;  %v8780_v56 = vsub.f32 %v4357_v8, %v4357_v8  ;;  %v560_v13 = vld [vmem:[#allocation5 + $0x20] sm:$0xff] }
 0x11d   :  { %6082 = vmatprep.subr.msk.bf16.mxu0 %vm8732_vm10, %v10751_v14  ;;  %vm8776_vm4 = vmpackc.low %vm241_vm7, %vm11028_vm14  ;;  %v8782_v28 = vsub.f32 %v4358_v20, %v4358_v20  ;;  %6072 = vmatpush3.bf16.msk.msra.mxu1 %vm8059_vm6, %v10751_v14  ;;  %vm11031_vm3 = vcmp.eq.s32.totalorder %v8381_v44, %v7565_v58  ;;  %v11032_v57 = vmov 0  ;;  %v4341_v24 = vsel %vm10557_vm1, 1.0, %v10767_v29 }
 0x11e   :  { %vm8793_vm7 = vmpackc.low %vm11031_vm3, %vm258_vm11  ;;  %v11035_v0 = vand.u32 4294901760, %v8563_v32  ;;  %6106 = vmatprep.subr.bf16.mxu1 %v8474_v12  ;;  %v8807_v44 = vpack.c.bf16 %v2701_v21, %v2694_v36  ;;  %v4342_v8 = vsel %vm10554_vm9, 1.0, %v10767_v29  ;;  %v11036_v20 = vand.u32 4294901760, %v8565_v3 }
 0x11f   :  { %v11033_v57 = vsel %vm8793_vm7, 4294967295, %v11032_v57  ;;  %vm10559_vm6 = vcmp.eq.s32.totalorder %v8762_v48, %v8822_v23  ;;  %vm10558_vm11 = vcmp.eq.s32.totalorder %v8765_v52, %v8822_v23  ;;  %v8829_v12 = vadd.s32 632, %v6595_v1 }
 0x120   :  { %11034 = vst [vmem:[#allocation12_spill] sm:$0xff] %v11033_v57  ;;  %v2707_v40 = vsub.f32 %v8563_v32, %v11035_v0  ;;  %v2714_v22 = vsub.f32 %v8565_v3, %v11036_v20  ;;  %v8817_v0 = vadd.s32 624, %v6595_v1  ;;  %6084 = vmatpush3.bf16.msk.msra.mxu0 %vm8776_vm4, %v10751_v14  ;;  %2396 = vmatmul.mubr.f32.vlgmr.msra.gmra.mrb[20].mxu1 %v11015_v11  ;;  %v11039_v21 = vmov 0  ;;  %v569_v57 = vld [vmem:[#allocation5 + $0x68] sm:$0xff] }
 0x121   :  { %6086 = vmatprep.subr.msk.bf16.mxu0 %vm8793_vm7, %v10751_v14  ;;  %vm11037_vm14 = vcmp.eq.s32.totalorder %v8405_v34, %v7565_v58  ;;  %vm11038_vm3 = vcmp.eq.s32.totalorder %v8419_v53, %v7565_v58  ;;  %v8846_v20 = vpack.c.bf16 %v2589_v33, %v2582_v50  ;;  %v8848_v27 = vsub.f32 %v4341_v24, %v4341_v24  ;;  %v11062_v1 = vld [vmem:[#allocation30_spill] sm:$0xff] }
 0x122   :  { %vm8842_vm9 = vmpackc.low %vm11038_vm3, %vm11037_vm14  ;;  %v8851_v36 = vand.u32 4294901760, %v560_v13  ;;  %6108 = vmatpush3.bf16.msra.mxu1 %v8476_v19  ;;  %2401 = vmatprep.mubr.f32.mxu1 %v11017_v10  ;;  %vm11043_vm1 = vcmp.eq.s32.totalorder %v8443_v6, %v7565_v58  ;;  %vm11044_vm14 = vcmp.eq.s32.totalorder %v8446_v63, %v7565_v58  ;;  %v11045_v34 = vmov 0 }
 0x123   :  { %v11040_v21 = vsel %vm8842_vm9, 4294967295, %v11039_v21  ;;  %vm8861_vm3 = vmpackc.low %vm11044_vm14, %vm11043_vm1  ;;  %v8865_v53 = vsub.f32 %v4342_v8, %v4342_v8  ;;  %v2708_v50 = vand.u32 4294901760, %v2707_v40  ;;  %v11048_v33 = vand.u32 4294901760, %v8587_v61  ;;  %6110 = vmatprep.subr.bf16.mxu1 %v8561_v31 }
 0x124   :  { %11041 = vst [vmem:[#allocation36_spill] sm:$0xff] %v11040_v21  ;;  %11042 = vst [vmem:[#allocation38_spill] sm:$0xff] %v8851_v36  ;;  %v11046_v34 = vsel %vm8861_vm3, 4294967295, %v11045_v34  ;;  %v11049_v19 = vand.u32 4294901760, %v8641_v2  ;;  %v2715_v6 = vand.u32 4294901760, %v2714_v22  ;;  %v4359_v63 = vsel %vm10559_vm6, 1.0, %v10767_v29  ;;  %6088 = vmatpush3.bf16.msk.msra.mxu0 %vm8842_vm9, %v10751_v14  ;;  %2403 = vmatmul.mubr.f32.gmra.mrb[22].mxu1 %v11027_v55 }
 0x125   :  { %11047 = vst [vmem:[#allocation37_spill] sm:$0xff] %v11046_v34  ;;  %v2595_v24 = vsub.f32 %v8587_v61, %v11048_v33  ;;  %v4360_v40 = vsel %vm10558_vm11, 1.0, %v10767_v29  ;;  %vm10569_vm1 = vcmp.eq.s32.totalorder %v8817_v0, %v8822_v23  ;;  %vm10568_vm14 = vcmp.eq.s32.totalorder %v8829_v12, %v8822_v23  ;;  %6090 = vmatprep.subr.msk.bf16.mxu0 %vm8861_vm3, %v10751_v14 }
 0x126   :  { %v2602_v10 = vsub.f32 %v8641_v2, %v11049_v19  ;;  %v11050_v31 = vand.u32 4294901760, %v8662_v5  ;;  %v8893_v33 = vand.u32 4294901760, %v569_v57  ;;  %v568_v19 = vld [vmem:[#allocation5 + $0x60] sm:$0xff]  ;;  %vm11052_vm11 = vcmp.eq.s32.totalorder %v8483_v46, %v7565_v58  ;;  %6112 = vmatpush3.bf16.msra.mxu1 %v8581_v51  ;;  %2760 = vmatprep.mubr.f32.mxu1 %v11062_v1 }
 0x127   :  { %vm11053_vm6 = vcmp.eq.s32.totalorder %v8512_v4, %v7565_v58  ;;  %v11054_v11 = vmov 0  ;;  %v8914_v21 = vsub.f32 %v560_v13, %v8851_v36  ;;  %vm11058_vm5 = vcmp.eq.s32.totalorder %v8532_v39, %v7565_v58  ;;  %6114 = vmatprep.subr.bf16.mxu1 %v8691_v30 }
 0x128   :  { %v2721_v22 = vsub.f32 %v8662_v5, %v11050_v31  ;;  %11051 = vst [vmem:[#allocation39_spill] sm:$0xff] %v8893_v33  ;;  %vm8905_vm12 = vmpackc.low %vm11053_vm6, %vm11052_vm11  ;;  %v11056_v31 = vand.u32 4294901760, %v8711_v49  ;;  %vm11059_vm6 = vcmp.eq.s32.totalorder %v8553_v35, %v7565_v58  ;;  %v11060_v4 = vmov 0 }
 0x129   :  { %v11055_v11 = vsel %vm8905_vm12, 4294967295, %v11054_v11  ;;  %11057 = vst [vmem:[#allocation31_spill] sm:$0xff] %v8914_v21  ;;  %vm8924_vm11 = vmpackc.low %vm11059_vm6, %vm11058_vm5  ;;  %v2596_v46 = vand.u32 4294901760, %v2595_v24  ;;  %v8928_v55 = vsub.f32 %v4359_v63, %v4359_v63  ;;  %v8930_v13 = vsub.f32 %v4360_v40, %v4360_v40  ;;  %6092 = vmatpush3.bf16.msk.msra.mxu0 %vm8905_vm12, %v10751_v14 }
 0x12a   :  { %v2728_v8 = vsub.f32 %v8711_v49, %v11056_v31  ;;  %v11061_v4 = vsel %vm8924_vm11, 4294967295, %v11060_v4  ;;  %v2603_v31 = vand.u32 4294901760, %v2602_v10  ;;  %v4343_v39 = vsel %vm10569_vm1, 1.0, %v10767_v29  ;;  %6094 = vmatprep.subr.msk.bf16.mxu0 %vm8924_vm11, %v10751_v14  ;;  %6116 = vmatpush3.bf16.msra.mxu1 %v8693_v38 }
 0x12b   :  { %v4344_v35 = vsel %vm10568_vm14, 1.0, %v10767_v29  ;;  %v8943_v24 = vand.u32 4294901760, %v568_v19  ;;  %v6121_v10 = vpack.c.bf16 %v2715_v6, %v2708_v50  ;;  %v2722_v30 = vand.u32 4294901760, %v2721_v22  ;;  %6118 = vmatprep.subr.bf16.mxu1 %v8807_v44 }
 0x12c   :  { %v11064_v63 = vand.u32 4294901760, %v8736_v9  ;;  %v8952_v34 = vsub.f32 %v569_v57, %v8893_v33  ;;  %vm11066_vm5 = vcmp.eq.s32.totalorder %v8556_v59, %v7565_v58  ;;  %v11067_v50 = vmov 0 }
 0x12d   :  { %11063 = vst [vmem:[#allocation40_spill] sm:$0xff] %v8943_v24  ;;  %vm8963_vm6 = vmpackc.low %vm247_vm2, %vm11066_vm5  ;;  %v2729_v6 = vand.u32 4294901760, %v2728_v8  ;;  %v11070_v22 = vand.u32 4294901760, %v8757_v54  ;;  %v11071_v51 = vand.u32 4294901760, %v8780_v56  ;;  %vm11072_vm14 = vcmp.eq.s32.totalorder %v8619_v37, %v7565_v58 }
 0x12e   :  { %v2609_v40 = vsub.f32 %v8736_v9, %v11064_v63  ;;  %11065 = vst [vmem:[#allocation16_spill] sm:$0xff] %v8952_v34  ;;  %v11068_v50 = vsel %vm8963_vm6, 4294967295, %v11067_v50  ;;  %vm11073_vm2 = vcmp.eq.s32.totalorder %v8622_v45, %v7565_v58  ;;  %v11074_v59 = vmov 0  ;;  %6096 = vmatpush3.bf16.msk.msra.mxu0 %vm8963_vm6, %v10751_v14  ;;  %6120 = vmatpush3.bf16.msra.mxu1 %v8846_v20 }
 0x12f   :  { %11069 = vst [vmem:[#allocation13_spill] sm:$0xff] %v11068_v50  ;;  %v2616_v57 = vsub.f32 %v8757_v54, %v11070_v22  ;;  %v2735_v1 = vsub.f32 %v8780_v56, %v11071_v51  ;;  %vm8981_vm5 = vmpackc.low %vm11073_vm2, %vm11072_vm14  ;;  %v8985_v60 = vsub.f32 %v4343_v39, %v4343_v39  ;;  %v8987_v8 = vsub.f32 %v4344_v35, %v4344_v35  ;;  %v11107_v50 = vld [vmem:[#allocation27_spill] sm:$0xff] }
 0x130   :  { %v11075_v59 = vsel %vm8981_vm5, 4294967295, %v11074_v59  ;;  %v11077_v38 = vand.u32 4294901760, %v8782_v28  ;;  %v8996_v45 = vsub.f32 %v568_v19, %v8943_v24  ;;  %v10577_v63 = vand.u32 4294901760, %v8928_v55  ;;  %6098 = vmatprep.subr.msk.bf16.mxu0 %vm8981_vm5, %v10751_v14  ;;  %6122 = vmatprep.subr.bf16.mxu1 %v6121_v10 }
 0x131   :  { %11076 = vst [vmem:[#allocation14_spill] sm:$0xff] %v11075_v59  ;;  %v10576_v39 = vand.u32 4294901760, %v8930_v13  ;;  %v6123_v35 = vpack.c.bf16 %v2603_v31, %v2596_v46  ;;  %v2610_v22 = vand.u32 4294901760, %v2609_v40  ;;  %v10578_v51 = vand.u32 4294901760, %v8952_v34  ;;  %v11103_v59 = vld [vmem:[#allocation24_spill] sm:$0xff] }
 0x132   :  { %v2742_v37 = vsub.f32 %v8782_v28, %v11077_v38  ;;  %11078 = vst [vmem:[#allocation21_spill] sm:$0xff] %v8996_v45  ;;  %vm11079_vm14 = vcmp.eq.s32.totalorder %v8685_v18, %v7565_v58  ;;  %vm11080_vm2 = vcmp.eq.s32.totalorder %v8696_v62, %v7565_v58  ;;  %v11081_v44 = vmov 0 }
 0x133   :  { %vm9013_vm1 = vmpackc.low %vm11080_vm2, %vm11079_vm14  ;;  %v6125_v19 = vpack.c.bf16 %v2729_v6, %v2722_v30  ;;  %v2617_v38 = vand.u32 4294901760, %v2616_v57  ;;  %v11084_v46 = vand.u32 4294901760, %v8914_v21  ;;  %v2736_v40 = vand.u32 4294901760, %v2735_v1  ;;  %6124 = vmatpush3.bf16.msra.mxu1 %v6123_v35  ;;  %v11101_v35 = vld [vmem:[#allocation22_spill] sm:$0xff] }
 0x134   :  { %v11082_v44 = vsel %vm9013_vm1, 4294967295, %v11081_v44  ;;  %vm11085_vm5 = vcmp.eq.s32.totalorder %v8762_v48, %v8822_v23  ;;  %vm11086_vm6 = vcmp.eq.s32.totalorder %v8765_v52, %v8822_v23  ;;  %v11087_v58 = vmov 0  ;;  %6100 = vmatpush3.bf16.msk.msra.mxu0 %vm9013_vm1, %v10751_v14 }
 0x135   :  { %11083 = vst [vmem:[#allocation15_spill] sm:$0xff] %v11082_v44  ;;  %v2513_v31 = vsub.f32 %v8914_v21, %v11084_v46  ;;  %vm9027_vm11 = vmpackc.low %vm11086_vm6, %vm11085_vm5  ;;  %v11090_v62 = vand.u32 4294901760, %v8848_v27  ;;  %v11091_v30 = vand.u32 4294901760, %v8865_v53  ;;  %v10585_v20 = vand.u32 4294901760, %v8985_v60  ;;  %6126 = vmatprep.subr.bf16.mxu1 %v6125_v19  ;;  %v11104_v21 = vld [vmem:[#allocation25_spill] sm:$0xff] }
 0x136   :  { %v11088_v58 = vsel %vm9027_vm11, 4294967295, %v11087_v58  ;;  %v2743_v48 = vand.u32 4294901760, %v2742_v37  ;;  %v2749_v57 = vsub.f32 %v8928_v55, %v10577_v63  ;;  %v2756_v46 = vsub.f32 %v8930_v13, %v10576_v39  ;;  %6102 = vmatprep.subr.msk.bf16.mxu0 %vm9027_vm11, %v10751_v14  ;;  %v11097_v39 = vld [vmem:[#allocation20_spill] sm:$0xff]  ;;  %v11098_v63 = vld [vmem:[#allocation19_spill] sm:$0xff] }
 0x137   :  { %11089 = vst [vmem:[#allocation17_spill] sm:$0xff] %v11088_v58  ;;  %v2623_v18 = vsub.f32 %v8848_v27, %v11090_v62  ;;  %v2630_v1 = vsub.f32 %v8865_v53, %v11091_v30  ;;  %v2522_v62 = vsub.f32 %v8952_v34, %v10578_v51  ;;  %vm11092_vm6 = vcmp.eq.s32.totalorder %v8817_v0, %v8822_v23 }
 0x138   :  { %vm11093_vm5 = vcmp.eq.s32.totalorder %v8829_v12, %v8822_v23  ;;  %v11094_v10 = vmov 0  ;;  %v6127_v37 = vpack.c.bf16 %v2617_v38, %v2610_v22  ;;  %v2514_v30 = vand.u32 4294901760, %v2513_v31 }
 0x139   :  { %vm9061_vm14 = vmpackc.low %vm11093_vm5, %vm11092_vm6  ;;  %v6137_v52 = vpack.c.bf16 %v11098_v63, %v11097_v39  ;;  %v2624_v51 = vand.u32 4294901760, %v2623_v18  ;;  %v2631_v6 = vand.u32 4294901760, %v2630_v1  ;;  %v2637_v58 = vsub.f32 %v8985_v60, %v10585_v20  ;;  %v11102_v18 = vld [vmem:[#allocation23_spill] sm:$0xff] }
 0x13a   :  { %v11095_v10 = vsel %vm9061_vm14, 4294967295, %v11094_v10  ;;  %v11099_v0 = vand.u32 4294901760, %v8987_v8  ;;  %v6129_v44 = vpack.c.bf16 %v2743_v48, %v2736_v40  ;;  %v11100_v34 = vand.u32 4294901760, %v8996_v45  ;;  %6104 = vmatpush3.bf16.msk.msra.mxu0 %vm9061_vm14, %v10751_v14  ;;  %6128 = vmatpush3.bf16.msra.mxu1 %v6127_v37 }
 0x13b   :  { %11096 = vst [vmem:[#allocation18_spill] sm:$0xff] %v11095_v10  ;;  %v2750_v38 = vand.u32 4294901760, %v2749_v57  ;;  %v2757_v31 = vand.u32 4294901760, %v2756_v46  ;;  %v6139_v1 = vpack.c.bf16 %v11102_v18, %v11101_v35  ;;  %v2523_v20 = vand.u32 4294901760, %v2522_v62  ;;  %6138 = vmatprep.subr.bf16.mxu0 %v6137_v52  ;;  %v11105_v46 = vld [vmem:[#allocation34_spill] sm:$0xff] }
 0x13c   :  { %v2644_v12 = vsub.f32 %v8987_v8, %v11099_v0  ;;  %v2528_v22 = vsub.f32 %v8996_v45, %v11100_v34  ;;  %v6141_v0 = vpack.c.bf16 %v11104_v21, %v11103_v59  ;;  %v6131_v19 = vpack.c.bf16 %v2631_v6, %v2624_v51  ;;  %6130 = vmatprep.subr.bf16.mxu1 %v6129_v44  ;;  %v11106_v10 = vld [vmem:[#allocation26_spill] sm:$0xff] }
 0x13d   :  { %v2638_v40 = vand.u32 4294901760, %v2637_v58  ;;  %2515 = vmatmul.mubr.f32.vlgmr.msra.gmra.mrb[24].mxu0 %v2514_v30  ;;  %v6133_v57 = vpack.c.bf16 %v2757_v31, %v2750_v38  ;;  %v6143_v45 = vpack.c.bf16 %v11106_v10, %v11105_v46  ;;  %v6145_v52 = vpack.c.bf16 %v8410_v26, %v11107_v50 }
 0x13e   :  { %v2645_v48 = vand.u32 4294901760, %v2644_v12  ;;  %v2529_v34 = vand.u32 4294901760, %v2528_v22  ;;  %6140 = vmatpush3.bf16.msra.mxu0 %v6139_v1  ;;  %2524 = vmatprep.mubr.f32.mxu0 %v2523_v20  ;;  %v6147_v51 = vpack.c.bf16 %v8438_v17, %v8416_v25  ;;  %v6149_v44 = vpack.c.bf16 %v8486_v7, %v8455_v47 }
 0x13f   :  { %6142 = vmatprep.subr.bf16.mxu0 %v6141_v0  ;;  %6132 = vmatpush3.bf16.msra.mxu1 %v6131_v19  ;;  %v6151_v58 = vpack.c.bf16 %v8538_v41, %v8509_v42  ;;  %v6155_v37 = vpack.c.bf16 %v8641_v2, %v8587_v61  ;;  %v6157_v30 = vpack.c.bf16 %v8711_v49, %v8662_v5  ;;  %v11111_v22 = vand.u32 4294901760, %v8535_v43  ;;  %v4809_v0 = vpop.f32.mrb[0].mxu0  ;;  %v11113_v19 = vld [vmem:[#allocation11_spill] sm:$0xff] }
 0x140   :  { %v6135_v62 = vpack.c.bf16 %v2645_v48, %v2638_v40  ;;  %6134 = vmatprep.subr.bf16.mxu1 %v6133_v57  ;;  %v6159_v31 = vpack.c.bf16 %v8757_v54, %v8736_v9  ;;  %v6161_v1 = vpack.c.bf16 %v8782_v28, %v8780_v56  ;;  %v9131_v40 = vadd.s32 904, %v11113_v19  ;;  %v4810_v57 = vpop.f32.mrb[1].mxu0 }
 0x141   :  { %2530 = vmatmul.mubr.f32.gmra.mrb[26].mxu0 %v2529_v34  ;;  %v6163_v34 = vpack.c.bf16 %v8865_v53, %v8848_v27 }
 0x142   :  { %6144 = vmatpush3.bf16.msra.mxu0 %v6143_v45  ;;  %2904 = vmatprep.mubr.f32.mxu0 %v8535_v43  ;;  %v6153_v45 = vpack.c.bf16 %v8565_v3, %v8563_v32  ;;  %v9128_v43 = vadd.s32 896, %v11113_v19  ;;  %vm11137_vm5 = vcmp.eq.s32.totalorder %v9131_v40, %v8822_v23 }
 0x143   :  { %6146 = vmatprep.subr.bf16.mxu0 %v6145_v52  ;;  %6136 = vmatpush3.bf16.msra.mxu1 %v6135_v62  ;;  %v6165_v52 = vpack.c.bf16 %v8930_v13, %v8928_v55  ;;  %v9141_v62 = vadd.s32 768, %v11113_v19 }
 0x144   :  { %6170 = vmatprep.subr.msk.bf16.mxu1 %vm8598_vm13, %v10751_v14  ;;  %vm10602_vm2 = vcmp.eq.s32.totalorder %v9128_v43, %v8822_v23 }
 0x146   :  { %6148 = vmatpush3.bf16.msra.mxu0 %v6147_v51  ;;  %2762 = vmatmul.mubr.f32.vlgmr.msra.gmra.mrb[24].mxu1 %v8851_v36  ;;  %v4811_v51 = vadd.f32 %v4810_v57, %v4809_v0  ;;  %v11120_v0 = vand.u32 4294901760, %v11104_v21  ;;  %v11121_v36 = vand.u32 4294901760, %v11105_v46  ;;  %v11126_v21 = vand.u32 4294901760, %v8416_v25 }
 0x147   :  { %6150 = vmatprep.subr.bf16.mxu0 %v6149_v44  ;;  %6172 = vmatpush3.bf16.msk.msra.mxu1 %vm8637_vm15, %v10751_v14  ;;  %v6167_v44 = vpack.c.bf16 %v8987_v8, %v8985_v60  ;;  %v11131_v25 = vand.u32 4294901760, %v8509_v42  ;;  %v9223_v42 = vadd.s32 784, %v11113_v19 }
 0x148   :  { %2767 = vmatprep.mubr.f32.mxu1 %v8893_v33  ;;  %6174 = vmatprep.subr.msk.bf16.mxu1 %vm8658_vm0, %v10751_v14 }
 0x14a   :  { %6152 = vmatpush3.bf16.msra.mxu0 %v6151_v58  ;;  %2769 = vmatmul.mubr.f32.gmra.mrb[26].mxu1 %v8943_v24  ;;  %v11115_v58 = vand.u32 4294901760, %v11097_v39  ;;  %v11118_v24 = vand.u32 4294901760, %v11102_v18  ;;  %v11122_v39 = vand.u32 4294901760, %v11106_v10  ;;  %v11127_v18 = vand.u32 4294901760, %v8438_v17 }
 0x14b   :  { %6154 = vmatprep.subr.bf16.mxu0 %v6153_v45  ;;  %6176 = vmatpush3.bf16.msk.msra.mxu1 %vm8707_vm8, %v10751_v14  ;;  %v11116_v45 = vand.u32 4294901760, %v11098_v63  ;;  %v11132_v17 = vand.u32 4294901760, %v8538_v41  ;;  %v9220_v41 = vadd.s32 920, %v11113_v19 }
 0x14c   :  { %3020 = vmatprep.mubr.f32.mxu1 %v11111_v22  ;;  %6178 = vmatprep.subr.msk.bf16.mxu1 %vm8732_vm10, %v10751_v14  ;;  %v11117_v22 = vand.u32 4294901760, %v11101_v35  ;;  %v9164_v63 = vpack.c.bf16 %v11122_v39, %v11121_v36  ;;  %v9182_v10 = vpack.c.bf16 %v11127_v18, %v11126_v21 }
 0x14e   :  { %6156 = vmatpush3.bf16.msra.mxu0 %v6155_v37  ;;  %v6201_v37 = vpack.c.bf16 %v11116_v45, %v11115_v58  ;;  %v6203_v33 = vpack.c.bf16 %v11118_v24, %v11117_v22  ;;  %v9167_v58 = vadd.s32 912, %v11113_v19  ;;  %v11124_v24 = vand.u32 4294901760, %v11107_v50 }
 0x14f   :  { %6158 = vmatprep.subr.bf16.mxu0 %v6157_v30  ;;  %6180 = vmatpush3.bf16.msk.msra.mxu1 %vm8776_vm4, %v10751_v14  ;;  %v9150_v30 = vadd.s32 776, %v11113_v19  ;;  %v11130_v50 = vand.u32 4294901760, %v8486_v7  ;;  %v9201_v45 = vpack.c.bf16 %v11132_v17, %v11131_v25  ;;  %v11133_v22 = vand.u32 4294901760, %v8563_v32 }
 0x150   :  { %6182 = vmatprep.subr.msk.bf16.mxu1 %vm8793_vm7, %v10751_v14  ;;  %v11135_v7 = vand.u32 4294901760, %v8587_v61  ;;  %v4377_v32 = vsel %vm10602_vm2, 1.0, %v10767_v29  ;;  %v9236_v61 = vadd.s32 792, %v11113_v19  ;;  %vm11145_vm2 = vnez %v11061_v4 }
 0x151   :  { %v11150_v17 = vand.u32 4294901760, %v8928_v55 }
 0x152   :  { %6160 = vmatpush3.bf16.msra.mxu0 %v6159_v31  ;;  %v11119_v31 = vand.u32 4294901760, %v11103_v59  ;;  %v11125_v59 = vand.u32 4294901760, %v8410_v26  ;;  %v11129_v26 = vand.u32 4294901760, %v8455_v47  ;;  %v11136_v47 = vand.u32 4294901760, %v8641_v2  ;;  %11138 = vst [vmem:[#allocation35_spill] sm:$0xff] %v9236_v61 }
 0x153   :  { %6162 = vmatprep.subr.bf16.mxu0 %v6161_v1  ;;  %6184 = vmatpush3.bf16.msk.msra.mxu1 %vm8842_vm9, %v10751_v14  ;;  %v11139_v2 = vand.u32 4294901760, %v8662_v5  ;;  %v11146_v5 = vand.u32 4294901760, %v8780_v56 }
 0x154   :  { %v6205_v57 = vpack.c.bf16 %v11120_v0, %v11119_v31  ;;  %v9176_v35 = vpack.c.bf16 %v11125_v59, %v11124_v24  ;;  %6186 = vmatprep.subr.msk.bf16.mxu1 %vm8861_vm3, %v10751_v14  ;;  %v9195_v46 = vpack.c.bf16 %v11130_v50, %v11129_v26  ;;  %v11134_v31 = vand.u32 4294901760, %v8565_v3 }
 0x155   :  { %v9215_v39 = vpack.c.bf16 %v11136_v47, %v11135_v7  ;;  %v4378_v3 = vsel %vm11137_vm5, 1.0, %v10767_v29  ;;  %v11141_v24 = vand.u32 4294901760, %v8736_v9  ;;  %v11142_v59 = vand.u32 4294901760, %v8757_v54 }
 0x156   :  { %v9207_v0 = vpack.c.bf16 %v11134_v31, %v11133_v22  ;;  %6164 = vmatpush3.bf16.msra.mxu0 %v6163_v34  ;;  %v11140_v34 = vand.u32 4294901760, %v8711_v49  ;;  %vm11143_vm5 = vcmp.eq.s32.totalorder %v9141_v62, %v8822_v23  ;;  %v9258_v26 = vadd.s32 928, %v11113_v19 }
 0x157   :  { %6166 = vmatprep.subr.bf16.mxu0 %v6165_v52  ;;  %6188 = vmatpush3.bf16.msk.msra.mxu1 %vm8905_vm12, %v10751_v14  ;;  %v9251_v21 = vpack.c.bf16 %v11142_v59, %v11141_v24  ;;  %v4361_v18 = vsel %vm11143_vm5, 1.0, %v10767_v29  ;;  %v11147_v49 = vand.u32 4294901760, %v8782_v28  ;;  %v11148_v54 = vand.u32 4294901760, %v8848_v27  ;;  %v4847_v28 = vpop.f32.mrb[0].mxu1 }
 0x158   :  { %v9245_v52 = vpack.c.bf16 %v11140_v34, %v11139_v2  ;;  %11144 = vst [vmem:[#allocation20_spill] sm:$0xff] %v9258_v26  ;;  %6190 = vmatprep.subr.msk.bf16.mxu1 %vm11145_vm2, %v10751_v14  ;;  %v11149_v50 = vand.u32 4294901760, %v8865_v53  ;;  %v11151_v22 = vand.u32 4294901760, %v8930_v13  ;;  %vm11152_vm5 = vcmp.eq.s32.totalorder %v9150_v30, %v8822_v23  ;;  %v4848_v55 = vpop.f32.mrb[1].mxu1  ;;  %v11162_v2 = vld [vmem:[#allocation31_spill] sm:$0xff]  ;;  %v11163_v34 = vld [vmem:[#allocation14_spill] sm:$0xff] }
 0x159   :  { %v9267_v9 = vpack.c.bf16 %v11147_v49, %v11146_v5  ;;  %v4362_v56 = vsel %vm11152_vm5, 1.0, %v10767_v29  ;;  %v9285_v7 = vsub.f32 %v4377_v32, %v4377_v32  ;;  %v9287_v27 = vsub.f32 %v4378_v3, %v4378_v3  ;;  %v11158_v32 = vld [vmem:[#allocation13_spill] sm:$0xff] }
 0x15a   :  { %v9273_v25 = vpack.c.bf16 %v11149_v50, %v11148_v54  ;;  %v9279_v31 = vpack.c.bf16 %v11151_v22, %v11150_v17  ;;  %6168 = vmatpush3.bf16.msra.mxu0 %v6167_v44  ;;  %vm11155_vm2 = vcmp.eq.s32.totalorder %v9167_v58, %v8822_v23  ;;  %v9295_v13 = vsub.f32 %v4361_v18, %v4361_v18  ;;  %v11169_v17 = vld [vmem:[#allocation16_spill] sm:$0xff] }
 0x15b   :  { %11153 = vst [vmem:[#allocation19_spill] sm:$0xff] %v9285_v7  ;;  %11154 = vst [vmem:[#allocation22_spill] sm:$0xff] %v9287_v27  ;;  %v4379_v53 = vsel %vm11155_vm2, 1.0, %v10767_v29  ;;  %6202 = vmatprep.subr.bf16.mxu0 %v6201_v37  ;;  %v9302_v44 = vadd.s32 936, %v11113_v19  ;;  %v4849_v47 = vadd.f32 %v4848_v55, %v4847_v28  ;;  %vm11159_vm6 = vnez %v11158_v32  ;;  %v4812_v28 = vpop.f32.mrb[2].mxu0 }
 0x15c   :  { %11156 = vst [vmem:[#allocation23_spill] sm:$0xff] %v9295_v13  ;;  %6192 = vmatpush3.bf16.msk.msra.mxu1 %vm11159_vm6, %v10751_v14  ;;  %v9307_v3 = vsub.f32 %v4362_v56, %v4362_v56  ;;  %v9312_v37 = vadd.s32 800, %v11113_v19  ;;  %vm11164_vm12 = vnez %v11163_v34  ;;  %v11165_v24 = vand.u32 4294901760, %v8985_v60  ;;  %v4850_v60 = vpop.f32.mrb[2].mxu1 }
 0x15d   :  { %11157 = vst [vmem:[#allocation24_spill] sm:$0xff] %v9302_v44  ;;  %2907 = vmatmul.mubr.f32.vlgmr.msra.gmra.mrb[28].mxu0 %v11162_v2  ;;  %6194 = vmatprep.subr.msk.bf16.mxu1 %vm11164_vm12, %v10751_v14  ;;  %v11166_v59 = vand.u32 4294901760, %v8987_v8  ;;  %vm11167_vm5 = vcmp.eq.s32.totalorder %v9220_v41, %v8822_v23  ;;  %v9328_v49 = vsub.f32 %v4379_v53, %v4379_v53  ;;  %v9331_v54 = vadd.s32 808, %v11113_v19 }
 0x15e   :  { %11160 = vst [vmem:[#allocation25_spill] sm:$0xff] %v9307_v3  ;;  %11161 = vst [vmem:[#allocation34_spill] sm:$0xff] %v9312_v37  ;;  %v4380_v5 = vsel %vm11167_vm5, 1.0, %v10767_v29  ;;  %v9333_v50 = vadd.f32 %v4849_v47, %v4811_v51  ;;  %6204 = vmatpush3.bf16.msra.mxu0 %v6203_v33  ;;  %2913 = vmatprep.mubr.f32.mxu0 %v11169_v17  ;;  %vm11170_vm2 = vcmp.eq.s32.totalorder %v9223_v42, %v8822_v23  ;;  %v4851_v51 = vpop.f32.mrb[3].mxu1 }
 0x15f   :  { %v9322_v18 = vpack.c.bf16 %v11166_v59, %v11165_v24  ;;  %11168 = vst [vmem:[#allocation26_spill] sm:$0xff] %v9328_v49  ;;  %v4363_v8 = vsel %vm11170_vm2, 1.0, %v10767_v29  ;;  %vm11171_vm5 = vcmp.eq.s32.totalorder %v9236_v61, %v8822_v23  ;;  %6206 = vmatprep.subr.bf16.mxu0 %v6205_v57  ;;  %vm289_vm12 = vcmp.eq.s32.totalorder %v9302_v44, %v8822_v23  ;;  %v4813_v24 = vpop.f32.mrb[3].mxu0 }
 0x160   :  { %v4364_v22 = vsel %vm11171_vm5, 1.0, %v10767_v29  ;;  %vm11172_vm6 = vcmp.eq.s32.totalorder %v9258_v26, %v8822_v23  ;;  %6196 = vmatpush3.bf16.msk.msra.mxu1 %vm9013_vm1, %v10751_v14  ;;  %v4852_v57 = vadd.f32 %v4851_v51, %v4850_v60  ;;  %vm10608_vm2 = vcmp.eq.s32.totalorder %v9312_v37, %v8822_v23  ;;  %v11174_v26 = vld [vmem:[#allocation21_spill] sm:$0xff]  ;;  %v11177_v51 = vld [vmem:[#allocation30_spill] sm:$0xff] }
 0x161   :  { %v4381_v33 = vsel %vm11172_vm6, 1.0, %v10767_v29  ;;  %v9360_v56 = vadd.s32 944, %v11113_v19  ;;  %2916 = vmatmul.mubr.f32.gmra.mrb[30].mxu0 %v11174_v26  ;;  %6198 = vmatprep.subr.msk.bf16.mxu1 %vm9027_vm11, %v10751_v14  ;;  %v4814_v55 = vadd.f32 %v4813_v24, %v4812_v28  ;;  %v9366_v61 = vsub.f32 %v4380_v5, %v4380_v5 }
 0x162   :  { %vm273_vm6 = vcmp.eq.s32.totalorder %v9331_v54, %v8822_v23  ;;  %v9371_v60 = vadd.s32 952, %v11113_v19  ;;  %6208 = vmatpush3.bf16.msra.mxu0 %v9164_v63  ;;  %3201 = vmatprep.mubr.f32.mxu0 %v11177_v51  ;;  %v9375_v59 = vsub.f32 %v4363_v8, %v4363_v8  ;;  %v9377_v47 = vsub.f32 %v4364_v22, %v4364_v22 }
 0x163   :  { %11176 = vst [vmem:[#allocation27_spill] sm:$0xff] %v9366_v61  ;;  %v4382_v5 = vsel %vm289_vm12, 1.0, %v10767_v29  ;;  %v9383_v28 = vsub.f32 %v4381_v33, %v4381_v33  ;;  %6210 = vmatprep.subr.bf16.mxu0 %v9176_v35  ;;  %v9386_v24 = vadd.f32 %v4852_v57, %v4814_v55  ;;  %v4365_v63 = vsel %vm10608_vm2, 1.0, %v10767_v29 }
 0x164   :  { %11178 = vst [vmem:[#allocation28_spill] sm:$0xff] %v9375_v59  ;;  %11179 = vst [vmem:[#allocation29_spill] sm:$0xff] %v9377_v47  ;;  %v11180_v8 = vand.u32 4294901760, %v9285_v7  ;;  %v11181_v53 = vand.u32 4294901760, %v9287_v27  ;;  %6200 = vmatpush3.bf16.msk.msra.mxu1 %vm9061_vm14, %v10751_v14  ;;  %v4366_v35 = vsel %vm273_vm6, 1.0, %v10767_v29  ;;  %v11183_v55 = vand.u32 4294901760, %v9295_v13 }
 0x165   :  { %v11184_v37 = vand.u32 4294901760, %v9307_v3  ;;  %vm290_vm5 = vcmp.eq.s32.totalorder %v9360_v56, %v8822_v23  ;;  %6234 = vmatprep.subr.msk.bf16.mxu1 %vm8598_vm13, %v10751_v14  ;;  %vm291_vm2 = vcmp.eq.s32.totalorder %v9371_v60, %v8822_v23  ;;  %v11187_v20 = vand.u32 4294901760, %v9328_v49  ;;  %v562_v60 = vld [vmem:[#allocation5 + $0x30] sm:$0xff] }
 0x166   :  { %v3569_v22 = vsub.f32 %v9285_v7, %v11180_v8  ;;  %v3576_v44 = vsub.f32 %v9287_v27, %v11181_v53  ;;  %v3457_v57 = vsub.f32 %v9295_v13, %v11183_v55  ;;  %v9419_v53 = vadd.s32 816, %v11113_v19  ;;  %6212 = vmatpush3.bf16.msra.mxu0 %v9182_v10 }
 0x167   :  { %v3464_v8 = vsub.f32 %v9307_v3, %v11184_v37  ;;  %v9424_v37 = vsub.f32 %v4382_v5, %v4382_v5  ;;  %v9426_v3 = vsub.f32 %v4365_v63, %v4365_v63  ;;  %v9429_v13 = vadd.s32 824, %v11113_v19  ;;  %6214 = vmatprep.subr.bf16.mxu0 %v9195_v46 }
 0x168   :  { %v11185_v7 = vand.u32 4294901760, %v11162_v2  ;;  %v3570_v33 = vand.u32 4294901760, %v3569_v22  ;;  %v3577_v27 = vand.u32 4294901760, %v3576_v44  ;;  %v10618_v55 = vand.u32 4294901760, %v9377_v47 }
 0x169   :  { %v9437_v10 = vadd.s32 960, %v11113_v19  ;;  %v11186_v5 = vand.u32 4294901760, %v11169_v17  ;;  %v3458_v63 = vand.u32 4294901760, %v3457_v57  ;;  %v3465_v16 = vand.u32 4294901760, %v3464_v8 }
 0x16a   :  { %3024 = vmatmul.mubr.f32.vlgmr.msra.gmra.mrb[28].mxu1 %v11185_v7  ;;  %v4383_v46 = vsel %vm290_vm5, 1.0, %v10767_v29  ;;  %v4384_v7 = vsel %vm291_vm2, 1.0, %v10767_v29  ;;  %vm10639_vm13 = vcmp.eq.s32.totalorder %v9419_v53, %v8822_v23  ;;  %v3583_v44 = vsub.f32 %v9328_v49, %v11187_v20  ;;  %6216 = vmatpush3.bf16.msra.mxu0 %v9201_v45 }
 0x16b   :  { %6236 = vmatpush3.bf16.msk.msra.mxu1 %vm8637_vm15, %v10751_v14  ;;  %3031 = vmatprep.mubr.f32.mxu1 %v11186_v5  ;;  %v11188_v2 = vand.u32 4294901760, %v9366_v61  ;;  %v9464_v22 = vadd.s32 968, %v11113_v19  ;;  %v9467_v57 = vsub.f32 %v4366_v35, %v4366_v35  ;;  %v11189_v6 = vand.u32 4294901760, %v9375_v59 }
 0x16c   :  { %6238 = vmatprep.subr.msk.bf16.mxu1 %vm8658_vm0, %v10751_v14  ;;  %vm10617_vm0 = vcmp.eq.s32.totalorder %v9429_v13, %v8822_v23  ;;  %v9475_v5 = vadd.s32 832, %v11113_v19  ;;  %v11190_v20 = vand.u32 4294901760, %v11174_v26  ;;  %6218 = vmatprep.subr.bf16.mxu0 %v9207_v0  ;;  %v3478_v45 = vsub.f32 %v9377_v47, %v10618_v55 }
 0x16d   :  { %v3590_v17 = vsub.f32 %v9366_v61, %v11188_v2  ;;  %v3471_v8 = vsub.f32 %v9375_v59, %v11189_v6  ;;  %v9480_v2 = vpack.c.bf16 %v3577_v27, %v3570_v33  ;;  %vm10634_vm15 = vcmp.eq.s32.totalorder %v9437_v10, %v8822_v23  ;;  %v563_v6 = vld [vmem:[#allocation5 + $0x38] sm:$0xff] }
 0x16e   :  { %3035 = vmatmul.mubr.f32.gmra.mrb[30].mxu1 %v11190_v20  ;;  %v9488_v35 = vadd.s32 840, %v11113_v19  ;;  %v9494_v0 = vpack.c.bf16 %v3465_v16, %v3458_v63  ;;  %v9496_v26 = vsub.f32 %v4383_v46, %v4383_v46  ;;  %v9498_v27 = vsub.f32 %v4384_v7, %v4384_v7  ;;  %6220 = vmatpush3.bf16.msra.mxu0 %v9215_v39 }
 0x16f   :  { %6240 = vmatpush3.bf16.msk.msra.mxu1 %vm8707_vm8, %v10751_v14  ;;  %3312 = vmatprep.mubr.f32.mxu1 %v11177_v51  ;;  %v4367_v33 = vsel %vm10639_vm13, 1.0, %v10767_v29  ;;  %v4368_v12 = vsel %vm10617_vm0, 1.0, %v10767_v29  ;;  %v3584_v51 = vand.u32 4294901760, %v3583_v44  ;;  %v3591_v16 = vand.u32 4294901760, %v3590_v17  ;;  %v4885_v17 = vpop.f32.mrb[4].mxu0 }
 0x170   :  { %11191 = vst [vmem:[#allocation32_spill] sm:$0xff] %v9498_v27  ;;  %6242 = vmatprep.subr.msk.bf16.mxu1 %vm8732_vm10, %v10751_v14  ;;  %vm10633_vm8 = vcmp.eq.s32.totalorder %v9464_v22, %v8822_v23  ;;  %v3472_v63 = vand.u32 4294901760, %v3471_v8  ;;  %v4385_v46 = vsel %vm10634_vm15, 1.0, %v10767_v29  ;;  %vm10628_vm10 = vcmp.eq.s32.totalorder %v9475_v5, %v8822_v23  ;;  %6222 = vmatprep.subr.bf16.mxu0 %v9245_v52  ;;  %v4886_v55 = vpop.f32.mrb[5].mxu0 }
 0x171   :  { %v9520_v38 = vand.u32 4294901760, %v563_v6  ;;  %v3479_v7 = vand.u32 4294901760, %v3478_v45  ;;  %vm10627_vm0 = vcmp.eq.s32.totalorder %v9488_v35, %v8822_v23  ;;  %v9530_v8 = vsub.f32 %v4367_v33, %v4367_v33 }
 0x172   :  { %v9532_v20 = vsub.f32 %v4368_v12, %v4368_v12  ;;  %v4386_v52 = vsel %vm10633_vm8, 1.0, %v10767_v29  ;;  %v9539_v45 = vadd.s32 976, %v11113_v19  ;;  %v9544_v39 = vsub.f32 %v4385_v46, %v4385_v46  ;;  %6224 = vmatpush3.bf16.msra.mxu0 %v9251_v21 }
 0x173   :  { %11192 = vst [vmem:[#allocation33_spill] sm:$0xff] %v9520_v38  ;;  %6244 = vmatpush3.bf16.msk.msra.mxu1 %vm8776_vm4, %v10751_v14  ;;  %11193 = vst [vmem:[#allocation11_spill] sm:$0xff] %v9530_v8  ;;  %v4369_v15 = vsel %vm10628_vm10, 1.0, %v10767_v29  ;;  %v9552_v12 = vadd.s32 984, %v11113_v19  ;;  %v4887_v44 = vadd.f32 %v4886_v55, %v4885_v17  ;;  %v4370_v48 = vsel %vm10627_vm0, 1.0, %v10767_v29  ;;  %6226 = vmatprep.subr.bf16.mxu0 %v9267_v9 }
 0x174   :  { %11194 = vst [vmem:[#allocation12_spill] sm:$0xff] %v9532_v20  ;;  %6246 = vmatprep.subr.msk.bf16.mxu1 %vm8793_vm7, %v10751_v14  ;;  %v10629_v46 = vand.u32 4294901760, %v9467_v57  ;;  %v9561_v47 = vsub.f32 %v563_v6, %v9520_v38  ;;  %v9564_v59 = vpack.c.bf16 %v3591_v16, %v3584_v51  ;;  %v9566_v33 = vpack.c.bf16 %v3479_v7, %v3472_v63  ;;  %v4888_v6 = vpop.f32.mrb[6].mxu0 }
 0x175   :  { %v11195_v55 = vand.u32 4294901760, %v9383_v28  ;;  %v11196_v17 = vand.u32 4294901760, %v9424_v37  ;;  %v1073_v49 = vadd.f32 %v4887_v44, %v9333_v50  ;;  %v9578_v9 = vsub.f32 %v4386_v52, %v4386_v52  ;;  %v4889_v16 = vpop.f32.mrb[7].mxu0 }
 0x176   :  { %v9580_v51 = vsub.f32 %v4369_v15, %v4369_v15  ;;  %vm10631_vm4 = vcmp.eq.s32.totalorder %v9539_v45, %v8822_v23  ;;  %v9587_v63 = vsub.f32 %v4370_v48, %v4370_v48  ;;  %v11197_v50 = vand.u32 4294901760, %v9426_v3  ;;  %6228 = vmatpush3.bf16.msra.mxu0 %v9273_v25 }
 0x177   :  { %v3597_v21 = vsub.f32 %v9383_v28, %v11195_v55  ;;  %v3604_v61 = vsub.f32 %v9424_v37, %v11196_v17  ;;  %6248 = vmatpush3.bf16.msk.msra.mxu1 %vm8842_vm9, %v10751_v14  ;;  %vm10630_vm9 = vcmp.eq.s32.totalorder %v9552_v12, %v8822_v23  ;;  %v9595_v7 = vadd.s32 848, %v11113_v19  ;;  %6230 = vmatprep.subr.bf16.mxu0 %v9279_v31 }
 0x178   :  { %6250 = vmatprep.subr.msk.bf16.mxu1 %vm8861_vm3, %v10751_v14  ;;  %v3485_v1 = vsub.f32 %v9426_v3, %v11197_v50  ;;  %v4890_v44 = vadd.f32 %v4889_v16, %v4888_v6  ;;  %v3492_v36 = vsub.f32 %v9467_v57, %v10629_v46  ;;  %v9602_v52 = vadd.s32 856, %v11113_v19  ;;  %v4923_v16 = vpop.f32.mrb[4].mxu1 }
 0x179   :  { %v10632_v15 = vand.u32 4294901760, %v9561_v47  ;;  %v3598_v48 = vand.u32 4294901760, %v3597_v21  ;;  %v3605_v55 = vand.u32 4294901760, %v3604_v61  ;;  %v4387_v17 = vsel %vm10631_vm4, 1.0, %v10767_v29 }
 0x17a   :  { %v10637_v25 = vand.u32 4294901760, %v9496_v26  ;;  %v1082_v6 = vadd.f32 %v4890_v44, %v9386_v24  ;;  %vm11198_vm7 = vnez %v11055_v11  ;;  %vm11199_vm3 = vcmp.eq.s32.totalorder %v9128_v43, %v8822_v23  ;;  %6232 = vmatpush3.bf16.msra.mxu0 %v9322_v18  ;;  %v4924_v24 = vpop.f32.mrb[5].mxu1 }
 0x17b   :  { %6252 = vmatpush3.bf16.msk.msra.mxu1 %vm11198_vm7, %v10751_v14  ;;  %vm11200_vm0 = vcmp.eq.s32.totalorder %v9131_v40, %v8822_v23  ;;  %v11201_v61 = vmov 0  ;;  %v4388_v31 = vsel %vm10630_vm9, 1.0, %v10767_v29  ;;  %v9631_v11 = vadd.s32 992, %v11113_v19 }
 0x17c   :  { %vm9621_vm10 = vmpackc.low %vm11200_vm0, %vm11199_vm3  ;;  %vm11204_vm7 = vnez %v11061_v4  ;;  %vm10638_vm0 = vcmp.eq.s32.totalorder %v9595_v7, %v8822_v23  ;;  %v10635_v43 = vand.u32 4294901760, %v9530_v8  ;;  %v10636_v40 = vand.u32 4294901760, %v9532_v20 }
 0x17d   :  { %v11202_v61 = vsel %vm9621_vm10, 4294967295, %v11201_v61  ;;  %6254 = vmatprep.subr.msk.bf16.mxu1 %vm11204_vm7, %v10751_v14  ;;  %v9641_v21 = vadd.s32 1000, %v11113_v19  ;;  %v3486_v50 = vand.u32 4294901760, %v3485_v1  ;;  %v3493_v44 = vand.u32 4294901760, %v3492_v36  ;;  %6266 = vmatprep.subr.msk.bf16.mxu0 %vm9621_vm10, %v10751_v14 }
 0x17e   :  { %11203 = vst [vmem:[#allocation36_spill] sm:$0xff] %v11202_v61  ;;  %v9644_v46 = vsub.f32 %v4387_v17, %v4387_v17  ;;  %v3425_v4 = vsub.f32 %v9561_v47, %v10632_v15  ;;  %vm11205_vm3 = vcmp.eq.s32.totalorder %v9141_v62, %v8822_v23  ;;  %vm11206_vm7 = vcmp.eq.s32.totalorder %v9150_v30, %v8822_v23 }
 0x17f   :  { %vm9658_vm9 = vmpackc.low %vm11206_vm7, %vm11205_vm3  ;;  %v11207_v18 = vmov 0  ;;  %v9662_v1 = vpack.c.bf16 %v3605_v55, %v3598_v48  ;;  %v9664_v36 = vsub.f32 %v4388_v31, %v4388_v31  ;;  %vm279_vm4 = vcmp.eq.s32.totalorder %v9602_v52, %v8822_v23 }
 0x180   :  { %v11208_v18 = vsel %vm9658_vm9, 4294967295, %v11207_v18  ;;  %v3611_v17 = vsub.f32 %v9496_v26, %v10637_v25  ;;  %v4925_v15 = vadd.f32 %v4924_v24, %v4923_v16  ;;  %vm11210_vm8 = vnez %v11158_v32  ;;  %v4926_v16 = vpop.f32.mrb[6].mxu1 }
 0x181   :  { %11209 = vst [vmem:[#allocation37_spill] sm:$0xff] %v11208_v18  ;;  %6256 = vmatpush3.bf16.msk.msra.mxu1 %vm11210_vm8, %v10751_v14  ;;  %vm11211_vm3 = vcmp.eq.s32.totalorder %v9167_v58, %v8822_v23  ;;  %vm11212_vm7 = vcmp.eq.s32.totalorder %v9220_v41, %v8822_v23  ;;  %v11213_v62 = vmov 0  ;;  %v4371_v30 = vsel %vm10638_vm0, 1.0, %v10767_v29  ;;  %v11217_v58 = vld [vmem:[#allocation38_spill] sm:$0xff]  ;;  %v4927_v25 = vpop.f32.mrb[7].mxu1  ;;  %v11227_v18 = vld [vmem:[#allocation20_spill] sm:$0xff] }
 0x182   :  { %vm9680_vm15 = vmpackc.low %vm11212_vm7, %vm11211_vm3  ;;  %v11216_v48 = vand.u32 4294901760, %v9498_v27  ;;  %vm10664_vm8 = vcmp.eq.s32.totalorder %v9631_v11, %v8822_v23  ;;  %3203 = vmatmul.mubr.f32.vlgmr.msra.gmra.mrb[32].mxu0 %v11217_v58  ;;  %vm11218_vm3 = vnez %v11163_v34  ;;  %v3499_v41 = vsub.f32 %v9530_v8, %v10635_v43  ;;  %v11219_v34 = vld [vmem:[#allocation39_spill] sm:$0xff] }
 0x183   :  { %v11214_v62 = vsel %vm9680_vm15, 4294967295, %v11213_v62  ;;  %6258 = vmatprep.subr.msk.bf16.mxu1 %vm11218_vm3, %v10751_v14  ;;  %v3506_v55 = vsub.f32 %v9532_v20, %v10636_v40  ;;  %vm10661_vm7 = vcmp.eq.s32.totalorder %v9641_v21, %v8822_v23  ;;  %v9706_v31 = vadd.s32 864, %v11113_v19  ;;  %6268 = vmatpush3.bf16.msk.msra.mxu0 %vm9658_vm9, %v10751_v14 }
 0x184   :  { %11215 = vst [vmem:[#allocation13_spill] sm:$0xff] %v11214_v62  ;;  %v3618_v32 = vsub.f32 %v9498_v27, %v11216_v48  ;;  %v9708_v24 = vadd.f32 %v4925_v15, %v1073_v49  ;;  %3208 = vmatprep.mubr.f32.mxu0 %v11219_v34  ;;  %v9714_v48 = vpack.c.bf16 %v3493_v44, %v3486_v50  ;;  %v9717_v43 = vadd.s32 872, %v11113_v19  ;;  %v11221_v49 = vld [vmem:[#allocation35_spill] sm:$0xff] }
 0x185   :  { %v3426_v40 = vand.u32 4294901760, %v3425_v4  ;;  %6270 = vmatprep.subr.msk.bf16.mxu0 %vm9680_vm15, %v10751_v14  ;;  %vm11220_vm3 = vcmp.eq.s32.totalorder %v9223_v42, %v8822_v23  ;;  %vm11222_vm0 = vcmp.eq.s32.totalorder %v11221_v49, %v8822_v23  ;;  %v11223_v15 = vmov 0  ;;  %6260 = vmatpush3.bf16.msk.msra.mxu1 %vm9013_vm1, %v10751_v14  ;;  %v11233_v49 = vld [vmem:[#allocation40_spill] sm:$0xff] }
 0x186   :  { %vm9728_vm13 = vmpackc.low %vm11222_vm0, %vm11220_vm3  ;;  %v4372_v50 = vsel %vm279_vm4, 1.0, %v10767_v29  ;;  %v9736_v44 = vsub.f32 %v4371_v30, %v4371_v30  ;;  %v3612_v4 = vand.u32 4294901760, %v3611_v17  ;;  %v4389_v42 = vsel %vm10664_vm8, 1.0, %v10767_v29  ;;  %3210 = vmatmul.mubr.f32.gmra.mrb[34].mxu0 %v11233_v49  ;;  %6262 = vmatprep.subr.msk.bf16.mxu1 %vm9027_vm11, %v10751_v14 }
 0x187   :  { %v11224_v15 = vsel %vm9728_vm13, 4294967295, %v11223_v15  ;;  %v4928_v62 = vadd.f32 %v4927_v25, %v4926_v16  ;;  %vm11228_vm0 = vcmp.eq.s32.totalorder %v11227_v18, %v8822_v23  ;;  %v11230_v30 = vmov 0  ;;  %6272 = vmatpush3.bf16.msk.msra.mxu0 %vm9728_vm13, %v10751_v14  ;;  %3427 = vmatprep.mubr.f32.mxu0 %v3426_v40 }
 0x188   :  { %11225 = vst [vmem:[#allocation31_spill] sm:$0xff] %v11224_v15  ;;  %vm9751_vm3 = vmpackc.low %vm289_vm12, %vm11228_vm0  ;;  %v4390_v17 = vsel %vm10661_vm7, 1.0, %v10767_v29  ;;  %v3619_v20 = vand.u32 4294901760, %v3618_v32  ;;  %v3500_v8 = vand.u32 4294901760, %v3499_v41  ;;  %v3507_v61 = vand.u32 4294901760, %v3506_v55 }
 0x189   :  { %v11231_v30 = vsel %vm9751_vm3, 4294967295, %v11230_v30  ;;  %vm10657_vm12 = vcmp.eq.s32.totalorder %v9706_v31, %v8822_v23  ;;  %v9767_v27 = vadd.f32 %v4928_v62, %v1082_v6  ;;  %vm10656_vm1 = vcmp.eq.s32.totalorder %v9717_v43, %v8822_v23  ;;  %6274 = vmatprep.subr.msk.bf16.mxu0 %vm9751_vm3, %v10751_v14  ;;  %v11235_v6 = vld [vmem:[#allocation34_spill] sm:$0xff]  ;;  %6264 = vmatpush3.bf16.msk.msra.mxu1 %vm9061_vm14, %v10751_v14 }
 0x18a   :  { %11232 = vst [vmem:[#allocation14_spill] sm:$0xff] %v11231_v30  ;;  %v9775_v16 = vadd.s32 1008, %v11113_v19  ;;  %v9778_v18 = vadd.s32 1016, %v11113_v19  ;;  %vm11236_vm11 = vcmp.eq.s32.totalorder %v11235_v6, %v8822_v23  ;;  %v9793_v32 = vsub.f32 %v4372_v50, %v4372_v50  ;;  %6298 = vmatprep.subr.bf16.mxu1 %v9480_v2  ;;  %v571_v2 = vld [vmem:[#allocation5 + $0x78] sm:$0xff] }
 0x18b   :  { %vm9789_vm0 = vmpackc.low %vm273_vm6, %vm11236_vm11  ;;  %v9795_v41 = vsub.f32 %v4389_v42, %v4389_v42  ;;  %v9797_v55 = vsub.f32 %v4390_v17, %v4390_v17  ;;  %v4373_v50 = vsel %vm10657_vm12, 1.0, %v10767_v29  ;;  %v11242_v42 = vand.u32 4294901760, %v9544_v39 }
 0x18c   :  { %vm9809_vm6 = vmpackc.low %vm291_vm2, %vm290_vm5  ;;  %v11243_v25 = vand.u32 4294901760, %v9578_v9  ;;  %v10658_v6 = vand.u32 4294901760, %v9587_v63  ;;  %v9825_v40 = vpack.c.bf16 %v3619_v20, %v3612_v4  ;;  %v4374_v30 = vsel %vm10656_vm1, 1.0, %v10767_v29  ;;  %6276 = vmatpush3.bf16.msk.msra.mxu0 %vm9789_vm0, %v10751_v14  ;;  %3314 = vmatmul.mubr.f32.vlgmr.msra.gmra.mrb[32].mxu1 %v11217_v58 }
 0x18d   :  { %v3625_v17 = vsub.f32 %v9544_v39, %v11242_v42  ;;  %v9832_v15 = vadd.s32 880, %v11113_v19  ;;  %v9835_v42 = vadd.s32 888, %v11113_v19  ;;  %vm10660_vm14 = vcmp.eq.s32.totalorder %v9775_v16, %v8822_v23  ;;  %6278 = vmatprep.subr.msk.bf16.mxu0 %vm9809_vm6, %v10751_v14  ;;  %6300 = vmatpush3.bf16.msra.mxu1 %v9494_v0 }
 0x18e   :  { %v3632_v56 = vsub.f32 %v9578_v9, %v11243_v25  ;;  %v9840_v25 = vpack.c.bf16 %v3507_v61, %v3500_v8  ;;  %vm10659_vm2 = vcmp.eq.s32.totalorder %v9778_v18, %v8822_v23  ;;  %vm11244_vm5 = vcmp.eq.s32.totalorder %v9419_v53, %v8822_v23  ;;  %3319 = vmatprep.mubr.f32.mxu1 %v11219_v34 }
 0x18f   :  { %vm11245_vm11 = vcmp.eq.s32.totalorder %v9429_v13, %v8822_v23  ;;  %v9861_v8 = vsub.f32 %v4373_v50, %v4373_v50  ;;  %v11248_v61 = vand.u32 4294901760, %v9580_v51  ;;  %v10665_v4 = vand.u32 4294901760, %v9664_v36  ;;  %6302 = vmatprep.subr.bf16.mxu1 %v9564_v59 }
 0x190   :  { %vm9857_vm1 = vmpackc.low %vm11245_vm11, %vm11244_vm5  ;;  %v9867_v20 = vand.u32 4294901760, %v562_v60  ;;  %vm11249_vm5 = vcmp.eq.s32.totalorder %v9437_v10, %v8822_v23  ;;  %vm11250_vm11 = vcmp.eq.s32.totalorder %v9464_v22, %v8822_v23  ;;  %v11251_v13 = vmov 0  ;;  %3321 = vmatmul.mubr.f32.gmra.mrb[34].mxu1 %v11233_v49 }
 0x191   :  { %v3513_v58 = vsub.f32 %v9580_v51, %v11248_v61  ;;  %vm9877_vm12 = vmpackc.low %vm11250_vm11, %vm11249_vm5  ;;  %v9881_v53 = vsub.f32 %v4374_v30, %v4374_v30  ;;  %v3626_v50 = vand.u32 4294901760, %v3625_v17  ;;  %v3633_v61 = vand.u32 4294901760, %v3632_v56  ;;  %6280 = vmatpush3.bf16.msk.msra.mxu0 %vm9857_vm1, %v10751_v14  ;;  %6304 = vmatpush3.bf16.msra.mxu1 %v9566_v33 }
 0x192   :  { %v11252_v13 = vsel %vm9877_vm12, 4294967295, %v11251_v13  ;;  %v3520_v0 = vsub.f32 %v9587_v63, %v10658_v6  ;;  %v4391_v10 = vsel %vm10660_vm14, 1.0, %v10767_v29  ;;  %v4392_v22 = vsel %vm10659_vm2, 1.0, %v10767_v29  ;;  %v570_v6 = vld [vmem:[#allocation5 + $0x70] sm:$0xff]  ;;  %6282 = vmatprep.subr.msk.bf16.mxu0 %vm9877_vm12, %v10751_v14  ;;  %3678 = vmatprep.mubr.f32.mxu1 %v9520_v38  ;;  %v4961_v38 = vpop.f32.mrb[8].mxu0 }
 0x193   :  { %11253 = vst [vmem:[#allocation16_spill] sm:$0xff] %v11252_v13  ;;  %vm10671_vm5 = vcmp.eq.s32.totalorder %v9832_v15, %v8822_v23  ;;  %vm10668_vm11 = vcmp.eq.s32.totalorder %v9835_v42, %v8822_v23  ;;  %v11254_v59 = vand.u32 4294901760, %v9644_v46  ;;  %v9907_v56 = vand.u32 4294901760, %v571_v2  ;;  %6306 = vmatprep.subr.bf16.mxu1 %v9662_v1 }
 0x194   :  { %vm11255_vm2 = vcmp.eq.s32.totalorder %v9475_v5, %v8822_v23  ;;  %vm11256_vm14 = vcmp.eq.s32.totalorder %v9488_v35, %v8822_v23  ;;  %v3514_v17 = vand.u32 4294901760, %v3513_v58  ;;  %v3646_v30 = vsub.f32 %v9664_v36, %v10665_v4 }
 0x195   :  { %v3639_v34 = vsub.f32 %v9644_v46, %v11254_v59  ;;  %vm9919_vm7 = vmpackc.low %vm11256_vm14, %vm11255_vm2  ;;  %v9927_v49 = vsub.f32 %v562_v60, %v9867_v20  ;;  %vm11260_vm8 = vcmp.eq.s32.totalorder %v9539_v45, %v8822_v23  ;;  %vm11261_vm14 = vcmp.eq.s32.totalorder %v9552_v12, %v8822_v23  ;;  %6308 = vmatpush3.bf16.msra.mxu1 %v9714_v48  ;;  %v4962_v12 = vpop.f32.mrb[9].mxu0 }
 0x196   :  { %vm9937_vm2 = vmpackc.low %vm11261_vm14, %vm11260_vm8  ;;  %v11262_v5 = vmov 0  ;;  %v6313_v35 = vpack.c.bf16 %v3633_v61, %v3626_v50  ;;  %v3521_v58 = vand.u32 4294901760, %v3520_v0  ;;  %v9941_v4 = vsub.f32 %v4391_v10, %v4391_v10  ;;  %6284 = vmatpush3.bf16.msk.msra.mxu0 %vm9919_vm7, %v10751_v14  ;;  %6310 = vmatprep.subr.bf16.mxu1 %v9825_v40 }
 0x197   :  { %11259 = vst [vmem:[#allocation21_spill] sm:$0xff] %v9927_v49  ;;  %v11263_v5 = vsel %vm9937_vm2, 4294967295, %v11262_v5  ;;  %v9943_v60 = vsub.f32 %v4392_v22, %v4392_v22  ;;  %v4375_v45 = vsel %vm10671_vm5, 1.0, %v10767_v29  ;;  %v4376_v33 = vsel %vm10668_vm11, 1.0, %v10767_v29  ;;  %6286 = vmatprep.subr.msk.bf16.mxu0 %vm9937_vm2, %v10751_v14 }
 0x198   :  { %11264 = vst [vmem:[#allocation30_spill] sm:$0xff] %v11263_v5  ;;  %v9956_v50 = vand.u32 4294901760, %v570_v6  ;;  %v3640_v61 = vand.u32 4294901760, %v3639_v34  ;;  %v11265_v1 = vand.u32 4294901760, %v9736_v44  ;;  %v11266_v10 = vand.u32 4294901760, %v9793_v32 }
 0x199   :  { %v9968_v13 = vsub.f32 %v571_v2, %v9907_v56  ;;  %vm11268_vm8 = vcmp.eq.s32.totalorder %v9595_v7, %v8822_v23  ;;  %v11269_v29 = vmov 0  ;;  %v3647_v34 = vand.u32 4294901760, %v3646_v30  ;;  %6312 = vmatpush3.bf16.msra.mxu1 %v9840_v25 }
 0x19a   :  { %v3527_v0 = vsub.f32 %v9736_v44, %v11265_v1  ;;  %v3534_v22 = vsub.f32 %v9793_v32, %v11266_v10  ;;  %vm9979_vm14 = vmpackc.low %vm279_vm4, %vm11268_vm8  ;;  %v11272_v2 = vand.u32 4294901760, %v9795_v41  ;;  %vm11273_vm11 = vcmp.eq.s32.totalorder %v9631_v11, %v8822_v23  ;;  %6314 = vmatprep.subr.bf16.mxu1 %v6313_v35 }
 0x19b   :  { %11267 = vst [vmem:[#allocation38_spill] sm:$0xff] %v9968_v13  ;;  %v11270_v29 = vsel %vm9979_vm14, 4294967295, %v11269_v29  ;;  %vm11274_vm4 = vcmp.eq.s32.totalorder %v9641_v21, %v8822_v23  ;;  %v11275_v7 = vmov 0  ;;  %v6315_v52 = vpack.c.bf16 %v3521_v58, %v3514_v17  ;;  %6288 = vmatpush3.bf16.msk.msra.mxu0 %vm9979_vm14, %v10751_v14 }
 0x19c   :  { %11271 = vst [vmem:[#allocation39_spill] sm:$0xff] %v11270_v29  ;;  %v3653_v10 = vsub.f32 %v9795_v41, %v11272_v2  ;;  %vm9995_vm8 = vmpackc.low %vm11274_vm4, %vm11273_vm11  ;;  %v9999_v30 = vsub.f32 %v4375_v45, %v4375_v45  ;;  %v10001_v1 = vsub.f32 %v4376_v33, %v4376_v33  ;;  %v10674_v2 = vand.u32 4294901760, %v9881_v53  ;;  %v11308_v29 = vld [vmem:[#allocation28_spill] sm:$0xff] }
 0x19d   :  { %v11276_v7 = vsel %vm9995_vm8, 4294967295, %v11275_v7  ;;  %v11278_v48 = vand.u32 4294901760, %v9797_v55  ;;  %v10009_v21 = vsub.f32 %v570_v6, %v9956_v50  ;;  %v10677_v5 = vand.u32 4294901760, %v9941_v4  ;;  %6290 = vmatprep.subr.msk.bf16.mxu0 %vm9995_vm8, %v10751_v14  ;;  %6316 = vmatpush3.bf16.msra.mxu1 %v6315_v52  ;;  %v11305_v52 = vld [vmem:[#allocation25_spill] sm:$0xff] }
 0x19e   :  { %11277 = vst [vmem:[#allocation35_spill] sm:$0xff] %v11276_v7  ;;  %v4963_v58 = vadd.f32 %v4962_v12, %v4961_v38  ;;  %v3528_v45 = vand.u32 4294901760, %v3527_v0  ;;  %v3535_v33 = vand.u32 4294901760, %v3534_v22  ;;  %vm11280_vm11 = vcmp.eq.s32.totalorder %v9706_v31, %v8822_v23  ;;  %v4964_v31 = vpop.f32.mrb[10].mxu0 }
 0x19f   :  { %v3660_v11 = vsub.f32 %v9797_v55, %v11278_v48  ;;  %11279 = vst [vmem:[#allocation15_spill] sm:$0xff] %v10009_v21  ;;  %vm11281_vm4 = vcmp.eq.s32.totalorder %v9717_v43, %v8822_v23  ;;  %v11282_v38 = vmov 0  ;;  %v6317_v6 = vpack.c.bf16 %v3647_v34, %v3640_v61 }
 0x1a0   :  { %vm10026_vm5 = vmpackc.low %vm11281_vm4, %vm11280_vm11  ;;  %v11285_v12 = vand.u32 4294901760, %v9927_v49  ;;  %v3654_v22 = vand.u32 4294901760, %v3653_v10  ;;  %v11286_v48 = vand.u32 4294901760, %v9861_v8  ;;  %v1369_v17 = vadd.f32 %v4963_v58, %v9708_v24  ;;  %v4965_v10 = vpop.f32.mrb[11].mxu0 }
 0x1a1   :  { %v11283_v38 = vsel %vm10026_vm5, 4294967295, %v11282_v38  ;;  %vm11287_vm11 = vcmp.eq.s32.totalorder %v9775_v16, %v8822_v23  ;;  %vm11288_vm4 = vcmp.eq.s32.totalorder %v9778_v18, %v8822_v23  ;;  %v11289_v43 = vmov 0  ;;  %6292 = vmatpush3.bf16.msk.msra.mxu0 %vm10026_vm5, %v10751_v14  ;;  %6318 = vmatprep.subr.bf16.mxu1 %v6317_v6  ;;  %v11307_v6 = vld [vmem:[#allocation27_spill] sm:$0xff] }
 0x1a2   :  { %11284 = vst [vmem:[#allocation20_spill] sm:$0xff] %v11283_v38  ;;  %v3431_v0 = vsub.f32 %v9927_v49, %v11285_v12  ;;  %v3541_v40 = vsub.f32 %v9861_v8, %v11286_v48  ;;  %vm10044_vm8 = vmpackc.low %vm11288_vm4, %vm11287_vm11  ;;  %v3548_v61 = vsub.f32 %v9881_v53, %v10674_v2  ;;  %v3661_v25 = vand.u32 4294901760, %v3660_v11 }
 0x1a3   :  { %v11290_v43 = vsel %vm10044_vm8, 4294967295, %v11289_v43  ;;  %v3667_v18 = vsub.f32 %v9941_v4, %v10677_v5  ;;  %v11292_v58 = vand.u32 4294901760, %v9943_v60  ;;  %v4966_v48 = vadd.f32 %v4965_v10, %v4964_v31  ;;  %6294 = vmatprep.subr.msk.bf16.mxu0 %vm10044_vm8, %v10751_v14  ;;  %v11300_v5 = vld [vmem:[#allocation22_spill] sm:$0xff] }
 0x1a4   :  { %11291 = vst [vmem:[#allocation24_spill] sm:$0xff] %v11290_v43  ;;  %v11293_v2 = vand.u32 4294901760, %v9968_v13  ;;  %vm11294_vm11 = vcmp.eq.s32.totalorder %v9832_v15, %v8822_v23  ;;  %vm11295_vm4 = vcmp.eq.s32.totalorder %v9835_v42, %v8822_v23  ;;  %v11296_v11 = vmov 0 }
 0x1a5   :  { %v3674_v12 = vsub.f32 %v9943_v60, %v11292_v58  ;;  %vm10075_vm14 = vmpackc.low %vm11295_vm4, %vm11294_vm11  ;;  %v6319_v31 = vpack.c.bf16 %v3535_v33, %v3528_v45  ;;  %v3432_v10 = vand.u32 4294901760, %v3431_v0  ;;  %v11299_v58 = vld [vmem:[#allocation19_spill] sm:$0xff]  ;;  %v1376_v24 = vadd.f32 %v4966_v48, %v9767_v27 }
 0x1a6   :  { %v3440_v35 = vsub.f32 %v9968_v13, %v11293_v2  ;;  %v11297_v11 = vsel %vm10075_vm14, 4294967295, %v11296_v11  ;;  %v6329_v16 = vpack.c.bf16 %v11300_v5, %v11299_v58  ;;  %v3542_v2 = vand.u32 4294901760, %v3541_v40  ;;  %v4999_v13 = vpop.f32.mrb[8].mxu1  ;;  %6296 = vmatpush3.bf16.msk.msra.mxu0 %vm10075_vm14, %v10751_v14  ;;  %v11304_v27 = vld [vmem:[#allocation23_spill] sm:$0xff] }
 0x1a7   :  { %11298 = vst [vmem:[#allocation40_spill] sm:$0xff] %v11297_v11  ;;  %v3549_v34 = vand.u32 4294901760, %v3548_v61  ;;  %v11301_v43 = vand.u32 4294901760, %v9999_v30  ;;  %v11302_v23 = vand.u32 4294901760, %v10001_v1  ;;  %v6321_v38 = vpack.c.bf16 %v3661_v25, %v3654_v22  ;;  %v5000_v48 = vpop.f32.mrb[9].mxu1  ;;  %6320 = vmatpush3.bf16.msra.mxu1 %v6319_v31 }
 0x1a8   :  { %v11303_v45 = vand.u32 4294901760, %v10009_v21  ;;  %v3668_v0 = vand.u32 4294901760, %v3667_v18  ;;  %v3675_v40 = vand.u32 4294901760, %v3674_v12  ;;  %v3441_v61 = vand.u32 4294901760, %v3440_v35  ;;  %6330 = vmatprep.subr.bf16.mxu0 %v6329_v16  ;;  %v5002_v49 = vpop.f32.mrb[10].mxu1  ;;  %v11309_v35 = vld [vmem:[#allocation29_spill] sm:$0xff] }
 0x1a9   :  { %v3555_v15 = vsub.f32 %v9999_v30, %v11301_v43  ;;  %v3562_v42 = vsub.f32 %v10001_v1, %v11302_v23  ;;  %v6331_v43 = vpack.c.bf16 %v11305_v52, %v11304_v27  ;;  %v11306_v23 = vld [vmem:[#allocation26_spill] sm:$0xff]  ;;  %v5001_v25 = vadd.f32 %v5000_v48, %v4999_v13  ;;  %3433 = vmatmul.mubr.f32.vlgmr.msra.gmra.mrb[36].mxu0 %v3432_v10  ;;  %v5003_v16 = vpop.f32.mrb[11].mxu1  ;;  %v11310_v10 = vld [vmem:[#allocation32_spill] sm:$0xff] }
 0x1aa   :  { %v3446_v33 = vsub.f32 %v10009_v21, %v11303_v45  ;;  %v6333_v22 = vpack.c.bf16 %v11307_v6, %v11306_v23  ;;  %v6323_v7 = vpack.c.bf16 %v3549_v34, %v3542_v2  ;;  %6322 = vmatprep.subr.bf16.mxu1 %v6321_v38  ;;  %v6325_v21 = vpack.c.bf16 %v3675_v40, %v3668_v0 }
 0x1ab   :  { %v3556_v45 = vand.u32 4294901760, %v3555_v15  ;;  %v3563_v18 = vand.u32 4294901760, %v3562_v42  ;;  %v1480_v11 = vadd.f32 %v5001_v25, %v1369_v17  ;;  %6332 = vmatpush3.bf16.msra.mxu0 %v6331_v43  ;;  %3442 = vmatprep.mubr.f32.mxu0 %v3441_v61  ;;  %v6335_v52 = vpack.c.bf16 %v11309_v35, %v11308_v29  ;;  %v5037_v25 = vpop.f32.mrb[12].mxu0 }
 0x1ac   :  { %v3447_v12 = vand.u32 4294901760, %v3446_v33  ;;  %6334 = vmatprep.subr.bf16.mxu0 %v6333_v22  ;;  %v6337_v13 = vpack.c.bf16 %v9424_v37, %v9383_v28  ;;  %v5004_v31 = vadd.f32 %v5003_v16, %v5002_v49  ;;  %6324 = vmatpush3.bf16.msra.mxu1 %v6323_v7  ;;  %v6339_v17 = vpack.c.bf16 %v9467_v57, %v9426_v3  ;;  %v11312_v49 = vld [vmem:[#allocation11_spill] sm:$0xff]  ;;  %v11313_v7 = vld [vmem:[#allocation12_spill] sm:$0xff] }
 0x1ad   :  { %v6327_v34 = vpack.c.bf16 %v3563_v18, %v3556_v45  ;;  %6326 = vmatprep.subr.bf16.mxu1 %v6325_v21  ;;  %v6341_v2 = vpack.c.bf16 %v11310_v10, %v9496_v26  ;;  %v6343_v21 = vpack.c.bf16 %v11313_v7, %v11312_v49  ;;  %v6347_v0 = vpack.c.bf16 %v9587_v63, %v9580_v51  ;;  %v5038_v45 = vpop.f32.mrb[13].mxu0 }
 0x1ae   :  { %3448 = vmatmul.mubr.f32.gmra.mrb[38].mxu0 %v3447_v12  ;;  %v1487_v38 = vadd.f32 %v5004_v31, %v1376_v24  ;;  %v6345_v24 = vpack.c.bf16 %v9578_v9, %v9544_v39  ;;  %v6349_v40 = vpack.c.bf16 %v9664_v36, %v9644_v46  ;;  %v11317_v43 = vand.u32 4294901760, %v9561_v47 }
 0x1af   :  { %6336 = vmatpush3.bf16.msra.mxu0 %v6335_v52  ;;  %3822 = vmatprep.mubr.f32.mxu0 %v9561_v47  ;;  %v6351_v48 = vpack.c.bf16 %v9793_v32, %v9736_v44  ;;  %v6353_v22 = vpack.c.bf16 %v9797_v55, %v9795_v41  ;;  %v5039_v47 = vadd.f32 %v5038_v45, %v5037_v25  ;;  %v11356_v42 = vand.u32 4294901760, %v9644_v46 }
 0x1b0   :  { %6338 = vmatprep.subr.bf16.mxu0 %v6337_v13  ;;  %6328 = vmatpush3.bf16.msra.mxu1 %v6327_v34  ;;  %v6355_v18 = vpack.c.bf16 %v9881_v53, %v9861_v8  ;;  %v6357_v12 = vpack.c.bf16 %v9943_v60, %v9941_v4  ;;  %v5040_v13 = vpop.f32.mrb[14].mxu0  ;;  %v11360_v46 = vand.u32 4294901760, %v9795_v41  ;;  %v11363_v61 = vand.u32 4294901760, %v9881_v53 }
 0x1b1   :  { %6362 = vmatprep.subr.msk.bf16.mxu1 %vm9621_vm10, %v10751_v14  ;;  %v1599_v16 = vadd.f32 %v5039_v47, %v1480_v11  ;;  %v5041_v31 = vpop.f32.mrb[15].mxu0  ;;  %v11321_v11 = vand.u32 4294901760, %v11300_v5  ;;  %v11326_v5 = vand.u32 4294901760, %v11306_v23  ;;  %v11334_v23 = vand.u32 4294901760, %v11308_v29 }
 0x1b2   :  { %v11366_v53 = vand.u32 4294901760, %v9999_v30 }
 0x1b3   :  { %6340 = vmatpush3.bf16.msra.mxu0 %v6339_v17  ;;  %3680 = vmatmul.mubr.f32.vlgmr.msra.gmra.mrb[36].mxu1 %v9867_v20  ;;  %v5042_v17 = vadd.f32 %v5041_v31, %v5040_v13  ;;  %v11330_v13 = vld [vmem:[#allocation21_spill] sm:$0xff]  ;;  %v11331_v31 = vld [vmem:[#allocation35_spill] sm:$0xff] }
 0x1b4   :  { %6342 = vmatprep.subr.bf16.mxu0 %v6341_v2  ;;  %6364 = vmatpush3.bf16.msk.msra.mxu1 %vm9658_vm9, %v10751_v14  ;;  %v6359_v2 = vpack.c.bf16 %v10001_v1, %v9999_v30  ;;  %vm11332_vm4 = vnez %v11331_v31 }
 0x1b5   :  { %3685 = vmatprep.mubr.f32.mxu1 %v9907_v56  ;;  %6366 = vmatprep.subr.msk.bf16.mxu1 %vm9680_vm15, %v10751_v14 }
 0x1b7   :  { %6344 = vmatpush3.bf16.msra.mxu0 %v6343_v21  ;;  %3687 = vmatmul.mubr.f32.gmra.mrb[38].mxu1 %v9956_v50  ;;  %v11320_v21 = vand.u32 4294901760, %v11299_v58 }
 0x1b8   :  { %6346 = vmatprep.subr.bf16.mxu0 %v6345_v24  ;;  %6368 = vmatpush3.bf16.msk.msra.mxu1 %vm9728_vm13, %v10751_v14 }
 0x1b9   :  { %3938 = vmatprep.mubr.f32.mxu1 %v11317_v43  ;;  %6370 = vmatprep.subr.msk.bf16.mxu1 %vm9751_vm3, %v10751_v14  ;;  %v6393_v24 = vpack.c.bf16 %v11321_v11, %v11320_v21  ;;  %v5075_v43 = vpop.f32.mrb[12].mxu1 }
 0x1ba   :  { %v5076_v58 = vpop.f32.mrb[13].mxu1 }
 0x1bb   :  { %6348 = vmatpush3.bf16.msra.mxu0 %v6347_v0  ;;  %v1614_v0 = vadd.f32 %v5042_v17, %v1487_v38  ;;  %v11327_v38 = vand.u32 4294901760, %v11307_v6  ;;  %v5078_v17 = vpop.f32.mrb[14].mxu1  ;;  %v11335_v6 = vand.u32 4294901760, %v11309_v35  ;;  %v11341_v35 = vand.u32 4294901760, %v9426_v3 }
 0x1bc   :  { %6350 = vmatprep.subr.bf16.mxu0 %v6349_v40  ;;  %6372 = vmatpush3.bf16.msk.msra.mxu1 %vm9789_vm0, %v10751_v14  ;;  %v5079_v11 = vpop.f32.mrb[15].mxu1  ;;  %v11347_v3 = vand.u32 4294901760, %v11312_v49  ;;  %v11353_v49 = vand.u32 4294901760, %v9580_v51  ;;  %v11358_v51 = vand.u32 4294901760, %v9736_v44 }
 0x1bd   :  { %6374 = vmatprep.subr.msk.bf16.mxu1 %vm9809_vm6, %v10751_v14  ;;  %v6397_v47 = vpack.c.bf16 %v11327_v38, %v11326_v5  ;;  %v6399_v21 = vpack.c.bf16 %v11335_v6, %v11334_v23  ;;  %v11344_v5 = vand.u32 4294901760, %v9496_v26  ;;  %v11345_v38 = vand.u32 4294901760, %v11310_v10 }
 0x1be   :  { %v11350_v26 = vand.u32 4294901760, %v9544_v39  ;;  %v11351_v10 = vand.u32 4294901760, %v9578_v9 }
 0x1bf   :  { %6352 = vmatpush3.bf16.msra.mxu0 %v6351_v48  ;;  %v11323_v48 = vand.u32 4294901760, %v11304_v27 }
 0x1c0   :  { %6354 = vmatprep.subr.bf16.mxu0 %v6353_v22  ;;  %6376 = vmatpush3.bf16.msk.msra.mxu1 %vm9857_vm1, %v10751_v14  ;;  %v11324_v22 = vld [vmem:[#allocation25_spill] sm:$0xff]  ;;  %v6409_v23 = vpack.c.bf16 %v11351_v10, %v11350_v26 }
 0x1c1   :  { %6378 = vmatprep.subr.msk.bf16.mxu1 %vm9877_vm12, %v10751_v14  ;;  %v11325_v25 = vand.u32 4294901760, %v11324_v22  ;;  %v5080_v22 = vadd.f32 %v5079_v11, %v5078_v17  ;;  %v11349_v17 = vand.u32 4294901760, %v11330_v13  ;;  %v11365_v11 = vand.u32 4294901760, %v9943_v60 }
 0x1c3   :  { %6356 = vmatpush3.bf16.msra.mxu0 %v6355_v18  ;;  %v6395_v45 = vpack.c.bf16 %v11325_v25, %v11323_v48  ;;  %v5077_v18 = vadd.f32 %v5076_v58, %v5075_v43  ;;  %v11337_v43 = vand.u32 4294901760, %v9424_v37  ;;  %v1853_v29 = vadd.f32 %v5080_v22, %v1614_v0  ;;  %v11343_v37 = vld [vmem:[#allocation33_spill] sm:$0xff] }
 0x1c4   :  { %6358 = vmatprep.subr.bf16.mxu0 %v6357_v12  ;;  %6380 = vmatpush3.bf16.msk.msra.mxu1 %vm9919_vm7, %v10751_v14  ;;  %v11328_v12 = vld [vmem:[#allocation39_spill] sm:$0xff] }
 0x1c5   :  { %6382 = vmatprep.subr.msk.bf16.mxu1 %vm9937_vm2, %v10751_v14  ;;  %vm11329_vm11 = vnez %v11328_v12  ;;  %v1846_v27 = vadd.f32 %v5077_v18, %v1599_v16  ;;  %v11339_v16 = vld [vmem:[#allocation15_spill] sm:$0xff] }
 0x1c6   :  { %v11355_v9 = vand.u32 4294901760, %v11339_v16 }
 0x1c7   :  { %6360 = vmatpush3.bf16.msra.mxu0 %v6359_v2  ;;  %v11333_v2 = vld [vmem:[#allocation38_spill] sm:$0xff] }
 0x1c8   :  { %6394 = vmatprep.subr.bf16.mxu0 %v6393_v24  ;;  %6384 = vmatpush3.bf16.msk.msra.mxu1 %vm11329_vm11, %v10751_v14  ;;  %v11336_v24 = vand.u32 4294901760, %v9383_v28  ;;  %v11342_v28 = vand.u32 4294901760, %v9467_v57  ;;  %v11348_v57 = vand.u32 4294901760, %v11313_v7  ;;  %v11352_v15 = vand.u32 4294901760, %v11333_v2 }
 0x1c9   :  { %6386 = vmatprep.subr.msk.bf16.mxu1 %vm11332_vm4, %v10751_v14  ;;  %v11354_v7 = vand.u32 4294901760, %v9587_v63  ;;  %v11359_v63 = vand.u32 4294901760, %v9793_v32  ;;  %v5113_v52 = vpop.f32.mrb[16].mxu0  ;;  %v11362_v32 = vand.u32 4294901760, %v9861_v8 }
 0x1ca   :  { %3825 = vmatmul.mubr.f32.vlgmr.msra.gmra.mrb[40].mxu0 %v11330_v13  ;;  %v6401_v48 = vpack.c.bf16 %v11337_v43, %v11336_v24  ;;  %v6403_v58 = vpack.c.bf16 %v11342_v28, %v11341_v35  ;;  %v6407_v0 = vpack.c.bf16 %v11348_v57, %v11347_v3  ;;  %v11357_v13 = vand.u32 4294901760, %v9664_v36 }
 0x1cb   :  { %6396 = vmatpush3.bf16.msra.mxu0 %v6395_v45  ;;  %3831 = vmatprep.mubr.f32.mxu0 %v11333_v2  ;;  %v6411_v39 = vpack.c.bf16 %v11354_v7, %v11353_v49  ;;  %v6415_v33 = vpack.c.bf16 %v11359_v63, %v11358_v51  ;;  %v11361_v36 = vand.u32 4294901760, %v9797_v55  ;;  %v6419_v41 = vpack.c.bf16 %v11363_v61, %v11362_v32 }
 0x1cc   :  { %6398 = vmatprep.subr.bf16.mxu0 %v6397_v47  ;;  %6388 = vmatpush3.bf16.msk.msra.mxu1 %vm10026_vm5, %v10751_v14  ;;  %v6405_v47 = vpack.c.bf16 %v11345_v38, %v11344_v5  ;;  %v6413_v2 = vpack.c.bf16 %v11357_v13, %v11356_v42  ;;  %v11364_v55 = vand.u32 4294901760, %v9941_v4  ;;  %v11367_v4 = vand.u32 4294901760, %v10001_v1 }
 0x1cd   :  { %6390 = vmatprep.subr.msk.bf16.mxu1 %vm10044_vm8, %v10751_v14  ;;  %v6417_v6 = vpack.c.bf16 %v11361_v36, %v11360_v46 }
 0x1ce   :  { %3834 = vmatmul.mubr.f32.gmra.mrb[42].mxu0 %v11339_v16  ;;  %v6421_v24 = vpack.c.bf16 %v11365_v11, %v11364_v55 }
 0x1cf   :  { %6400 = vmatpush3.bf16.msra.mxu0 %v6399_v21  ;;  %4119 = vmatprep.mubr.f32.mxu0 %v11343_v37  ;;  %v5114_v21 = vpop.f32.mrb[17].mxu0 }
 0x1d0   :  { %6402 = vmatprep.subr.bf16.mxu0 %v6401_v48  ;;  %6392 = vmatpush3.bf16.msk.msra.mxu1 %vm10075_vm14, %v10751_v14  ;;  %v5115_v44 = vadd.f32 %v5114_v21, %v5113_v52  ;;  %v5116_v43 = vpop.f32.mrb[18].mxu0  ;;  %v6423_v48 = vpack.c.bf16 %v11367_v4, %v11366_v53 }
 0x1d1   :  { %6426 = vmatprep.subr.msk.bf16.mxu1 %vm9621_vm10, %v10751_v14  ;;  %v5117_v54 = vpop.f32.mrb[19].mxu0 }
 0x1d2   :  { %v1991_v62 = vadd.f32 %v5115_v44, %v1846_v27  ;;  %v5118_v8 = vadd.f32 %v5117_v54, %v5116_v43  ;;  %v5151_v19 = vpop.f32.mrb[16].mxu1 }
 0x1d3   :  { %6404 = vmatpush3.bf16.msra.mxu0 %v6403_v58  ;;  %3942 = vmatmul.mubr.f32.vlgmr.msra.gmra.mrb[40].mxu1 %v11349_v17  ;;  %v5152_v34 = vpop.f32.mrb[17].mxu1 }
 0x1d4   :  { %6406 = vmatprep.subr.bf16.mxu0 %v6405_v47  ;;  %6428 = vmatpush3.bf16.msk.msra.mxu1 %vm9658_vm9, %v10751_v14  ;;  %v2000_v60 = vadd.f32 %v5118_v8, %v1853_v29  ;;  %v5153_v27 = vadd.f32 %v5152_v34, %v5151_v19 }
 0x1d5   :  { %3949 = vmatprep.mubr.f32.mxu1 %v11352_v15  ;;  %6430 = vmatprep.subr.msk.bf16.mxu1 %vm9680_vm15, %v10751_v14 }
 0x1d6   :  { %v2108_v59 = vadd.f32 %v5153_v27, %v1991_v62  ;;  %v5154_v1 = vpop.f32.mrb[18].mxu1 }
 0x1d7   :  { %6408 = vmatpush3.bf16.msra.mxu0 %v6407_v0  ;;  %3953 = vmatmul.mubr.f32.gmra.mrb[42].mxu1 %v11355_v9  ;;  %v5155_v30 = vpop.f32.mrb[19].mxu1 }
 0x1d8   :  { %6410 = vmatprep.subr.bf16.mxu0 %v6409_v23  ;;  %6432 = vmatpush3.bf16.msk.msra.mxu1 %vm9728_vm13, %v10751_v14  ;;  %v5156_v40 = vadd.f32 %v5155_v30, %v5154_v1 }
 0x1d9   :  { %4230 = vmatprep.mubr.f32.mxu1 %v11343_v37  ;;  %6434 = vmatprep.subr.msk.bf16.mxu1 %vm9751_vm3, %v10751_v14 }
 0x1da   :  { %v2119_v12 = vadd.f32 %v5156_v40, %v2000_v60 }
 0x1db   :  { %6412 = vmatpush3.bf16.msra.mxu0 %v6411_v39 }
 0x1dc   :  { %6414 = vmatprep.subr.bf16.mxu0 %v6413_v2  ;;  %6436 = vmatpush3.bf16.msk.msra.mxu1 %vm9789_vm0, %v10751_v14 }
 0x1dd   :  { %6438 = vmatprep.subr.msk.bf16.mxu1 %vm9809_vm6, %v10751_v14 }
 0x1df   :  { %6416 = vmatpush3.bf16.msra.mxu0 %v6415_v33 }
 0x1e0   :  { %6418 = vmatprep.subr.bf16.mxu0 %v6417_v6  ;;  %6440 = vmatpush3.bf16.msk.msra.mxu1 %vm9857_vm1, %v10751_v14 }
 0x1e1   :  { %6442 = vmatprep.subr.msk.bf16.mxu1 %vm9877_vm12, %v10751_v14 }
 0x1e3   :  { %6420 = vmatpush3.bf16.msra.mxu0 %v6419_v41 }
 0x1e4   :  { %6422 = vmatprep.subr.bf16.mxu0 %v6421_v24  ;;  %6444 = vmatpush3.bf16.msk.msra.mxu1 %vm9919_vm7, %v10751_v14 }
 0x1e5   :  { %6446 = vmatprep.subr.msk.bf16.mxu1 %vm9937_vm2, %v10751_v14 }
 0x1e7   :  { %6424 = vmatpush3.bf16.msra.mxu0 %v6423_v48 }
 0x1e8   :  { %6448 = vmatpush3.bf16.msk.msra.mxu1 %vm11329_vm11, %v10751_v14 }
 0x1e9   :  { %6450 = vmatprep.subr.msk.bf16.mxu1 %vm11332_vm4, %v10751_v14  ;;  %v5189_v31 = vpop.f32.mrb[20].mxu0 }
 0x1ea   :  { %4121 = vmatmul.mubr.f32.vlgmr.msra.gmra.mrb[44].mxu0 %v9867_v20  ;;  %v5190_v22 = vpop.f32.mrb[21].mxu0 }
 0x1eb   :  { %4126 = vmatprep.mubr.f32.mxu0 %v9907_v56  ;;  %v5191_v25 = vadd.f32 %v5190_v22, %v5189_v31 }
 0x1ec   :  { %6452 = vmatpush3.bf16.msk.msra.mxu1 %vm10026_vm5, %v10751_v14 }
 0x1ed   :  { %6454 = vmatprep.subr.msk.bf16.mxu1 %vm10044_vm8, %v10751_v14  ;;  %v2287_v16 = vadd.f32 %v5191_v25, %v2108_v59 }
 0x1ee   :  { %4128 = vmatmul.mubr.f32.gmra.mrb[46].mxu0 %v9956_v50  ;;  %v5192_v29 = vpop.f32.mrb[22].mxu0 }
 0x1ef   :  { %v5193_v35 = vpop.f32.mrb[23].mxu0 }
 0x1f0   :  { %6456 = vmatpush3.bf16.msk.msra.mxu1 %vm10075_vm14, %v10751_v14  ;;  %v5194_v28 = vadd.f32 %v5193_v35, %v5192_v29 }
 0x1f2   :  { %v2294_v45 = vadd.f32 %v5194_v28, %v2119_v12 }
 0x1f3   :  { %4232 = vmatmul.mubr.f32.vlgmr.msra.gmra.mrb[44].mxu1 %v9867_v20  ;;  %v5227_v58 = vpop.f32.mrb[20].mxu1 }
 0x1f4   :  { %4237 = vmatprep.mubr.f32.mxu1 %v9907_v56  ;;  %v5228_v37 = vpop.f32.mrb[21].mxu1 }
 0x1f5   :  { %v5229_v5 = vadd.f32 %v5228_v37, %v5227_v58 }
 0x1f7   :  { %4239 = vmatmul.mubr.f32.gmra.mrb[46].mxu1 %v9956_v50  ;;  %v2398_v38 = vadd.f32 %v5229_v5, %v2287_v16  ;;  %v5230_v47 = vpop.f32.mrb[22].mxu1 }
 0x1f8   :  { %v5231_v14 = vpop.f32.mrb[23].mxu1 }
 0x1f9   :  { %v5232_v18 = vadd.f32 %v5231_v14, %v5230_v47 }
 0x1fb   :  { %v2405_v20 = vadd.f32 %v5232_v18, %v2294_v45 }
 0x210   :  { %v5265_v3 = vpop.f32.mrb[24].mxu0 }
 0x211   :  { %v5266_v56 = vpop.f32.mrb[25].mxu0 }
 0x212   :  { %v5267_v57 = vadd.f32 %v5266_v56, %v5265_v3 }
 0x214   :  { %v2517_v50 = vadd.f32 %v5267_v57, %v2398_v38  ;;  %v5268_v0 = vpop.f32.mrb[26].mxu0 }
 0x215   :  { %v5269_v17 = vpop.f32.mrb[27].mxu0 }
 0x216   :  { %v5270_v26 = vadd.f32 %v5269_v17, %v5268_v0 }
 0x218   :  { %v2532_v10 = vadd.f32 %v5270_v26, %v2405_v20 }
 0x219   :  { %v5303_v23 = vpop.f32.mrb[24].mxu1 }
 0x21a   :  { %v5304_v15 = vpop.f32.mrb[25].mxu1 }
 0x21b   :  { %v5305_v49 = vadd.f32 %v5304_v15, %v5303_v23 }
 0x21d   :  { %v2764_v7 = vadd.f32 %v5305_v49, %v2517_v50  ;;  %v5306_v39 = vpop.f32.mrb[26].mxu1 }
 0x21e   :  { %v5307_v9 = vpop.f32.mrb[27].mxu1 }
 0x21f   :  { %v5308_v42 = vadd.f32 %v5307_v9, %v5306_v39 }
 0x221   :  { %v2771_v13 = vadd.f32 %v5308_v42, %v2532_v10 }
 0x230   :  { %v5341_v2 = vpop.f32.mrb[28].mxu0 }
 0x231   :  { %v5342_v51 = vpop.f32.mrb[29].mxu0 }
 0x232   :  { %v5343_v63 = vadd.f32 %v5342_v51, %v5341_v2 }
 0x234   :  { %v2909_v33 = vadd.f32 %v5343_v63, %v2764_v7  ;;  %v5344_v46 = vpop.f32.mrb[30].mxu0 }
 0x235   :  { %v5345_v36 = vpop.f32.mrb[31].mxu0 }
 0x236   :  { %v5346_v6 = vadd.f32 %v5345_v36, %v5344_v46 }
 0x238   :  { %v2918_v52 = vadd.f32 %v5346_v6, %v2771_v13 }
 0x23d   :  { %v5379_v21 = vpop.f32.mrb[28].mxu1 }
 0x23e   :  { %v5380_v44 = vpop.f32.mrb[29].mxu1 }
 0x23f   :  { %v5381_v32 = vadd.f32 %v5380_v44, %v5379_v21 }
 0x241   :  { %v3026_v61 = vadd.f32 %v5381_v32, %v2909_v33  ;;  %v5382_v41 = vpop.f32.mrb[30].mxu1 }
 0x242   :  { %v5383_v55 = vpop.f32.mrb[31].mxu1 }
 0x243   :  { %v5384_v11 = vadd.f32 %v5383_v55, %v5382_v41 }
 0x245   :  { %v3037_v24 = vadd.f32 %v5384_v11, %v2918_v52 }
 0x255   :  { %v5417_v62 = vpop.f32.mrb[32].mxu0 }
 0x256   :  { %v5418_v43 = vpop.f32.mrb[33].mxu0 }
 0x257   :  { %v5419_v54 = vadd.f32 %v5418_v43, %v5417_v62 }
 0x259   :  { %v3205_v8 = vadd.f32 %v5419_v54, %v3026_v61  ;;  %v5420_v53 = vpop.f32.mrb[34].mxu0 }
 0x25a   :  { %v5421_v4 = vpop.f32.mrb[35].mxu0 }
 0x25b   :  { %v5422_v48 = vadd.f32 %v5421_v4, %v5420_v53 }
 0x25d   :  { %v3212_v60 = vadd.f32 %v5422_v48, %v3037_v24 }
 0x25f   :  { %v5455_v19 = vpop.f32.mrb[32].mxu1 }
 0x260   :  { %v5456_v34 = vpop.f32.mrb[33].mxu1 }
 0x261   :  { %v5457_v27 = vadd.f32 %v5456_v34, %v5455_v19 }
 0x263   :  { %v3316_v59 = vadd.f32 %v5457_v27, %v3205_v8  ;;  %v5458_v1 = vpop.f32.mrb[34].mxu1 }
 0x264   :  { %v5459_v30 = vpop.f32.mrb[35].mxu1 }
 0x265   :  { %v5460_v40 = vadd.f32 %v5459_v30, %v5458_v1 }
 0x267   :  { %v3323_v12 = vadd.f32 %v5460_v40, %v3212_v60 }
 0x27c   :  { %v5493_v31 = vpop.f32.mrb[36].mxu0 }
 0x27d   :  { %v5494_v22 = vpop.f32.mrb[37].mxu0 }
 0x27e   :  { %v5495_v25 = vadd.f32 %v5494_v22, %v5493_v31 }
 0x280   :  { %v3435_v16 = vadd.f32 %v5495_v25, %v3316_v59 }
 0x281   :  { %v5496_v29 = vpop.f32.mrb[38].mxu0 }
 0x282   :  { %v5497_v35 = vpop.f32.mrb[39].mxu0 }
 0x283   :  { %v5498_v28 = vadd.f32 %v5497_v35, %v5496_v29 }
 0x285   :  { %v3450_v45 = vadd.f32 %v5498_v28, %v3323_v12 }
 0x286   :  { %v5531_v58 = vpop.f32.mrb[36].mxu1 }
 0x287   :  { %v5532_v37 = vpop.f32.mrb[37].mxu1 }
 0x288   :  { %v5533_v5 = vadd.f32 %v5532_v37, %v5531_v58 }
 0x28a   :  { %v3682_v38 = vadd.f32 %v5533_v5, %v3435_v16  ;;  %v5534_v47 = vpop.f32.mrb[38].mxu1 }
 0x28b   :  { %v5535_v14 = vpop.f32.mrb[39].mxu1 }
 0x28c   :  { %v5536_v18 = vadd.f32 %v5535_v14, %v5534_v47 }
 0x28e   :  { %v3689_v20 = vadd.f32 %v5536_v18, %v3450_v45 }
 0x29d   :  { %v5569_v3 = vpop.f32.mrb[40].mxu0 }
 0x29e   :  { %v5570_v56 = vpop.f32.mrb[41].mxu0 }
 0x29f   :  { %v5571_v57 = vadd.f32 %v5570_v56, %v5569_v3 }
 0x2a1   :  { %v3827_v50 = vadd.f32 %v5571_v57, %v3682_v38  ;;  %v5572_v0 = vpop.f32.mrb[42].mxu0 }
 0x2a2   :  { %v5573_v17 = vpop.f32.mrb[43].mxu0 }
 0x2a3   :  { %v5574_v26 = vadd.f32 %v5573_v17, %v5572_v0 }
 0x2a5   :  { %v3836_v10 = vadd.f32 %v5574_v26, %v3689_v20 }
 0x2a6   :  { %v5607_v23 = vpop.f32.mrb[40].mxu1 }
 0x2a7   :  { %v5608_v15 = vpop.f32.mrb[41].mxu1 }
 0x2a8   :  { %v5609_v49 = vadd.f32 %v5608_v15, %v5607_v23 }
 0x2aa   :  { %v3944_v7 = vadd.f32 %v5609_v49, %v3827_v50  ;;  %v5610_v39 = vpop.f32.mrb[42].mxu1 }
 0x2ab   :  { %v5611_v9 = vpop.f32.mrb[43].mxu1 }
 0x2ac   :  { %v5612_v42 = vadd.f32 %v5611_v9, %v5610_v39 }
 0x2ae   :  { %v3955_v13 = vadd.f32 %v5612_v42, %v3836_v10 }
 0x2bd   :  { %v5645_v2 = vpop.f32.mrb[44].mxu0 }
 0x2be   :  { %v5646_v51 = vpop.f32.mrb[45].mxu0 }
 0x2bf   :  { %v5647_v63 = vadd.f32 %v5646_v51, %v5645_v2 }
 0x2c1   :  { %v4123_v33 = vadd.f32 %v5647_v63, %v3944_v7  ;;  %v5648_v46 = vpop.f32.mrb[46].mxu0 }
 0x2c2   :  { %v5649_v36 = vpop.f32.mrb[47].mxu0 }
 0x2c3   :  { %v5650_v6 = vadd.f32 %v5649_v36, %v5648_v46 }
 0x2c5   :  { %v4130_v52 = vadd.f32 %v5650_v6, %v3955_v13 }
 0x2c6   :  { %v5683_v21 = vpop.f32.mrb[44].mxu1 }
 0x2c7   :  { %v5684_v44 = vpop.f32.mrb[45].mxu1 }
 0x2c8   :  { %v5685_v32 = vadd.f32 %v5684_v44, %v5683_v21 }
 0x2ca   :  { %v4234_v61 = vadd.f32 %v5685_v32, %v4123_v33  ;;  %v5686_v41 = vpop.f32.mrb[46].mxu1 }
 0x2cb   :  { %v5687_v55 = vpop.f32.mrb[47].mxu1 }
 0x2cc   :  { %4244 = vst [vmem:[#allocation7] sm:$0xff] %v4234_v61  ;;  %v5688_v11 = vadd.f32 %v5687_v55, %v5686_v41 }
 0x2ce   :  { %v4241_v24 = vadd.f32 %v5688_v11, %v4130_v52 }
 0x2d0   :  { %4245 = vst [vmem:[#allocation7 + $0x8] sm:$0xff] %v4241_v24 }
 0x2d1   :  { %6523 = shalt.err (!%p6520_p6)
}
 0x2d2   :  { %s6524_s11 = scalar_lea.hbm %s10321_s2, 256 }
 0x2d3   :  { %p6525_p7 = scmp.ne.s32.totalorder %s10321_s2, %s6524_s11  ;;  %p6528_p8 = scmp.lt.u32.totalorder %s6524_s11, %s10321_s2 }
 0x2d5   :  { %p6530_p9 = pnand %p6528_p8, %p6525_p7 }
 0x2d7   :  { %6533 = shalt.err (!%p6530_p9)
}
 0x2d8   :  { %s6547_s16 = smov 128   ;;  %s6548_s17 = smov 8  }
 0x2d9   :  { %4257 = dma.vmem_to_hbm [thread:$0]  %s4252_s7, 256, %s10321_s2, [#allocation4], %s6547_s16, %s6547_s16, %s6548_s17  }
 0x2da   :  { %6538 = dma.done.wait [#allocation4], 256  }
 0x2db   :  { %6539 = vsyncadd [#allocation4], 4294967040 }
 0x2dc   :  { %4261 = vsyncpa [#allocation3], 1 }
 0x2dd   :  { %4262 = vsyncpa [#allocation6], 1 }
 0x2de   :  { %4263 = vsyncpa [#allocation4], 1 }

</bundles_post_ra>
